<compile_context>
chip_gen: v6e
topology: v6e:2x2x1
jax: 0.10.0
libtpu: 0.0.40
codegen_flags: <defaults>
</compile_context>

<pallas_src>
import functools

import jax
import jax.numpy as jnp
from jax import lax
from jax.experimental import pallas as pl
from jax.experimental.pallas import tpu as pltpu


def _sigmoid(x):
    # One EUP op (tanh) instead of exp + reciprocal.
    return 0.5 * jnp.tanh(0.5 * x) + 0.5


def _rnn_maxpool_kernel(embeds_ref, lengths_ref, wih_ref, whh_ref, b_ref,
                        out_ref, gx_ref, *, matmul_dtype):
    T, BB, E = embeds_ref.shape
    S2, G = whh_ref.shape            # S2 = 2*Hp (fused state), G = 8*Hp (fused gates)
    Hp = S2 // 2

    lengths = lengths_ref[...]                   # (BB, 1) int32
    wih = wih_ref[...].astype(matmul_dtype)      # (E, G)
    whh = whh_ref[...].astype(matmul_dtype)      # (S2, G), block-diagonal fwd/bwd
    bias = b_ref[...]                            # (1, G) f32, bias_ih + bias_hh

    # ---- Hoisted input projection (off the recurrent critical path). ----
    # T independent (BB, E) x (E, G) matmuls with a shared RHS, bias folded in.
    for t in range(T):
        x_t = embeds_ref[t].astype(matmul_dtype)
        gx_ref[t] = jnp.dot(x_t, wih, preferred_element_type=jnp.float32) + bias

    # Lane maps (hoisted out of the loop): within every 2*Hp gate slab and within
    # the state, the first Hp lanes belong to the forward direction.
    lane_g = lax.broadcasted_iota(jnp.int32, (1, G), 1)
    fwd_g = (lane_g % S2) < Hp                   # (1, G)  bool
    lane_s = lax.broadcasted_iota(jnp.int32, (1, S2), 1)
    fwd_s = lane_s < Hp                          # (1, S2) bool

    h0 = jnp.zeros((BB, S2), jnp.float32)
    c0 = jnp.zeros((BB, S2), jnp.float32)
    p0 = jnp.full((BB, S2), -jnp.inf, jnp.float32)

    # ---- Fused fwd/bwd recurrence: fwd lanes use time t, bwd lanes use T-1-t. ----
    def body(t, carry):
        h, c, pooled = carry
        tb = T - 1 - t
        gx = jnp.where(fwd_g, gx_ref[t], gx_ref[tb])                  # (BB, G)
        gates = jnp.dot(h.astype(matmul_dtype), whh,
                        preferred_element_type=jnp.float32) + gx      # (BB, G)
        i = _sigmoid(gates[:, 0 * S2:1 * S2])
        f = _sigmoid(gates[:, 1 * S2:2 * S2])
        g = jnp.tanh(gates[:, 2 * S2:3 * S2])
        o = _sigmoid(gates[:, 3 * S2:4 * S2])
        c_new = f * c + i * g
        h_new = o * jnp.tanh(c_new)
        # Packed-sequence mask: fwd lanes valid iff t < len, bwd lanes iff tb < len.
        m_f = t < lengths                                             # (BB, 1)
        m_b = tb < lengths                                            # (BB, 1)
        mask = (fwd_s & m_f) | (jnp.logical_not(fwd_s) & m_b)         # (BB, S2)
        h = jnp.where(mask, h_new, h)
        c = jnp.where(mask, c_new, c)
        pooled = jnp.where(mask, jnp.maximum(pooled, h_new), pooled)
        return h, c, pooled

    _, _, pooled = lax.fori_loop(0, T, body, (h0, c0, p0), unroll=True)

    out_ref[...] = pooled            # lane-dense (BB, 2*Hp) store


def pack_bilstm_params(raw, H, E):
    """Pack PyTorch-layout bi-LSTM params into the fused, 128-lane-aligned layout.

    raw: dict with w_ih_{f,b} (4H, E), w_hh_{f,b} (4H, H), b_ih_{f,b}, b_hh_{f,b} (4H,)
    Returns (wih (E, 8Hp), whh (2Hp, 8Hp), bias (1, 8Hp), Hp).
    """
    Hp = ((H + 63) // 64) * 64       # per-direction width padded so 2*Hp % 128 == 0
    S2 = 2 * Hp
    G = 4 * S2                       # gate slabs [i | f | g | o], each [fwd Hp | bwd Hp]
    wih = jnp.zeros((E, G), jnp.float32)
    whh = jnp.zeros((S2, G), jnp.float32)
    bias = jnp.zeros((1, G), jnp.float32)
    dirs = [(0, raw["w_ih_f"], raw["w_hh_f"], raw["b_ih_f"], raw["b_hh_f"]),
            (1, raw["w_ih_b"], raw["w_hh_b"], raw["b_ih_b"], raw["b_hh_b"])]
    for d, w_ih, w_hh, b_ih, b_hh in dirs:
        row0 = d * Hp
        for g in range(4):           # PyTorch gate order [i, f, g, o]
            col0 = g * S2 + d * Hp
            wih = wih.at[:, col0:col0 + H].set(w_ih[g * H:(g + 1) * H, :].T)
            whh = whh.at[row0:row0 + H, col0:col0 + H].set(w_hh[g * H:(g + 1) * H, :].T)
            bias = bias.at[:, col0:col0 + H].set(
                (b_ih[g * H:(g + 1) * H] + b_hh[g * H:(g + 1) * H])[None, :])
    return wih, whh, bias, Hp


def rnn_maxpool(embeds_tm, lengths, packed, H, *, block_b=None,
                matmul_dtype=jnp.float32):
    """embeds_tm: (T, B, E) f32; lengths: (B, 1) i32 → (B, 2H) f32.

    matmul_dtype=jnp.bfloat16 feeds the MXU bf16 operands on v6e/v7x (state and
    elementwise math stay f32).
    """
    wih, whh, bias, Hp = packed
    T, B, E = embeds_tm.shape
    S2, G = whh.shape
    if block_b is None:
        block_b = B
    assert B % block_b == 0 and (block_b == B or block_b % 8 == 0)

    kernel = functools.partial(_rnn_maxpool_kernel, matmul_dtype=matmul_dtype)
    out_padded = pl.pallas_call(
        kernel,
        out_shape=jax.ShapeDtypeStruct((B, S2), jnp.float32),
        grid_spec=pltpu.PrefetchScalarGridSpec(
            num_scalar_prefetch=0,
            grid=(B // block_b,),
            in_specs=[
                pl.BlockSpec((T, block_b, E), lambda j: (0, j, 0)),
                pl.BlockSpec((block_b, 1), lambda j: (j, 0)),
                pl.BlockSpec((E, G), lambda j: (0, 0)),
                pl.BlockSpec((S2, G), lambda j: (0, 0)),
                pl.BlockSpec((1, G), lambda j: (0, 0)),
            ],
            out_specs=pl.BlockSpec((block_b, S2), lambda j: (j, 0)),
            scratch_shapes=[pltpu.VMEM((T, block_b, G), jnp.float32)],
        ),
        compiler_params=pltpu.CompilerParams(
            dimension_semantics=("parallel",),
            vmem_limit_bytes=32 * 1024 * 1024,
        ),
    )(embeds_tm, lengths, wih, whh, bias)

    # Drop the per-direction lane padding: [fwd real H | bwd real H].
    return jnp.concatenate([out_padded[:, :H], out_padded[:, Hp:Hp + H]], axis=-1)


def reference(embeds_tm, lengths, raw, H):
    """Pure-JAX reference with identical packed-LSTM + masked maxpool semantics."""
    T, B, E = embeds_tm.shape

    def make_cell(w_ih, w_hh, b_ih, b_hh):
        W, U = w_ih.T, w_hh.T
        b = (b_ih + b_hh)[None, :]

        def cell(x, h, c):
            gates = x @ W + h @ U + b
            i = jax.nn.sigmoid(gates[:, 0 * H:1 * H])
            f = jax.nn.sigmoid(gates[:, 1 * H:2 * H])
            g = jnp.tanh(gates[:, 2 * H:3 * H])
            o = jax.nn.sigmoid(gates[:, 3 * H:4 * H])
            c_new = f * c + i * g
            return o * jnp.tanh(c_new), c_new
        return cell

    def run_dir(cell, reverse):
        def step(carry, t):
            h, c, pooled = carry
            h_new, c_new = cell(embeds_tm[t], h, c)
            mask = t < lengths
            h = jnp.where(mask, h_new, h)
            c = jnp.where(mask, c_new, c)
            pooled = jnp.where(mask, jnp.maximum(pooled, h_new), pooled)
            return (h, c, pooled), None

        ts = jnp.arange(T)
        if reverse:
            ts = ts[::-1]
        init = (jnp.zeros((B, H), jnp.float32),
                jnp.zeros((B, H), jnp.float32),
                jnp.full((B, H), -jnp.inf, jnp.float32))
        (_, _, pooled), _ = lax.scan(step, init, ts)
        return pooled

    pf = run_dir(make_cell(raw["w_ih_f"], raw["w_hh_f"], raw["b_ih_f"], raw["b_hh_f"]), False)
    pb = run_dir(make_cell(raw["w_ih_b"], raw["w_hh_b"], raw["b_ih_b"], raw["b_hh_b"]), True)
    return jnp.concatenate([pf, pb], axis=-1)


if __name__ == "__main__":
    embed_size, hidden_size, vocab_size = 16, 32, 50
    batch, max_len = 4, 8
    seq_lens = jnp.array([8, 5, 7, 3], dtype=jnp.int32)     # variable-length batch (>= 1)

    key = jax.random.PRNGKey(0)
    keys = jax.random.split(key, 10)

    # nn.Embedding(vocab_size+1, embed_size, padding_idx=vocab_size); pad row zero.
    emb_table = 0.1 * jax.random.normal(keys[0], (vocab_size + 1, embed_size), jnp.float32)
    emb_table = emb_table.at[vocab_size].set(0.0)
    ids = jax.random.randint(keys[1], (batch, max_len), 0, vocab_size)
    pos = jnp.arange(max_len)[None, :]
    ids = jnp.where(pos < seq_lens[:, None], ids, vocab_size)

    # PyTorch-native LSTM param layout: weight_ih (4H, E), weight_hh (4H, H), biases (4H,).
    scale = 1.0 / float(hidden_size) ** 0.5
    u = lambda k, shp: jax.random.uniform(k, shp, jnp.float32, -scale, scale)
    raw = {
        "w_ih_f": u(keys[2], (4 * hidden_size, embed_size)),
        "w_hh_f": u(keys[3], (4 * hidden_size, hidden_size)),
        "b_ih_f": u(keys[4], (4 * hidden_size,)),
        "b_hh_f": u(keys[5], (4 * hidden_size,)),
        "w_ih_b": u(keys[6], (4 * hidden_size, embed_size)),
        "w_hh_b": u(keys[7], (4 * hidden_size, hidden_size)),
        "b_ih_b": u(keys[8], (4 * hidden_size,)),
        "b_hh_b": u(keys[9], (4 * hidden_size,)),
    }

    # Embedding lookup (plain JAX gather glue), then time-major for the kernel.
    embeds = emb_table[ids]                           # (B, T, E)
    embeds_tm = jnp.transpose(embeds, (1, 0, 2))      # (T, B, E)
    lengths = seq_lens[:, None].astype(jnp.int32)     # (B, 1)

    packed = pack_bilstm_params(raw, hidden_size, embed_size)
    out = jax.block_until_ready(rnn_maxpool(embeds_tm, lengths, packed, hidden_size))
    ref = reference(embeds_tm, lengths, raw, hidden_size)

    assert out.shape == (batch, 2 * hidden_size)
    err = jnp.max(jnp.abs(out - ref))
    assert jnp.allclose(out, ref, rtol=5e-5, atol=5e-5), err
    print("KERNEL_OK")
</pallas_src>

<mosaic_0001>
module attributes {stable_mosaic.version = 11 : i64} {
  func.func @_rnn_maxpool_kernel(%arg0: i32, %arg1: memref<8x4x16xf32, #tpu.memory_space<vmem>>, %arg2: memref<4x1xi32, #tpu.memory_space<vmem>>, %arg3: memref<16x512xf32, #tpu.memory_space<vmem>>, %arg4: memref<128x512xf32, #tpu.memory_space<vmem>>, %arg5: memref<1x512xf32, #tpu.memory_space<vmem>>, %arg6: memref<4x128xf32, #tpu.memory_space<vmem>>, %arg7: memref<8x4x512xf32, #tpu.memory_space<vmem>>) attributes {dimension_semantics = [#tpu.dimension_semantics<parallel>], iteration_bounds = array<i64: 1>, scalar_prefetch = 0 : i64, scratch_operands = 1 : i64, tpu.core_type = #tpu.core_type<tc>, window_params = [{transform_indices = @transform_0, window_bounds = array<i64: 8, 4, 16>}, {transform_indices = @transform_1, window_bounds = array<i64: 4, 1>}, {pipeline_mode = #tpu.pipeline_mode<synchronous>, transform_indices = @transform_2, window_bounds = array<i64: 16, 512>}, {pipeline_mode = #tpu.pipeline_mode<synchronous>, transform_indices = @transform_3, window_bounds = array<i64: 128, 512>}, {pipeline_mode = #tpu.pipeline_mode<synchronous>, transform_indices = @transform_4, window_bounds = array<i64: 1, 512>}, {transform_indices = @transform_5, window_bounds = array<i64: 4, 128>}]} {
    %c0 = arith.constant 0 : index
    %c0_0 = arith.constant 0 : index
    %0 = vector.load %arg2[%c0, %c0_0] : memref<4x1xi32, #tpu.memory_space<vmem>>, vector<4x1xi32>
    %c0_1 = arith.constant 0 : index
    %c0_2 = arith.constant 0 : index
    %1 = vector.load %arg3[%c0_1, %c0_2] : memref<16x512xf32, #tpu.memory_space<vmem>>, vector<16x512xf32>
    %c0_3 = arith.constant 0 : index
    %c0_4 = arith.constant 0 : index
    %2 = vector.load %arg4[%c0_3, %c0_4] : memref<128x512xf32, #tpu.memory_space<vmem>>, vector<128x512xf32>
    %c0_5 = arith.constant 0 : index
    %c0_6 = arith.constant 0 : index
    %3 = vector.load %arg5[%c0_5, %c0_6] : memref<1x512xf32, #tpu.memory_space<vmem>>, vector<1x512xf32>
    %c0_7 = arith.constant 0 : index
    %c0_8 = arith.constant 0 : index
    %c0_9 = arith.constant 0 : index
    %4 = vector.load %arg1[%c0_7, %c0_8, %c0_9] : memref<8x4x16xf32, #tpu.memory_space<vmem>>, vector<1x4x16xf32>
    %5 = vector.shape_cast %4 : vector<1x4x16xf32> to vector<4x16xf32>
    %cst = arith.constant dense<0.000000e+00> : vector<4x512xf32>
    %6 = tpu.matmul %5, %1, %cst {dimension_numbers = #tpu.dot_dimension_numbers<[1], [0], [0], [1], [0, 0, 1, 1], [], []>} : vector<4x16xf32>, vector<16x512xf32>, vector<4x512xf32> -> vector<4x512xf32>
    %7 = vector.broadcast %3 : vector<1x512xf32> to vector<4x512xf32>
    %8 = arith.addf %6, %7 : vector<4x512xf32>
    %c0_10 = arith.constant 0 : index
    %c0_11 = arith.constant 0 : index
    %c0_12 = arith.constant 0 : index
    %9 = vector.load %arg7[%c0_10, %c0_11, %c0_12] : memref<8x4x512xf32, #tpu.memory_space<vmem>>, vector<1x4x512xf32>
    %10 = vector.shape_cast %9 : vector<1x4x512xf32> to vector<4x512xf32>
    %11 = vector.shape_cast %8 : vector<4x512xf32> to vector<1x4x512xf32>
    tpu.vector_store %arg7[%c0_10, %c0_11, %c0_12], %11 {strides = array<i32>} : memref<8x4x512xf32, #tpu.memory_space<vmem>>, vector<1x4x512xf32>,
    %c1 = arith.constant 1 : index
    %c0_13 = arith.constant 0 : index
    %c0_14 = arith.constant 0 : index
    %12 = vector.load %arg1[%c1, %c0_13, %c0_14] : memref<8x4x16xf32, #tpu.memory_space<vmem>>, vector<1x4x16xf32>
    %13 = vector.shape_cast %12 : vector<1x4x16xf32> to vector<4x16xf32>
    %cst_15 = arith.constant dense<0.000000e+00> : vector<4x512xf32>
    %14 = tpu.matmul %13, %1, %cst_15 {dimension_numbers = #tpu.dot_dimension_numbers<[1], [0], [0], [1], [0, 0, 1, 1], [], []>} : vector<4x16xf32>, vector<16x512xf32>, vector<4x512xf32> -> vector<4x512xf32>
    %15 = vector.broadcast %3 : vector<1x512xf32> to vector<4x512xf32>
    %16 = arith.addf %14, %15 : vector<4x512xf32>
    %c1_16 = arith.constant 1 : index
    %c0_17 = arith.constant 0 : index
    %c0_18 = arith.constant 0 : index
    %17 = vector.load %arg7[%c1_16, %c0_17, %c0_18] : memref<8x4x512xf32, #tpu.memory_space<vmem>>, vector<1x4x512xf32>
    %18 = vector.shape_cast %17 : vector<1x4x512xf32> to vector<4x512xf32>
    %19 = vector.shape_cast %16 : vector<4x512xf32> to vector<1x4x512xf32>
    tpu.vector_store %arg7[%c1_16, %c0_17, %c0_18], %19 {strides = array<i32>} : memref<8x4x512xf32, #tpu.memory_space<vmem>>, vector<1x4x512xf32>,
    %c2 = arith.constant 2 : index
    %c0_19 = arith.constant 0 : index
    %c0_20 = arith.constant 0 : index
    %20 = vector.load %arg1[%c2, %c0_19, %c0_20] : memref<8x4x16xf32, #tpu.memory_space<vmem>>, vector<1x4x16xf32>
    %21 = vector.shape_cast %20 : vector<1x4x16xf32> to vector<4x16xf32>
    %cst_21 = arith.constant dense<0.000000e+00> : vector<4x512xf32>
    %22 = tpu.matmul %21, %1, %cst_21 {dimension_numbers = #tpu.dot_dimension_numbers<[1], [0], [0], [1], [0, 0, 1, 1], [], []>} : vector<4x16xf32>, vector<16x512xf32>, vector<4x512xf32> -> vector<4x512xf32>
    %23 = vector.broadcast %3 : vector<1x512xf32> to vector<4x512xf32>
    %24 = arith.addf %22, %23 : vector<4x512xf32>
    %c2_22 = arith.constant 2 : index
    %c0_23 = arith.constant 0 : index
    %c0_24 = arith.constant 0 : index
    %25 = vector.load %arg7[%c2_22, %c0_23, %c0_24] : memref<8x4x512xf32, #tpu.memory_space<vmem>>, vector<1x4x512xf32>
    %26 = vector.shape_cast %25 : vector<1x4x512xf32> to vector<4x512xf32>
    %27 = vector.shape_cast %24 : vector<4x512xf32> to vector<1x4x512xf32>
    tpu.vector_store %arg7[%c2_22, %c0_23, %c0_24], %27 {strides = array<i32>} : memref<8x4x512xf32, #tpu.memory_space<vmem>>, vector<1x4x512xf32>,
    %c3 = arith.constant 3 : index
    %c0_25 = arith.constant 0 : index
    %c0_26 = arith.constant 0 : index
    %28 = vector.load %arg1[%c3, %c0_25, %c0_26] : memref<8x4x16xf32, #tpu.memory_space<vmem>>, vector<1x4x16xf32>
    %29 = vector.shape_cast %28 : vector<1x4x16xf32> to vector<4x16xf32>
    %cst_27 = arith.constant dense<0.000000e+00> : vector<4x512xf32>
    %30 = tpu.matmul %29, %1, %cst_27 {dimension_numbers = #tpu.dot_dimension_numbers<[1], [0], [0], [1], [0, 0, 1, 1], [], []>} : vector<4x16xf32>, vector<16x512xf32>, vector<4x512xf32> -> vector<4x512xf32>
    %31 = vector.broadcast %3 : vector<1x512xf32> to vector<4x512xf32>
    %32 = arith.addf %30, %31 : vector<4x512xf32>
    %c3_28 = arith.constant 3 : index
    %c0_29 = arith.constant 0 : index
    %c0_30 = arith.constant 0 : index
    %33 = vector.load %arg7[%c3_28, %c0_29, %c0_30] : memref<8x4x512xf32, #tpu.memory_space<vmem>>, vector<1x4x512xf32>
    %34 = vector.shape_cast %33 : vector<1x4x512xf32> to vector<4x512xf32>
    %35 = vector.shape_cast %32 : vector<4x512xf32> to vector<1x4x512xf32>
    tpu.vector_store %arg7[%c3_28, %c0_29, %c0_30], %35 {strides = array<i32>} : memref<8x4x512xf32, #tpu.memory_space<vmem>>, vector<1x4x512xf32>,
    %c4 = arith.constant 4 : index
    %c0_31 = arith.constant 0 : index
    %c0_32 = arith.constant 0 : index
    %36 = vector.load %arg1[%c4, %c0_31, %c0_32] : memref<8x4x16xf32, #tpu.memory_space<vmem>>, vector<1x4x16xf32>
    %37 = vector.shape_cast %36 : vector<1x4x16xf32> to vector<4x16xf32>
    %cst_33 = arith.constant dense<0.000000e+00> : vector<4x512xf32>
    %38 = tpu.matmul %37, %1, %cst_33 {dimension_numbers = #tpu.dot_dimension_numbers<[1], [0], [0], [1], [0, 0, 1, 1], [], []>} : vector<4x16xf32>, vector<16x512xf32>, vector<4x512xf32> -> vector<4x512xf32>
    %39 = vector.broadcast %3 : vector<1x512xf32> to vector<4x512xf32>
    %40 = arith.addf %38, %39 : vector<4x512xf32>
    %c4_34 = arith.constant 4 : index
    %c0_35 = arith.constant 0 : index
    %c0_36 = arith.constant 0 : index
    %41 = vector.load %arg7[%c4_34, %c0_35, %c0_36] : memref<8x4x512xf32, #tpu.memory_space<vmem>>, vector<1x4x512xf32>
    %42 = vector.shape_cast %41 : vector<1x4x512xf32> to vector<4x512xf32>
    %43 = vector.shape_cast %40 : vector<4x512xf32> to vector<1x4x512xf32>
    tpu.vector_store %arg7[%c4_34, %c0_35, %c0_36], %43 {strides = array<i32>} : memref<8x4x512xf32, #tpu.memory_space<vmem>>, vector<1x4x512xf32>,
    %c5 = arith.constant 5 : index
    %c0_37 = arith.constant 0 : index
    %c0_38 = arith.constant 0 : index
    %44 = vector.load %arg1[%c5, %c0_37, %c0_38] : memref<8x4x16xf32, #tpu.memory_space<vmem>>, vector<1x4x16xf32>
    %45 = vector.shape_cast %44 : vector<1x4x16xf32> to vector<4x16xf32>
    %cst_39 = arith.constant dense<0.000000e+00> : vector<4x512xf32>
    %46 = tpu.matmul %45, %1, %cst_39 {dimension_numbers = #tpu.dot_dimension_numbers<[1], [0], [0], [1], [0, 0, 1, 1], [], []>} : vector<4x16xf32>, vector<16x512xf32>, vector<4x512xf32> -> vector<4x512xf32>
    %47 = vector.broadcast %3 : vector<1x512xf32> to vector<4x512xf32>
    %48 = arith.addf %46, %47 : vector<4x512xf32>
    %c5_40 = arith.constant 5 : index
    %c0_41 = arith.constant 0 : index
    %c0_42 = arith.constant 0 : index
    %49 = vector.load %arg7[%c5_40, %c0_41, %c0_42] : memref<8x4x512xf32, #tpu.memory_space<vmem>>, vector<1x4x512xf32>
    %50 = vector.shape_cast %49 : vector<1x4x512xf32> to vector<4x512xf32>
    %51 = vector.shape_cast %48 : vector<4x512xf32> to vector<1x4x512xf32>
    tpu.vector_store %arg7[%c5_40, %c0_41, %c0_42], %51 {strides = array<i32>} : memref<8x4x512xf32, #tpu.memory_space<vmem>>, vector<1x4x512xf32>,
    %c6 = arith.constant 6 : index
    %c0_43 = arith.constant 0 : index
    %c0_44 = arith.constant 0 : index
    %52 = vector.load %arg1[%c6, %c0_43, %c0_44] : memref<8x4x16xf32, #tpu.memory_space<vmem>>, vector<1x4x16xf32>
    %53 = vector.shape_cast %52 : vector<1x4x16xf32> to vector<4x16xf32>
    %cst_45 = arith.constant dense<0.000000e+00> : vector<4x512xf32>
    %54 = tpu.matmul %53, %1, %cst_45 {dimension_numbers = #tpu.dot_dimension_numbers<[1], [0], [0], [1], [0, 0, 1, 1], [], []>} : vector<4x16xf32>, vector<16x512xf32>, vector<4x512xf32> -> vector<4x512xf32>
    %55 = vector.broadcast %3 : vector<1x512xf32> to vector<4x512xf32>
    %56 = arith.addf %54, %55 : vector<4x512xf32>
    %c6_46 = arith.constant 6 : index
    %c0_47 = arith.constant 0 : index
    %c0_48 = arith.constant 0 : index
    %57 = vector.load %arg7[%c6_46, %c0_47, %c0_48] : memref<8x4x512xf32, #tpu.memory_space<vmem>>, vector<1x4x512xf32>
    %58 = vector.shape_cast %57 : vector<1x4x512xf32> to vector<4x512xf32>
    %59 = vector.shape_cast %56 : vector<4x512xf32> to vector<1x4x512xf32>
    tpu.vector_store %arg7[%c6_46, %c0_47, %c0_48], %59 {strides = array<i32>} : memref<8x4x512xf32, #tpu.memory_space<vmem>>, vector<1x4x512xf32>,
    %c7 = arith.constant 7 : index
    %c0_49 = arith.constant 0 : index
    %c0_50 = arith.constant 0 : index
    %60 = vector.load %arg1[%c7, %c0_49, %c0_50] : memref<8x4x16xf32, #tpu.memory_space<vmem>>, vector<1x4x16xf32>
    %61 = vector.shape_cast %60 : vector<1x4x16xf32> to vector<4x16xf32>
    %cst_51 = arith.constant dense<0.000000e+00> : vector<4x512xf32>
    %62 = tpu.matmul %61, %1, %cst_51 {dimension_numbers = #tpu.dot_dimension_numbers<[1], [0], [0], [1], [0, 0, 1, 1], [], []>} : vector<4x16xf32>, vector<16x512xf32>, vector<4x512xf32> -> vector<4x512xf32>
    %63 = vector.broadcast %3 : vector<1x512xf32> to vector<4x512xf32>
    %64 = arith.addf %62, %63 : vector<4x512xf32>
    %c7_52 = arith.constant 7 : index
    %c0_53 = arith.constant 0 : index
    %c0_54 = arith.constant 0 : index
    %65 = vector.load %arg7[%c7_52, %c0_53, %c0_54] : memref<8x4x512xf32, #tpu.memory_space<vmem>>, vector<1x4x512xf32>
    %66 = vector.shape_cast %65 : vector<1x4x512xf32> to vector<4x512xf32>
    %67 = vector.shape_cast %64 : vector<4x512xf32> to vector<1x4x512xf32>
    tpu.vector_store %arg7[%c7_52, %c0_53, %c0_54], %67 {strides = array<i32>} : memref<8x4x512xf32, #tpu.memory_space<vmem>>, vector<1x4x512xf32>,
    %68 = tpu.iota {dimensions = array<i32: 1>} : vector<1x512xi32>
    %c128_i32 = arith.constant 128 : i32
    %c0_i32 = arith.constant 0 : i32
    %69 = arith.cmpi eq, %c128_i32, %c0_i32 : i32
    %c1_i32 = arith.constant 1 : i32
    %70 = arith.select %69, %c1_i32, %c128_i32 : i32
    %71 = vector.broadcast %70 : i32 to vector<1x512xi32>
    %72 = arith.remsi %68, %71 : vector<1x512xi32>
    %c0_i32_55 = arith.constant 0 : i32
    %73 = vector.broadcast %c0_i32_55 : i32 to vector<1x512xi32>
    %74 = arith.cmpi ne, %72, %73 : vector<1x512xi32>
    %c0_i32_56 = arith.constant 0 : i32
    %75 = vector.broadcast %c0_i32_56 : i32 to vector<1x512xi32>
    %76 = arith.cmpi slt, %72, %75 : vector<1x512xi32>
    %c0_i32_57 = arith.constant 0 : i32
    %77 = arith.cmpi slt, %70, %c0_i32_57 : i32
    %78 = vector.broadcast %77 : i1 to vector<1x512xi1>
    %79 = vector.broadcast %78 : vector<1x512xi1> to vector<1x512xi1>
    %80 = arith.xori %76, %79 : vector<1x512xi1>
    %81 = arith.andi %80, %74 : vector<1x512xi1>
    %82 = vector.broadcast %70 : i32 to vector<1x512xi32>
    %83 = arith.addi %72, %82 : vector<1x512xi32>
    %84 = arith.select %81, %83, %72 : vector<1x512xi1>, vector<1x512xi32>
    %c64_i32 = arith.constant 64 : i32
    %85 = vector.broadcast %c64_i32 : i32 to vector<1x512xi32>
    %86 = arith.cmpi slt, %84, %85 : vector<1x512xi32>
    %87 = tpu.iota {dimensions = array<i32: 1>} : vector<1x128xi32>
    %c64_i32_58 = arith.constant 64 : i32
    %88 = vector.broadcast %c64_i32_58 : i32 to vector<1x128xi32>
    %89 = arith.cmpi slt, %87, %88 : vector<1x128xi32>
    %cst_59 = arith.constant 0.000000e+00 : f32
    %90 = vector.broadcast %cst_59 : f32 to vector<4x128xf32>
    %cst_60 = arith.constant 0.000000e+00 : f32
    %91 = vector.broadcast %cst_60 : f32 to vector<4x128xf32>
    %cst_61 = arith.constant 0xFF800000 : f32
    %92 = vector.broadcast %cst_61 : f32 to vector<4x128xf32>
    %c0_i32_62 = arith.constant 0 : i32
    %c7_i32 = arith.constant 7 : i32
    %93 = arith.subi %c7_i32, %c0_i32_62 : i32
    %94 = arith.index_cast %c0_i32_62 : i32 to index
    %c0_63 = arith.constant 0 : index
    %c0_64 = arith.constant 0 : index
    %95 = vector.load %arg7[%94, %c0_63, %c0_64] : memref<8x4x512xf32, #tpu.memory_space<vmem>>, vector<1x4x512xf32>
    %96 = vector.shape_cast %95 : vector<1x4x512xf32> to vector<4x512xf32>
    %97 = arith.index_cast %93 : i32 to index
    %c0_65 = arith.constant 0 : index
    %c0_66 = arith.constant 0 : index
    %98 = vector.load %arg7[%97, %c0_65, %c0_66] : memref<8x4x512xf32, #tpu.memory_space<vmem>>, vector<1x4x512xf32>
    %99 = vector.shape_cast %98 : vector<1x4x512xf32> to vector<4x512xf32>
    %100 = vector.shape_cast %86 : vector<1x512xi1> to vector<1x512xi1>
    %101 = vector.broadcast %100 : vector<1x512xi1> to vector<4x512xi1>
    %102 = arith.select %101, %96, %99 : vector<4x512xi1>, vector<4x512xf32>
    %cst_67 = arith.constant dense<0.000000e+00> : vector<4x512xf32>
    %103 = tpu.matmul %90, %2, %cst_67 {dimension_numbers = #tpu.dot_dimension_numbers<[1], [0], [0], [1], [0, 0, 1, 1], [], []>} : vector<4x128xf32>, vector<128x512xf32>, vector<4x512xf32> -> vector<4x512xf32>
    %104 = arith.addf %103, %102 : vector<4x512xf32>
    %105 = vector.extract_strided_slice %104 {offsets = [0, 0], sizes = [4, 128], strides = [1, 1]} : vector<4x512xf32> to vector<4x128xf32>
    %cst_68 = arith.constant 5.000000e-01 : f32
    %106 = vector.broadcast %cst_68 : f32 to vector<4x128xf32>
    %107 = arith.mulf %106, %105 : vector<4x128xf32>
    %108 = math.tanh %107 : vector<4x128xf32>
    %cst_69 = arith.constant 5.000000e-01 : f32
    %109 = vector.broadcast %cst_69 : f32 to vector<4x128xf32>
    %110 = arith.mulf %109, %108 : vector<4x128xf32>
    %cst_70 = arith.constant 5.000000e-01 : f32
    %111 = vector.broadcast %cst_70 : f32 to vector<4x128xf32>
    %112 = arith.addf %110, %111 : vector<4x128xf32>
    %113 = vector.extract_strided_slice %104 {offsets = [0, 128], sizes = [4, 128], strides = [1, 1]} : vector<4x512xf32> to vector<4x128xf32>
    %cst_71 = arith.constant 5.000000e-01 : f32
    %114 = vector.broadcast %cst_71 : f32 to vector<4x128xf32>
    %115 = arith.mulf %114, %113 : vector<4x128xf32>
    %116 = math.tanh %115 : vector<4x128xf32>
    %cst_72 = arith.constant 5.000000e-01 : f32
    %117 = vector.broadcast %cst_72 : f32 to vector<4x128xf32>
    %118 = arith.mulf %117, %116 : vector<4x128xf32>
    %cst_73 = arith.constant 5.000000e-01 : f32
    %119 = vector.broadcast %cst_73 : f32 to vector<4x128xf32>
    %120 = arith.addf %118, %119 : vector<4x128xf32>
    %121 = vector.extract_strided_slice %104 {offsets = [0, 256], sizes = [4, 128], strides = [1, 1]} : vector<4x512xf32> to vector<4x128xf32>
    %122 = math.tanh %121 : vector<4x128xf32>
    %123 = vector.extract_strided_slice %104 {offsets = [0, 384], sizes = [4, 128], strides = [1, 1]} : vector<4x512xf32> to vector<4x128xf32>
    %cst_74 = arith.constant 5.000000e-01 : f32
    %124 = vector.broadcast %cst_74 : f32 to vector<4x128xf32>
    %125 = arith.mulf %124, %123 : vector<4x128xf32>
    %126 = math.tanh %125 : vector<4x128xf32>
    %cst_75 = arith.constant 5.000000e-01 : f32
    %127 = vector.broadcast %cst_75 : f32 to vector<4x128xf32>
    %128 = arith.mulf %127, %126 : vector<4x128xf32>
    %cst_76 = arith.constant 5.000000e-01 : f32
    %129 = vector.broadcast %cst_76 : f32 to vector<4x128xf32>
    %130 = arith.addf %128, %129 : vector<4x128xf32>
    %131 = arith.mulf %120, %91 : vector<4x128xf32>
    %132 = arith.mulf %112, %122 : vector<4x128xf32>
    %133 = arith.addf %131, %132 : vector<4x128xf32>
    %134 = math.tanh %133 : vector<4x128xf32>
    %135 = arith.mulf %130, %134 : vector<4x128xf32>
    %136 = vector.broadcast %c0_i32_62 : i32 to vector<4x1xi32>
    %137 = arith.cmpi slt, %136, %0 : vector<4x1xi32>
    %138 = vector.broadcast %93 : i32 to vector<4x1xi32>
    %139 = arith.cmpi slt, %138, %0 : vector<4x1xi32>
    %140 = vector.broadcast %89 : vector<1x128xi1> to vector<4x128xi1>
    %141 = vector.broadcast %137 : vector<4x1xi1> to vector<4x128xi1>
    %142 = arith.andi %140, %141 : vector<4x128xi1>
    %cst_77 = arith.constant dense<true> : vector<1x128xi1>
    %143 = arith.xori %89, %cst_77 : vector<1x128xi1>
    %144 = vector.broadcast %143 : vector<1x128xi1> to vector<4x128xi1>
    %145 = vector.broadcast %139 : vector<4x1xi1> to vector<4x128xi1>
    %146 = arith.andi %144, %145 : vector<4x128xi1>
    %147 = arith.ori %142, %146 : vector<4x128xi1>
    %148 = arith.select %147, %135, %90 : vector<4x128xi1>, vector<4x128xf32>
    %149 = arith.select %147, %133, %91 : vector<4x128xi1>, vector<4x128xf32>
    %150 = arith.maximumf %92, %135 : vector<4x128xf32>
    %151 = arith.select %147, %150, %92 : vector<4x128xi1>, vector<4x128xf32>
    %c1_i32_78 = arith.constant 1 : i32
    %c7_i32_79 = arith.constant 7 : i32
    %152 = arith.subi %c7_i32_79, %c1_i32_78 : i32
    %153 = arith.index_cast %c1_i32_78 : i32 to index
    %c0_80 = arith.constant 0 : index
    %c0_81 = arith.constant 0 : index
    %154 = vector.load %arg7[%153, %c0_80, %c0_81] : memref<8x4x512xf32, #tpu.memory_space<vmem>>, vector<1x4x512xf32>
    %155 = vector.shape_cast %154 : vector<1x4x512xf32> to vector<4x512xf32>
    %156 = arith.index_cast %152 : i32 to index
    %c0_82 = arith.constant 0 : index
    %c0_83 = arith.constant 0 : index
    %157 = vector.load %arg7[%156, %c0_82, %c0_83] : memref<8x4x512xf32, #tpu.memory_space<vmem>>, vector<1x4x512xf32>
    %158 = vector.shape_cast %157 : vector<1x4x512xf32> to vector<4x512xf32>
    %159 = vector.shape_cast %86 : vector<1x512xi1> to vector<1x512xi1>
    %160 = vector.broadcast %159 : vector<1x512xi1> to vector<4x512xi1>
    %161 = arith.select %160, %155, %158 : vector<4x512xi1>, vector<4x512xf32>
    %cst_84 = arith.constant dense<0.000000e+00> : vector<4x512xf32>
    %162 = tpu.matmul %148, %2, %cst_84 {dimension_numbers = #tpu.dot_dimension_numbers<[1], [0], [0], [1], [0, 0, 1, 1], [], []>} : vector<4x128xf32>, vector<128x512xf32>, vector<4x512xf32> -> vector<4x512xf32>
    %163 = arith.addf %162, %161 : vector<4x512xf32>
    %164 = vector.extract_strided_slice %163 {offsets = [0, 0], sizes = [4, 128], strides = [1, 1]} : vector<4x512xf32> to vector<4x128xf32>
    %cst_85 = arith.constant 5.000000e-01 : f32
    %165 = vector.broadcast %cst_85 : f32 to vector<4x128xf32>
    %166 = arith.mulf %165, %164 : vector<4x128xf32>
    %167 = math.tanh %166 : vector<4x128xf32>
    %cst_86 = arith.constant 5.000000e-01 : f32
    %168 = vector.broadcast %cst_86 : f32 to vector<4x128xf32>
    %169 = arith.mulf %168, %167 : vector<4x128xf32>
    %cst_87 = arith.constant 5.000000e-01 : f32
    %170 = vector.broadcast %cst_87 : f32 to vector<4x128xf32>
    %171 = arith.addf %169, %170 : vector<4x128xf32>
    %172 = vector.extract_strided_slice %163 {offsets = [0, 128], sizes = [4, 128], strides = [1, 1]} : vector<4x512xf32> to vector<4x128xf32>
    %cst_88 = arith.constant 5.000000e-01 : f32
    %173 = vector.broadcast %cst_88 : f32 to vector<4x128xf32>
    %174 = arith.mulf %173, %172 : vector<4x128xf32>
    %175 = math.tanh %174 : vector<4x128xf32>
    %cst_89 = arith.constant 5.000000e-01 : f32
    %176 = vector.broadcast %cst_89 : f32 to vector<4x128xf32>
    %177 = arith.mulf %176, %175 : vector<4x128xf32>
    %cst_90 = arith.constant 5.000000e-01 : f32
    %178 = vector.broadcast %cst_90 : f32 to vector<4x128xf32>
    %179 = arith.addf %177, %178 : vector<4x128xf32>
    %180 = vector.extract_strided_slice %163 {offsets = [0, 256], sizes = [4, 128], strides = [1, 1]} : vector<4x512xf32> to vector<4x128xf32>
    %181 = math.tanh %180 : vector<4x128xf32>
    %182 = vector.extract_strided_slice %163 {offsets = [0, 384], sizes = [4, 128], strides = [1, 1]} : vector<4x512xf32> to vector<4x128xf32>
    %cst_91 = arith.constant 5.000000e-01 : f32
    %183 = vector.broadcast %cst_91 : f32 to vector<4x128xf32>
    %184 = arith.mulf %183, %182 : vector<4x128xf32>
    %185 = math.tanh %184 : vector<4x128xf32>
    %cst_92 = arith.constant 5.000000e-01 : f32
    %186 = vector.broadcast %cst_92 : f32 to vector<4x128xf32>
    %187 = arith.mulf %186, %185 : vector<4x128xf32>
    %cst_93 = arith.constant 5.000000e-01 : f32
    %188 = vector.broadcast %cst_93 : f32 to vector<4x128xf32>
    %189 = arith.addf %187, %188 : vector<4x128xf32>
    %190 = arith.mulf %179, %149 : vector<4x128xf32>
    %191 = arith.mulf %171, %181 : vector<4x128xf32>
    %192 = arith.addf %190, %191 : vector<4x128xf32>
    %193 = math.tanh %192 : vector<4x128xf32>
    %194 = arith.mulf %189, %193 : vector<4x128xf32>
    %195 = vector.broadcast %c1_i32_78 : i32 to vector<4x1xi32>
    %196 = arith.cmpi slt, %195, %0 : vector<4x1xi32>
    %197 = vector.broadcast %152 : i32 to vector<4x1xi32>
    %198 = arith.cmpi slt, %197, %0 : vector<4x1xi32>
    %199 = vector.broadcast %89 : vector<1x128xi1> to vector<4x128xi1>
    %200 = vector.broadcast %196 : vector<4x1xi1> to vector<4x128xi1>
    %201 = arith.andi %199, %200 : vector<4x128xi1>
    %cst_94 = arith.constant dense<true> : vector<1x128xi1>
    %202 = arith.xori %89, %cst_94 : vector<1x128xi1>
    %203 = vector.broadcast %202 : vector<1x128xi1> to vector<4x128xi1>
    %204 = vector.broadcast %198 : vector<4x1xi1> to vector<4x128xi1>
    %205 = arith.andi %203, %204 : vector<4x128xi1>
    %206 = arith.ori %201, %205 : vector<4x128xi1>
    %207 = arith.select %206, %194, %148 : vector<4x128xi1>, vector<4x128xf32>
    %208 = arith.select %206, %192, %149 : vector<4x128xi1>, vector<4x128xf32>
    %209 = arith.maximumf %151, %194 : vector<4x128xf32>
    %210 = arith.select %206, %209, %151 : vector<4x128xi1>, vector<4x128xf32>
    %c2_i32 = arith.constant 2 : i32
    %c7_i32_95 = arith.constant 7 : i32
    %211 = arith.subi %c7_i32_95, %c2_i32 : i32
    %212 = arith.index_cast %c2_i32 : i32 to index
    %c0_96 = arith.constant 0 : index
    %c0_97 = arith.constant 0 : index
    %213 = vector.load %arg7[%212, %c0_96, %c0_97] : memref<8x4x512xf32, #tpu.memory_space<vmem>>, vector<1x4x512xf32>
    %214 = vector.shape_cast %213 : vector<1x4x512xf32> to vector<4x512xf32>
    %215 = arith.index_cast %211 : i32 to index
    %c0_98 = arith.constant 0 : index
    %c0_99 = arith.constant 0 : index
    %216 = vector.load %arg7[%215, %c0_98, %c0_99] : memref<8x4x512xf32, #tpu.memory_space<vmem>>, vector<1x4x512xf32>
    %217 = vector.shape_cast %216 : vector<1x4x512xf32> to vector<4x512xf32>
    %218 = vector.shape_cast %86 : vector<1x512xi1> to vector<1x512xi1>
    %219 = vector.broadcast %218 : vector<1x512xi1> to vector<4x512xi1>
    %220 = arith.select %219, %214, %217 : vector<4x512xi1>, vector<4x512xf32>
    %cst_100 = arith.constant dense<0.000000e+00> : vector<4x512xf32>
    %221 = tpu.matmul %207, %2, %cst_100 {dimension_numbers = #tpu.dot_dimension_numbers<[1], [0], [0], [1], [0, 0, 1, 1], [], []>} : vector<4x128xf32>, vector<128x512xf32>, vector<4x512xf32> -> vector<4x512xf32>
    %222 = arith.addf %221, %220 : vector<4x512xf32>
    %223 = vector.extract_strided_slice %222 {offsets = [0, 0], sizes = [4, 128], strides = [1, 1]} : vector<4x512xf32> to vector<4x128xf32>
    %cst_101 = arith.constant 5.000000e-01 : f32
    %224 = vector.broadcast %cst_101 : f32 to vector<4x128xf32>
    %225 = arith.mulf %224, %223 : vector<4x128xf32>
    %226 = math.tanh %225 : vector<4x128xf32>
    %cst_102 = arith.constant 5.000000e-01 : f32
    %227 = vector.broadcast %cst_102 : f32 to vector<4x128xf32>
    %228 = arith.mulf %227, %226 : vector<4x128xf32>
    %cst_103 = arith.constant 5.000000e-01 : f32
    %229 = vector.broadcast %cst_103 : f32 to vector<4x128xf32>
    %230 = arith.addf %228, %229 : vector<4x128xf32>
    %231 = vector.extract_strided_slice %222 {offsets = [0, 128], sizes = [4, 128], strides = [1, 1]} : vector<4x512xf32> to vector<4x128xf32>
    %cst_104 = arith.constant 5.000000e-01 : f32
    %232 = vector.broadcast %cst_104 : f32 to vector<4x128xf32>
    %233 = arith.mulf %232, %231 : vector<4x128xf32>
    %234 = math.tanh %233 : vector<4x128xf32>
    %cst_105 = arith.constant 5.000000e-01 : f32
    %235 = vector.broadcast %cst_105 : f32 to vector<4x128xf32>
    %236 = arith.mulf %235, %234 : vector<4x128xf32>
    %cst_106 = arith.constant 5.000000e-01 : f32
    %237 = vector.broadcast %cst_106 : f32 to vector<4x128xf32>
    %238 = arith.addf %236, %237 : vector<4x128xf32>
    %239 = vector.extract_strided_slice %222 {offsets = [0, 256], sizes = [4, 128], strides = [1, 1]} : vector<4x512xf32> to vector<4x128xf32>
    %240 = math.tanh %239 : vector<4x128xf32>
    %241 = vector.extract_strided_slice %222 {offsets = [0, 384], sizes = [4, 128], strides = [1, 1]} : vector<4x512xf32> to vector<4x128xf32>
    %cst_107 = arith.constant 5.000000e-01 : f32
    %242 = vector.broadcast %cst_107 : f32 to vector<4x128xf32>
    %243 = arith.mulf %242, %241 : vector<4x128xf32>
    %244 = math.tanh %243 : vector<4x128xf32>
    %cst_108 = arith.constant 5.000000e-01 : f32
    %245 = vector.broadcast %cst_108 : f32 to vector<4x128xf32>
    %246 = arith.mulf %245, %244 : vector<4x128xf32>
    %cst_109 = arith.constant 5.000000e-01 : f32
    %247 = vector.broadcast %cst_109 : f32 to vector<4x128xf32>
    %248 = arith.addf %246, %247 : vector<4x128xf32>
    %249 = arith.mulf %238, %208 : vector<4x128xf32>
    %250 = arith.mulf %230, %240 : vector<4x128xf32>
    %251 = arith.addf %249, %250 : vector<4x128xf32>
    %252 = math.tanh %251 : vector<4x128xf32>
    %253 = arith.mulf %248, %252 : vector<4x128xf32>
    %254 = vector.broadcast %c2_i32 : i32 to vector<4x1xi32>
    %255 = arith.cmpi slt, %254, %0 : vector<4x1xi32>
    %256 = vector.broadcast %211 : i32 to vector<4x1xi32>
    %257 = arith.cmpi slt, %256, %0 : vector<4x1xi32>
    %258 = vector.broadcast %89 : vector<1x128xi1> to vector<4x128xi1>
    %259 = vector.broadcast %255 : vector<4x1xi1> to vector<4x128xi1>
    %260 = arith.andi %258, %259 : vector<4x128xi1>
    %cst_110 = arith.constant dense<true> : vector<1x128xi1>
    %261 = arith.xori %89, %cst_110 : vector<1x128xi1>
    %262 = vector.broadcast %261 : vector<1x128xi1> to vector<4x128xi1>
    %263 = vector.broadcast %257 : vector<4x1xi1> to vector<4x128xi1>
    %264 = arith.andi %262, %263 : vector<4x128xi1>
    %265 = arith.ori %260, %264 : vector<4x128xi1>
    %266 = arith.select %265, %253, %207 : vector<4x128xi1>, vector<4x128xf32>
    %267 = arith.select %265, %251, %208 : vector<4x128xi1>, vector<4x128xf32>
    %268 = arith.maximumf %210, %253 : vector<4x128xf32>
    %269 = arith.select %265, %268, %210 : vector<4x128xi1>, vector<4x128xf32>
    %c3_i32 = arith.constant 3 : i32
    %c7_i32_111 = arith.constant 7 : i32
    %270 = arith.subi %c7_i32_111, %c3_i32 : i32
    %271 = arith.index_cast %c3_i32 : i32 to index
    %c0_112 = arith.constant 0 : index
    %c0_113 = arith.constant 0 : index
    %272 = vector.load %arg7[%271, %c0_112, %c0_113] : memref<8x4x512xf32, #tpu.memory_space<vmem>>, vector<1x4x512xf32>
    %273 = vector.shape_cast %272 : vector<1x4x512xf32> to vector<4x512xf32>
    %274 = arith.index_cast %270 : i32 to index
    %c0_114 = arith.constant 0 : index
    %c0_115 = arith.constant 0 : index
    %275 = vector.load %arg7[%274, %c0_114, %c0_115] : memref<8x4x512xf32, #tpu.memory_space<vmem>>, vector<1x4x512xf32>
    %276 = vector.shape_cast %275 : vector<1x4x512xf32> to vector<4x512xf32>
    %277 = vector.shape_cast %86 : vector<1x512xi1> to vector<1x512xi1>
    %278 = vector.broadcast %277 : vector<1x512xi1> to vector<4x512xi1>
    %279 = arith.select %278, %273, %276 : vector<4x512xi1>, vector<4x512xf32>
    %cst_116 = arith.constant dense<0.000000e+00> : vector<4x512xf32>
    %280 = tpu.matmul %266, %2, %cst_116 {dimension_numbers = #tpu.dot_dimension_numbers<[1], [0], [0], [1], [0, 0, 1, 1], [], []>} : vector<4x128xf32>, vector<128x512xf32>, vector<4x512xf32> -> vector<4x512xf32>
    %281 = arith.addf %280, %279 : vector<4x512xf32>
    %282 = vector.extract_strided_slice %281 {offsets = [0, 0], sizes = [4, 128], strides = [1, 1]} : vector<4x512xf32> to vector<4x128xf32>
    %cst_117 = arith.constant 5.000000e-01 : f32
    %283 = vector.broadcast %cst_117 : f32 to vector<4x128xf32>
    %284 = arith.mulf %283, %282 : vector<4x128xf32>
    %285 = math.tanh %284 : vector<4x128xf32>
    %cst_118 = arith.constant 5.000000e-01 : f32
    %286 = vector.broadcast %cst_118 : f32 to vector<4x128xf32>
    %287 = arith.mulf %286, %285 : vector<4x128xf32>
    %cst_119 = arith.constant 5.000000e-01 : f32
    %288 = vector.broadcast %cst_119 : f32 to vector<4x128xf32>
    %289 = arith.addf %287, %288 : vector<4x128xf32>
    %290 = vector.extract_strided_slice %281 {offsets = [0, 128], sizes = [4, 128], strides = [1, 1]} : vector<4x512xf32> to vector<4x128xf32>
    %cst_120 = arith.constant 5.000000e-01 : f32
    %291 = vector.broadcast %cst_120 : f32 to vector<4x128xf32>
    %292 = arith.mulf %291, %290 : vector<4x128xf32>
    %293 = math.tanh %292 : vector<4x128xf32>
    %cst_121 = arith.constant 5.000000e-01 : f32
    %294 = vector.broadcast %cst_121 : f32 to vector<4x128xf32>
    %295 = arith.mulf %294, %293 : vector<4x128xf32>
    %cst_122 = arith.constant 5.000000e-01 : f32
    %296 = vector.broadcast %cst_122 : f32 to vector<4x128xf32>
    %297 = arith.addf %295, %296 : vector<4x128xf32>
    %298 = vector.extract_strided_slice %281 {offsets = [0, 256], sizes = [4, 128], strides = [1, 1]} : vector<4x512xf32> to vector<4x128xf32>
    %299 = math.tanh %298 : vector<4x128xf32>
    %300 = vector.extract_strided_slice %281 {offsets = [0, 384], sizes = [4, 128], strides = [1, 1]} : vector<4x512xf32> to vector<4x128xf32>
    %cst_123 = arith.constant 5.000000e-01 : f32
    %301 = vector.broadcast %cst_123 : f32 to vector<4x128xf32>
    %302 = arith.mulf %301, %300 : vector<4x128xf32>
    %303 = math.tanh %302 : vector<4x128xf32>
    %cst_124 = arith.constant 5.000000e-01 : f32
    %304 = vector.broadcast %cst_124 : f32 to vector<4x128xf32>
    %305 = arith.mulf %304, %303 : vector<4x128xf32>
    %cst_125 = arith.constant 5.000000e-01 : f32
    %306 = vector.broadcast %cst_125 : f32 to vector<4x128xf32>
    %307 = arith.addf %305, %306 : vector<4x128xf32>
    %308 = arith.mulf %297, %267 : vector<4x128xf32>
    %309 = arith.mulf %289, %299 : vector<4x128xf32>
    %310 = arith.addf %308, %309 : vector<4x128xf32>
    %311 = math.tanh %310 : vector<4x128xf32>
    %312 = arith.mulf %307, %311 : vector<4x128xf32>
    %313 = vector.broadcast %c3_i32 : i32 to vector<4x1xi32>
    %314 = arith.cmpi slt, %313, %0 : vector<4x1xi32>
    %315 = vector.broadcast %270 : i32 to vector<4x1xi32>
    %316 = arith.cmpi slt, %315, %0 : vector<4x1xi32>
    %317 = vector.broadcast %89 : vector<1x128xi1> to vector<4x128xi1>
    %318 = vector.broadcast %314 : vector<4x1xi1> to vector<4x128xi1>
    %319 = arith.andi %317, %318 : vector<4x128xi1>
    %cst_126 = arith.constant dense<true> : vector<1x128xi1>
    %320 = arith.xori %89, %cst_126 : vector<1x128xi1>
    %321 = vector.broadcast %320 : vector<1x128xi1> to vector<4x128xi1>
    %322 = vector.broadcast %316 : vector<4x1xi1> to vector<4x128xi1>
    %323 = arith.andi %321, %322 : vector<4x128xi1>
    %324 = arith.ori %319, %323 : vector<4x128xi1>
    %325 = arith.select %324, %312, %266 : vector<4x128xi1>, vector<4x128xf32>
    %326 = arith.select %324, %310, %267 : vector<4x128xi1>, vector<4x128xf32>
    %327 = arith.maximumf %269, %312 : vector<4x128xf32>
    %328 = arith.select %324, %327, %269 : vector<4x128xi1>, vector<4x128xf32>
    %c4_i32 = arith.constant 4 : i32
    %c7_i32_127 = arith.constant 7 : i32
    %329 = arith.subi %c7_i32_127, %c4_i32 : i32
    %330 = arith.index_cast %c4_i32 : i32 to index
    %c0_128 = arith.constant 0 : index
    %c0_129 = arith.constant 0 : index
    %331 = vector.load %arg7[%330, %c0_128, %c0_129] : memref<8x4x512xf32, #tpu.memory_space<vmem>>, vector<1x4x512xf32>
    %332 = vector.shape_cast %331 : vector<1x4x512xf32> to vector<4x512xf32>
    %333 = arith.index_cast %329 : i32 to index
    %c0_130 = arith.constant 0 : index
    %c0_131 = arith.constant 0 : index
    %334 = vector.load %arg7[%333, %c0_130, %c0_131] : memref<8x4x512xf32, #tpu.memory_space<vmem>>, vector<1x4x512xf32>
    %335 = vector.shape_cast %334 : vector<1x4x512xf32> to vector<4x512xf32>
    %336 = vector.shape_cast %86 : vector<1x512xi1> to vector<1x512xi1>
    %337 = vector.broadcast %336 : vector<1x512xi1> to vector<4x512xi1>
    %338 = arith.select %337, %332, %335 : vector<4x512xi1>, vector<4x512xf32>
    %cst_132 = arith.constant dense<0.000000e+00> : vector<4x512xf32>
    %339 = tpu.matmul %325, %2, %cst_132 {dimension_numbers = #tpu.dot_dimension_numbers<[1], [0], [0], [1], [0, 0, 1, 1], [], []>} : vector<4x128xf32>, vector<128x512xf32>, vector<4x512xf32> -> vector<4x512xf32>
    %340 = arith.addf %339, %338 : vector<4x512xf32>
    %341 = vector.extract_strided_slice %340 {offsets = [0, 0], sizes = [4, 128], strides = [1, 1]} : vector<4x512xf32> to vector<4x128xf32>
    %cst_133 = arith.constant 5.000000e-01 : f32
    %342 = vector.broadcast %cst_133 : f32 to vector<4x128xf32>
    %343 = arith.mulf %342, %341 : vector<4x128xf32>
    %344 = math.tanh %343 : vector<4x128xf32>
    %cst_134 = arith.constant 5.000000e-01 : f32
    %345 = vector.broadcast %cst_134 : f32 to vector<4x128xf32>
    %346 = arith.mulf %345, %344 : vector<4x128xf32>
    %cst_135 = arith.constant 5.000000e-01 : f32
    %347 = vector.broadcast %cst_135 : f32 to vector<4x128xf32>
    %348 = arith.addf %346, %347 : vector<4x128xf32>
    %349 = vector.extract_strided_slice %340 {offsets = [0, 128], sizes = [4, 128], strides = [1, 1]} : vector<4x512xf32> to vector<4x128xf32>
    %cst_136 = arith.constant 5.000000e-01 : f32
    %350 = vector.broadcast %cst_136 : f32 to vector<4x128xf32>
    %351 = arith.mulf %350, %349 : vector<4x128xf32>
    %352 = math.tanh %351 : vector<4x128xf32>
    %cst_137 = arith.constant 5.000000e-01 : f32
    %353 = vector.broadcast %cst_137 : f32 to vector<4x128xf32>
    %354 = arith.mulf %353, %352 : vector<4x128xf32>
    %cst_138 = arith.constant 5.000000e-01 : f32
    %355 = vector.broadcast %cst_138 : f32 to vector<4x128xf32>
    %356 = arith.addf %354, %355 : vector<4x128xf32>
    %357 = vector.extract_strided_slice %340 {offsets = [0, 256], sizes = [4, 128], strides = [1, 1]} : vector<4x512xf32> to vector<4x128xf32>
    %358 = math.tanh %357 : vector<4x128xf32>
    %359 = vector.extract_strided_slice %340 {offsets = [0, 384], sizes = [4, 128], strides = [1, 1]} : vector<4x512xf32> to vector<4x128xf32>
    %cst_139 = arith.constant 5.000000e-01 : f32
    %360 = vector.broadcast %cst_139 : f32 to vector<4x128xf32>
    %361 = arith.mulf %360, %359 : vector<4x128xf32>
    %362 = math.tanh %361 : vector<4x128xf32>
    %cst_140 = arith.constant 5.000000e-01 : f32
    %363 = vector.broadcast %cst_140 : f32 to vector<4x128xf32>
    %364 = arith.mulf %363, %362 : vector<4x128xf32>
    %cst_141 = arith.constant 5.000000e-01 : f32
    %365 = vector.broadcast %cst_141 : f32 to vector<4x128xf32>
    %366 = arith.addf %364, %365 : vector<4x128xf32>
    %367 = arith.mulf %356, %326 : vector<4x128xf32>
    %368 = arith.mulf %348, %358 : vector<4x128xf32>
    %369 = arith.addf %367, %368 : vector<4x128xf32>
    %370 = math.tanh %369 : vector<4x128xf32>
    %371 = arith.mulf %366, %370 : vector<4x128xf32>
    %372 = vector.broadcast %c4_i32 : i32 to vector<4x1xi32>
    %373 = arith.cmpi slt, %372, %0 : vector<4x1xi32>
    %374 = vector.broadcast %329 : i32 to vector<4x1xi32>
    %375 = arith.cmpi slt, %374, %0 : vector<4x1xi32>
    %376 = vector.broadcast %89 : vector<1x128xi1> to vector<4x128xi1>
    %377 = vector.broadcast %373 : vector<4x1xi1> to vector<4x128xi1>
    %378 = arith.andi %376, %377 : vector<4x128xi1>
    %cst_142 = arith.constant dense<true> : vector<1x128xi1>
    %379 = arith.xori %89, %cst_142 : vector<1x128xi1>
    %380 = vector.broadcast %379 : vector<1x128xi1> to vector<4x128xi1>
    %381 = vector.broadcast %375 : vector<4x1xi1> to vector<4x128xi1>
    %382 = arith.andi %380, %381 : vector<4x128xi1>
    %383 = arith.ori %378, %382 : vector<4x128xi1>
    %384 = arith.select %383, %371, %325 : vector<4x128xi1>, vector<4x128xf32>
    %385 = arith.select %383, %369, %326 : vector<4x128xi1>, vector<4x128xf32>
    %386 = arith.maximumf %328, %371 : vector<4x128xf32>
    %387 = arith.select %383, %386, %328 : vector<4x128xi1>, vector<4x128xf32>
    %c5_i32 = arith.constant 5 : i32
    %c7_i32_143 = arith.constant 7 : i32
    %388 = arith.subi %c7_i32_143, %c5_i32 : i32
    %389 = arith.index_cast %c5_i32 : i32 to index
    %c0_144 = arith.constant 0 : index
    %c0_145 = arith.constant 0 : index
    %390 = vector.load %arg7[%389, %c0_144, %c0_145] : memref<8x4x512xf32, #tpu.memory_space<vmem>>, vector<1x4x512xf32>
    %391 = vector.shape_cast %390 : vector<1x4x512xf32> to vector<4x512xf32>
    %392 = arith.index_cast %388 : i32 to index
    %c0_146 = arith.constant 0 : index
    %c0_147 = arith.constant 0 : index
    %393 = vector.load %arg7[%392, %c0_146, %c0_147] : memref<8x4x512xf32, #tpu.memory_space<vmem>>, vector<1x4x512xf32>
    %394 = vector.shape_cast %393 : vector<1x4x512xf32> to vector<4x512xf32>
    %395 = vector.shape_cast %86 : vector<1x512xi1> to vector<1x512xi1>
    %396 = vector.broadcast %395 : vector<1x512xi1> to vector<4x512xi1>
    %397 = arith.select %396, %391, %394 : vector<4x512xi1>, vector<4x512xf32>
    %cst_148 = arith.constant dense<0.000000e+00> : vector<4x512xf32>
    %398 = tpu.matmul %384, %2, %cst_148 {dimension_numbers = #tpu.dot_dimension_numbers<[1], [0], [0], [1], [0, 0, 1, 1], [], []>} : vector<4x128xf32>, vector<128x512xf32>, vector<4x512xf32> -> vector<4x512xf32>
    %399 = arith.addf %398, %397 : vector<4x512xf32>
    %400 = vector.extract_strided_slice %399 {offsets = [0, 0], sizes = [4, 128], strides = [1, 1]} : vector<4x512xf32> to vector<4x128xf32>
    %cst_149 = arith.constant 5.000000e-01 : f32
    %401 = vector.broadcast %cst_149 : f32 to vector<4x128xf32>
    %402 = arith.mulf %401, %400 : vector<4x128xf32>
    %403 = math.tanh %402 : vector<4x128xf32>
    %cst_150 = arith.constant 5.000000e-01 : f32
    %404 = vector.broadcast %cst_150 : f32 to vector<4x128xf32>
    %405 = arith.mulf %404, %403 : vector<4x128xf32>
    %cst_151 = arith.constant 5.000000e-01 : f32
    %406 = vector.broadcast %cst_151 : f32 to vector<4x128xf32>
    %407 = arith.addf %405, %406 : vector<4x128xf32>
    %408 = vector.extract_strided_slice %399 {offsets = [0, 128], sizes = [4, 128], strides = [1, 1]} : vector<4x512xf32> to vector<4x128xf32>
    %cst_152 = arith.constant 5.000000e-01 : f32
    %409 = vector.broadcast %cst_152 : f32 to vector<4x128xf32>
    %410 = arith.mulf %409, %408 : vector<4x128xf32>
    %411 = math.tanh %410 : vector<4x128xf32>
    %cst_153 = arith.constant 5.000000e-01 : f32
    %412 = vector.broadcast %cst_153 : f32 to vector<4x128xf32>
    %413 = arith.mulf %412, %411 : vector<4x128xf32>
    %cst_154 = arith.constant 5.000000e-01 : f32
    %414 = vector.broadcast %cst_154 : f32 to vector<4x128xf32>
    %415 = arith.addf %413, %414 : vector<4x128xf32>
    %416 = vector.extract_strided_slice %399 {offsets = [0, 256], sizes = [4, 128], strides = [1, 1]} : vector<4x512xf32> to vector<4x128xf32>
    %417 = math.tanh %416 : vector<4x128xf32>
    %418 = vector.extract_strided_slice %399 {offsets = [0, 384], sizes = [4, 128], strides = [1, 1]} : vector<4x512xf32> to vector<4x128xf32>
    %cst_155 = arith.constant 5.000000e-01 : f32
    %419 = vector.broadcast %cst_155 : f32 to vector<4x128xf32>
    %420 = arith.mulf %419, %418 : vector<4x128xf32>
    %421 = math.tanh %420 : vector<4x128xf32>
    %cst_156 = arith.constant 5.000000e-01 : f32
    %422 = vector.broadcast %cst_156 : f32 to vector<4x128xf32>
    %423 = arith.mulf %422, %421 : vector<4x128xf32>
    %cst_157 = arith.constant 5.000000e-01 : f32
    %424 = vector.broadcast %cst_157 : f32 to vector<4x128xf32>
    %425 = arith.addf %423, %424 : vector<4x128xf32>
    %426 = arith.mulf %415, %385 : vector<4x128xf32>
    %427 = arith.mulf %407, %417 : vector<4x128xf32>
    %428 = arith.addf %426, %427 : vector<4x128xf32>
    %429 = math.tanh %428 : vector<4x128xf32>
    %430 = arith.mulf %425, %429 : vector<4x128xf32>
    %431 = vector.broadcast %c5_i32 : i32 to vector<4x1xi32>
    %432 = arith.cmpi slt, %431, %0 : vector<4x1xi32>
    %433 = vector.broadcast %388 : i32 to vector<4x1xi32>
    %434 = arith.cmpi slt, %433, %0 : vector<4x1xi32>
    %435 = vector.broadcast %89 : vector<1x128xi1> to vector<4x128xi1>
    %436 = vector.broadcast %432 : vector<4x1xi1> to vector<4x128xi1>
    %437 = arith.andi %435, %436 : vector<4x128xi1>
    %cst_158 = arith.constant dense<true> : vector<1x128xi1>
    %438 = arith.xori %89, %cst_158 : vector<1x128xi1>
    %439 = vector.broadcast %438 : vector<1x128xi1> to vector<4x128xi1>
    %440 = vector.broadcast %434 : vector<4x1xi1> to vector<4x128xi1>
    %441 = arith.andi %439, %440 : vector<4x128xi1>
    %442 = arith.ori %437, %441 : vector<4x128xi1>
    %443 = arith.select %442, %430, %384 : vector<4x128xi1>, vector<4x128xf32>
    %444 = arith.select %442, %428, %385 : vector<4x128xi1>, vector<4x128xf32>
    %445 = arith.maximumf %387, %430 : vector<4x128xf32>
    %446 = arith.select %442, %445, %387 : vector<4x128xi1>, vector<4x128xf32>
    %c6_i32 = arith.constant 6 : i32
    %c7_i32_159 = arith.constant 7 : i32
    %447 = arith.subi %c7_i32_159, %c6_i32 : i32
    %448 = arith.index_cast %c6_i32 : i32 to index
    %c0_160 = arith.constant 0 : index
    %c0_161 = arith.constant 0 : index
    %449 = vector.load %arg7[%448, %c0_160, %c0_161] : memref<8x4x512xf32, #tpu.memory_space<vmem>>, vector<1x4x512xf32>
    %450 = vector.shape_cast %449 : vector<1x4x512xf32> to vector<4x512xf32>
    %451 = arith.index_cast %447 : i32 to index
    %c0_162 = arith.constant 0 : index
    %c0_163 = arith.constant 0 : index
    %452 = vector.load %arg7[%451, %c0_162, %c0_163] : memref<8x4x512xf32, #tpu.memory_space<vmem>>, vector<1x4x512xf32>
    %453 = vector.shape_cast %452 : vector<1x4x512xf32> to vector<4x512xf32>
    %454 = vector.shape_cast %86 : vector<1x512xi1> to vector<1x512xi1>
    %455 = vector.broadcast %454 : vector<1x512xi1> to vector<4x512xi1>
    %456 = arith.select %455, %450, %453 : vector<4x512xi1>, vector<4x512xf32>
    %cst_164 = arith.constant dense<0.000000e+00> : vector<4x512xf32>
    %457 = tpu.matmul %443, %2, %cst_164 {dimension_numbers = #tpu.dot_dimension_numbers<[1], [0], [0], [1], [0, 0, 1, 1], [], []>} : vector<4x128xf32>, vector<128x512xf32>, vector<4x512xf32> -> vector<4x512xf32>
    %458 = arith.addf %457, %456 : vector<4x512xf32>
    %459 = vector.extract_strided_slice %458 {offsets = [0, 0], sizes = [4, 128], strides = [1, 1]} : vector<4x512xf32> to vector<4x128xf32>
    %cst_165 = arith.constant 5.000000e-01 : f32
    %460 = vector.broadcast %cst_165 : f32 to vector<4x128xf32>
    %461 = arith.mulf %460, %459 : vector<4x128xf32>
    %462 = math.tanh %461 : vector<4x128xf32>
    %cst_166 = arith.constant 5.000000e-01 : f32
    %463 = vector.broadcast %cst_166 : f32 to vector<4x128xf32>
    %464 = arith.mulf %463, %462 : vector<4x128xf32>
    %cst_167 = arith.constant 5.000000e-01 : f32
    %465 = vector.broadcast %cst_167 : f32 to vector<4x128xf32>
    %466 = arith.addf %464, %465 : vector<4x128xf32>
    %467 = vector.extract_strided_slice %458 {offsets = [0, 128], sizes = [4, 128], strides = [1, 1]} : vector<4x512xf32> to vector<4x128xf32>
    %cst_168 = arith.constant 5.000000e-01 : f32
    %468 = vector.broadcast %cst_168 : f32 to vector<4x128xf32>
    %469 = arith.mulf %468, %467 : vector<4x128xf32>
    %470 = math.tanh %469 : vector<4x128xf32>
    %cst_169 = arith.constant 5.000000e-01 : f32
    %471 = vector.broadcast %cst_169 : f32 to vector<4x128xf32>
    %472 = arith.mulf %471, %470 : vector<4x128xf32>
    %cst_170 = arith.constant 5.000000e-01 : f32
    %473 = vector.broadcast %cst_170 : f32 to vector<4x128xf32>
    %474 = arith.addf %472, %473 : vector<4x128xf32>
    %475 = vector.extract_strided_slice %458 {offsets = [0, 256], sizes = [4, 128], strides = [1, 1]} : vector<4x512xf32> to vector<4x128xf32>
    %476 = math.tanh %475 : vector<4x128xf32>
    %477 = vector.extract_strided_slice %458 {offsets = [0, 384], sizes = [4, 128], strides = [1, 1]} : vector<4x512xf32> to vector<4x128xf32>
    %cst_171 = arith.constant 5.000000e-01 : f32
    %478 = vector.broadcast %cst_171 : f32 to vector<4x128xf32>
    %479 = arith.mulf %478, %477 : vector<4x128xf32>
    %480 = math.tanh %479 : vector<4x128xf32>
    %cst_172 = arith.constant 5.000000e-01 : f32
    %481 = vector.broadcast %cst_172 : f32 to vector<4x128xf32>
    %482 = arith.mulf %481, %480 : vector<4x128xf32>
    %cst_173 = arith.constant 5.000000e-01 : f32
    %483 = vector.broadcast %cst_173 : f32 to vector<4x128xf32>
    %484 = arith.addf %482, %483 : vector<4x128xf32>
    %485 = arith.mulf %474, %444 : vector<4x128xf32>
    %486 = arith.mulf %466, %476 : vector<4x128xf32>
    %487 = arith.addf %485, %486 : vector<4x128xf32>
    %488 = math.tanh %487 : vector<4x128xf32>
    %489 = arith.mulf %484, %488 : vector<4x128xf32>
    %490 = vector.broadcast %c6_i32 : i32 to vector<4x1xi32>
    %491 = arith.cmpi slt, %490, %0 : vector<4x1xi32>
    %492 = vector.broadcast %447 : i32 to vector<4x1xi32>
    %493 = arith.cmpi slt, %492, %0 : vector<4x1xi32>
    %494 = vector.broadcast %89 : vector<1x128xi1> to vector<4x128xi1>
    %495 = vector.broadcast %491 : vector<4x1xi1> to vector<4x128xi1>
    %496 = arith.andi %494, %495 : vector<4x128xi1>
    %cst_174 = arith.constant dense<true> : vector<1x128xi1>
    %497 = arith.xori %89, %cst_174 : vector<1x128xi1>
    %498 = vector.broadcast %497 : vector<1x128xi1> to vector<4x128xi1>
    %499 = vector.broadcast %493 : vector<4x1xi1> to vector<4x128xi1>
    %500 = arith.andi %498, %499 : vector<4x128xi1>
    %501 = arith.ori %496, %500 : vector<4x128xi1>
    %502 = arith.select %501, %489, %443 : vector<4x128xi1>, vector<4x128xf32>
    %503 = arith.select %501, %487, %444 : vector<4x128xi1>, vector<4x128xf32>
    %504 = arith.maximumf %446, %489 : vector<4x128xf32>
    %505 = arith.select %501, %504, %446 : vector<4x128xi1>, vector<4x128xf32>
    %c7_i32_175 = arith.constant 7 : i32
    %c7_i32_176 = arith.constant 7 : i32
    %506 = arith.subi %c7_i32_176, %c7_i32_175 : i32
    %507 = arith.index_cast %c7_i32_175 : i32 to index
    %c0_177 = arith.constant 0 : index
    %c0_178 = arith.constant 0 : index
    %508 = vector.load %arg7[%507, %c0_177, %c0_178] : memref<8x4x512xf32, #tpu.memory_space<vmem>>, vector<1x4x512xf32>
    %509 = vector.shape_cast %508 : vector<1x4x512xf32> to vector<4x512xf32>
    %510 = arith.index_cast %506 : i32 to index
    %c0_179 = arith.constant 0 : index
    %c0_180 = arith.constant 0 : index
    %511 = vector.load %arg7[%510, %c0_179, %c0_180] : memref<8x4x512xf32, #tpu.memory_space<vmem>>, vector<1x4x512xf32>
    %512 = vector.shape_cast %511 : vector<1x4x512xf32> to vector<4x512xf32>
    %513 = vector.shape_cast %86 : vector<1x512xi1> to vector<1x512xi1>
    %514 = vector.broadcast %513 : vector<1x512xi1> to vector<4x512xi1>
    %515 = arith.select %514, %509, %512 : vector<4x512xi1>, vector<4x512xf32>
    %cst_181 = arith.constant dense<0.000000e+00> : vector<4x512xf32>
    %516 = tpu.matmul %502, %2, %cst_181 {dimension_numbers = #tpu.dot_dimension_numbers<[1], [0], [0], [1], [0, 0, 1, 1], [], []>} : vector<4x128xf32>, vector<128x512xf32>, vector<4x512xf32> -> vector<4x512xf32>
    %517 = arith.addf %516, %515 : vector<4x512xf32>
    %518 = vector.extract_strided_slice %517 {offsets = [0, 0], sizes = [4, 128], strides = [1, 1]} : vector<4x512xf32> to vector<4x128xf32>
    %cst_182 = arith.constant 5.000000e-01 : f32
    %519 = vector.broadcast %cst_182 : f32 to vector<4x128xf32>
    %520 = arith.mulf %519, %518 : vector<4x128xf32>
    %521 = math.tanh %520 : vector<4x128xf32>
    %cst_183 = arith.constant 5.000000e-01 : f32
    %522 = vector.broadcast %cst_183 : f32 to vector<4x128xf32>
    %523 = arith.mulf %522, %521 : vector<4x128xf32>
    %cst_184 = arith.constant 5.000000e-01 : f32
    %524 = vector.broadcast %cst_184 : f32 to vector<4x128xf32>
    %525 = arith.addf %523, %524 : vector<4x128xf32>
    %526 = vector.extract_strided_slice %517 {offsets = [0, 128], sizes = [4, 128], strides = [1, 1]} : vector<4x512xf32> to vector<4x128xf32>
    %cst_185 = arith.constant 5.000000e-01 : f32
    %527 = vector.broadcast %cst_185 : f32 to vector<4x128xf32>
    %528 = arith.mulf %527, %526 : vector<4x128xf32>
    %529 = math.tanh %528 : vector<4x128xf32>
    %cst_186 = arith.constant 5.000000e-01 : f32
    %530 = vector.broadcast %cst_186 : f32 to vector<4x128xf32>
    %531 = arith.mulf %530, %529 : vector<4x128xf32>
    %cst_187 = arith.constant 5.000000e-01 : f32
    %532 = vector.broadcast %cst_187 : f32 to vector<4x128xf32>
    %533 = arith.addf %531, %532 : vector<4x128xf32>
    %534 = vector.extract_strided_slice %517 {offsets = [0, 256], sizes = [4, 128], strides = [1, 1]} : vector<4x512xf32> to vector<4x128xf32>
    %535 = math.tanh %534 : vector<4x128xf32>
    %536 = vector.extract_strided_slice %517 {offsets = [0, 384], sizes = [4, 128], strides = [1, 1]} : vector<4x512xf32> to vector<4x128xf32>
    %cst_188 = arith.constant 5.000000e-01 : f32
    %537 = vector.broadcast %cst_188 : f32 to vector<4x128xf32>
    %538 = arith.mulf %537, %536 : vector<4x128xf32>
    %539 = math.tanh %538 : vector<4x128xf32>
    %cst_189 = arith.constant 5.000000e-01 : f32
    %540 = vector.broadcast %cst_189 : f32 to vector<4x128xf32>
    %541 = arith.mulf %540, %539 : vector<4x128xf32>
    %cst_190 = arith.constant 5.000000e-01 : f32
    %542 = vector.broadcast %cst_190 : f32 to vector<4x128xf32>
    %543 = arith.addf %541, %542 : vector<4x128xf32>
    %544 = arith.mulf %533, %503 : vector<4x128xf32>
    %545 = arith.mulf %525, %535 : vector<4x128xf32>
    %546 = arith.addf %544, %545 : vector<4x128xf32>
    %547 = math.tanh %546 : vector<4x128xf32>
    %548 = arith.mulf %543, %547 : vector<4x128xf32>
    %549 = vector.broadcast %c7_i32_175 : i32 to vector<4x1xi32>
    %550 = arith.cmpi slt, %549, %0 : vector<4x1xi32>
    %551 = vector.broadcast %506 : i32 to vector<4x1xi32>
    %552 = arith.cmpi slt, %551, %0 : vector<4x1xi32>
    %553 = vector.broadcast %89 : vector<1x128xi1> to vector<4x128xi1>
    %554 = vector.broadcast %550 : vector<4x1xi1> to vector<4x128xi1>
    %555 = arith.andi %553, %554 : vector<4x128xi1>
    %cst_191 = arith.constant dense<true> : vector<1x128xi1>
    %556 = arith.xori %89, %cst_191 : vector<1x128xi1>
    %557 = vector.broadcast %556 : vector<1x128xi1> to vector<4x128xi1>
    %558 = vector.broadcast %552 : vector<4x1xi1> to vector<4x128xi1>
    %559 = arith.andi %557, %558 : vector<4x128xi1>
    %560 = arith.ori %555, %559 : vector<4x128xi1>
    %561 = arith.select %560, %548, %502 : vector<4x128xi1>, vector<4x128xf32>
    %562 = arith.select %560, %546, %503 : vector<4x128xi1>, vector<4x128xf32>
    %563 = arith.maximumf %505, %548 : vector<4x128xf32>
    %564 = arith.select %560, %563, %505 : vector<4x128xi1>, vector<4x128xf32>
    %c8_i32 = arith.constant 8 : i32
    %c0_192 = arith.constant 0 : index
    %c0_193 = arith.constant 0 : index
    %565 = vector.load %arg6[%c0_192, %c0_193] : memref<4x128xf32, #tpu.memory_space<vmem>>, vector<4x128xf32>
    tpu.vector_store %arg6[%c0_192, %c0_193], %564 {strides = array<i32>} : memref<4x128xf32, #tpu.memory_space<vmem>>, vector<4x128xf32>,
    return
  }
  func.func @transform_0(%arg0: i32) -> (i32, i32, i32) {
    %c0_i32 = arith.constant 0 : i32
    %c0_i32_0 = arith.constant 0 : i32
    %c0_i32_1 = arith.constant 0 : i32
    return %c0_i32, %arg0, %c0_i32_0 : i32, i32, i32
  }
  func.func @transform_1(%arg0: i32) -> (i32, i32) {
    %c0_i32 = arith.constant 0 : i32
    %c0_i32_0 = arith.constant 0 : i32
    return %arg0, %c0_i32 : i32, i32
  }
  func.func @transform_2(%arg0: i32) -> (i32, i32) {
    %c0_i32 = arith.constant 0 : i32
    %c0_i32_0 = arith.constant 0 : i32
    %c0_i32_1 = arith.constant 0 : i32
    return %c0_i32, %c0_i32_0 : i32, i32
  }
  func.func @transform_3(%arg0: i32) -> (i32, i32) {
    %c0_i32 = arith.constant 0 : i32
    %c0_i32_0 = arith.constant 0 : i32
    %c0_i32_1 = arith.constant 0 : i32
    return %c0_i32, %c0_i32_0 : i32, i32
  }
  func.func @transform_4(%arg0: i32) -> (i32, i32) {
    %c0_i32 = arith.constant 0 : i32
    %c0_i32_0 = arith.constant 0 : i32
    %c0_i32_1 = arith.constant 0 : i32
    return %c0_i32, %c0_i32_0 : i32, i32
  }
  func.func @transform_5(%arg0: i32) -> (i32, i32) {
    %c0_i32 = arith.constant 0 : i32
    %c0_i32_0 = arith.constant 0 : i32
    return %arg0, %c0_i32 : i32, i32
  }
}

</mosaic_0001>

<bundles_post_ra>
// kernel: tpu_custom_call.1
= control target key start
LH: loop header
LB: loop body
LE: loop exit
PB: predicated region body
PF: predicated region fallthrough
CT: control target
= control target key end

     0   :  { %10 = vsyncpa [#allocation4], 0  ;;  %s4857_s0 = inlined_call_operand.hbm [shape: f32[8,4,16], index: 0, kind: input, shape index: {}]   ;;  %s4858_s1 = inlined_call_operand.vmem [shape: s32[4,1], index: 1, kind: input, shape index: {}]   ;;  %s4859_s2 = inlined_call_operand.hbm [shape: f32[16,512], index: 2, kind: input, shape index: {}]   ;;  %s4860_s3 = inlined_call_operand.hbm [shape: f32[128,512], index: 3, kind: input, shape index: {}]   ;;  %s4861_s4 = inlined_call_operand.vmem [shape: f32[1,512], index: 4, kind: input, shape index: {}]   ;;  %s4862_s5 = inlined_call_operand.hbm [shape: f32[4,128], index: 5, kind: output, shape index: {}]  }
   0x1   :  { %11 = vsyncpa [#allocation7], 0 }
   0x2   :  { %12 = vsyncpa [#allocation5], 0  ;;  %s3262_s18 = smov [#allocation6]  }
   0x3   :  { %s32_s19 = sshll.u32 %s3262_s18, 4  ;;  %s33_s19 = int_to_ptr.vmem [resolvable:$true] %s32_s19 }
   0x4   :  { %s3184_s20 = scalar_lea.vmem %s33_s19, 1024  ;;  %p3189_p1 = scmp.lt.s32.totalorder %s33_s19, %s33_s19 }
   0x5   :  { %p3185_p0 = scmp.ne.s32.totalorder %s33_s19, %s3184_s20  ;;  %p3190_p2 = scmp.lt.s32.totalorder %s3184_s20, %s3184_s20 }
   0x7   :  { %p3191_p3 = por %p3190_p2, %p3189_p1 }
   0x9   :  { %p3192_p4 = pnand %p3191_p3, %p3185_p0 }
   0xb   :  { %3195 = shalt.err (!%p3192_p4)
}
   0xc   :  { %s3263_s21 = smov 512   ;;  %s3264_s22 = smov 32  }
   0xd   :  { %38 = dma.hbm_to_vmem [thread:$0]  %s4859_s2, 1024, %s33_s19, [#allocation7], %s3263_s21, %s3263_s21, %s3264_s22  }
   0xe   :  { %s3265_s25 = smov [#allocation3]  }
   0xf   :  { %s18_s26 = sshll.u32 %s3265_s25, 4  ;;  %s19_s26 = int_to_ptr.vmem [resolvable:$true] %s18_s26 }
  0x10   :  { %s3204_s27 = scalar_lea.vmem %s19_s26, 512  ;;  %p3209_p6 = scmp.lt.s32.totalorder %s19_s26, %s19_s26 }
  0x11   :  { %p3205_p5 = scmp.ne.s32.totalorder %s19_s26, %s3204_s27  ;;  %p3210_p7 = scmp.lt.s32.totalorder %s3204_s27, %s3204_s27 }
  0x13   :  { %p3211_p8 = por %p3210_p7, %p3209_p6 }
  0x15   :  { %p3212_p9 = pnand %p3211_p8, %p3205_p5 }
  0x17   :  { %3215 = shalt.err (!%p3212_p9)
}
  0x18   :  { %s3266_s28 = smov 64   ;;  %s3267_s29 = smov 4  }
  0x19   :  { %24 = dma.hbm_to_vmem [thread:$0]  %s4857_s0, 512, %s19_s26, [#allocation4], %s3266_s28, %s3266_s28, %s3267_s29  }
  0x1a   :  { %s3268_s7 = smov [#allocation8]  }
  0x1b   :  { %s44_s8 = sshll.u32 %s3268_s7, 4  ;;  %s45_s8 = int_to_ptr.vmem [resolvable:$true] %s44_s8 }
  0x1c   :  { %s3224_s2 = scalar_lea.vmem %s45_s8, 8192  ;;  %p3229_p11 = scmp.lt.s32.totalorder %s45_s8, %s45_s8 }
  0x1d   :  { %p3225_p10 = scmp.ne.s32.totalorder %s45_s8, %s3224_s2  ;;  %p3230_p12 = scmp.lt.s32.totalorder %s3224_s2, %s3224_s2 }
  0x1f   :  { %p3231_p13 = por %p3230_p12, %p3229_p11 }
  0x21   :  { %p3232_p0 = pnand %p3231_p13, %p3225_p10 }
  0x23   :  { %3235 = shalt.err (!%p3232_p0)
}
  0x24   :  { %50 = dma.hbm_to_vmem [thread:$0]  %s4860_s3, 8192, %s45_s8, [#allocation7], %s3263_s21, %s3263_s21, %s3264_s22  }
  0x25   :  { %3256 = dma.done.wait [#allocation4], 512  }
  0x26   :  { %3257 = vsyncadd [#allocation4], 4294966784 }
  0x27   :  { %3258 = dma.done.wait [#allocation7], 9216  }
  0x28   :  { %3259 = vsyncadd [#allocation7], 4294958080  ;;  %v4865_v0 = vmov 0.0   ;;  %v4863_v1 = vmov 0   ;;  %v3316_v2 = vld [vmem:[#allocation6 + $0x28] sm:$0xff]  ;;  %v3318_v3 = vld [vmem:[#allocation6 + $0x38] sm:$0xff] }
  0x29   :  { %226 = vmatprep.mubr.f32.mxu0 %v4865_v0  ;;  %297 = vmatprep.mubr.f32.mxu1 %v4865_v0  ;;  %v3320_v4 = vld [vmem:[#allocation6 + $0x20] sm:$0xff]  ;;  %v3324_v5 = vld [vmem:[#allocation6 + $0x30] sm:$0xff]  ;;  %v3326_v6 = vld [vmem:[#allocation6 + $0x8] sm:$0xff]  ;;  %vm158_vm0 = vcmask 130048   ;;  %vm3271_vm10 = vmmov 1  }
  0x2a   :  { %3030 = vset.pattern.permute.xlu0 %v4863_v1  ;;  %3031 = vset.pattern.permute.xlu1 %v4863_v1  ;;  %v3328_v7 = vld [vmem:[#allocation6 + $0x18] sm:$0xff]  ;;  %v3332_v8 = vld [vmem:[#allocation6] sm:$0xff]  ;;  %v3334_v9 = vld [vmem:[#allocation6 + $0x10] sm:$0xff] }
  0x2b   :  { %190 = vmatprep.subr.mxu0 %v3316_v2  ;;  %261 = vmatprep.subr.mxu1 %v3318_v3  ;;  %v136_v10 = vld [vmem:[#allocation3] sm:$0xf]  ;;  %v315_v11 = vld [vmem:[#allocation3 + $0x4] sm:$0xf]  ;;  %v473_v12 = vld [vmem:[#allocation3 + $0x8] sm:$0xf] }
  0x2c   :  { %191 = vmatpush1.msra.mxu0 %v3320_v4  ;;  %262 = vmatpush1.msra.mxu1 %v3324_v5  ;;  %v631_v13 = vld [vmem:[#allocation3 + $0xc] sm:$0xf]  ;;  %v789_v14 = vld [vmem:[#allocation3 + $0x10] sm:$0xf]  ;;  %v947_v15 = vld [vmem:[#allocation3 + $0x14] sm:$0xf] }
  0x2d   :  { %192 = vmatprep.subr.mxu0 %v3326_v6  ;;  %263 = vmatprep.subr.mxu1 %v3328_v7  ;;  %v1105_v16 = vld [vmem:[#allocation3 + $0x18] sm:$0xf]  ;;  %v1263_v17 = vld [vmem:[#allocation3 + $0x1c] sm:$0xf]  ;;  %v3422_v18 = vld [vmem:[#allocation8 + $0x1e8] sm:$0xff] }
  0x2e   :  { %193 = vmatpush1.msra.mxu0 %v3332_v8  ;;  %264 = vmatpush1.msra.mxu1 %v3334_v9  ;;  %v3424_v19 = vld [vmem:[#allocation8 + $0x1f8] sm:$0xff]  ;;  %v3428_v20 = vld [vmem:[#allocation8 + $0x1e0] sm:$0xff]  ;;  %v3430_v21 = vld [vmem:[#allocation8 + $0x1f0] sm:$0xff] }
  0x2f   :  { %2985 = vmatmul.mubr.msk.f32.vlgmr.msra.gmra.mxu0 %vm158_vm0, %v136_v10  ;;  %2986 = vmatmul.mubr.msk.f32.vlgmr.msra.gmra.mxu1 %vm158_vm0, %v136_v10  ;;  %v3434_v22 = vld [vmem:[#allocation8 + $0x1c8] sm:$0xff]  ;;  %v3436_v23 = vld [vmem:[#allocation8 + $0x1d8] sm:$0xff]  ;;  %v3440_v24 = vld [vmem:[#allocation8 + $0x1c0] sm:$0xff] }
  0x30   :  { %347 = vmatprep.subr.mxu0 %v3316_v2  ;;  %418 = vmatprep.subr.mxu1 %v3318_v3  ;;  %v3442_v25 = vld [vmem:[#allocation8 + $0x1d0] sm:$0xff]  ;;  %v3446_v26 = vld [vmem:[#allocation8 + $0x1a8] sm:$0xff]  ;;  %v3448_v27 = vld [vmem:[#allocation8 + $0x1b8] sm:$0xff] }
  0x31   :  { %348 = vmatpush1.msra.mxu0 %v3320_v4  ;;  %419 = vmatpush1.msra.mxu1 %v3324_v5  ;;  %v3452_v28 = vld [vmem:[#allocation8 + $0x1a0] sm:$0xff]  ;;  %v3454_v29 = vld [vmem:[#allocation8 + $0x1b0] sm:$0xff]  ;;  %v3458_v30 = vld [vmem:[#allocation8 + $0x188] sm:$0xff] }
  0x32   :  { %349 = vmatprep.subr.mxu0 %v3326_v6  ;;  %420 = vmatprep.subr.mxu1 %v3328_v7  ;;  %v3460_v31 = vld [vmem:[#allocation8 + $0x198] sm:$0xff]  ;;  %v3464_v32 = vld [vmem:[#allocation8 + $0x180] sm:$0xff]  ;;  %v3466_v33 = vld [vmem:[#allocation8 + $0x190] sm:$0xff] }
  0x33   :  { %350 = vmatpush1.msra.mxu0 %v3332_v8  ;;  %383 = vmatprep.mubr.f32.mxu0 %v4865_v0  ;;  %v3470_v34 = vld [vmem:[#allocation8 + $0x168] sm:$0xff]  ;;  %v3472_v35 = vld [vmem:[#allocation8 + $0x178] sm:$0xff]  ;;  %v3476_v36 = vld [vmem:[#allocation8 + $0x160] sm:$0xff] }
  0x34   :  { %421 = vmatpush1.msra.mxu1 %v3334_v9  ;;  %454 = vmatprep.mubr.f32.mxu1 %v4865_v0  ;;  %v3478_v37 = vld [vmem:[#allocation8 + $0x170] sm:$0xff]  ;;  %v3482_v38 = vld [vmem:[#allocation8 + $0x148] sm:$0xff]  ;;  %v3484_v39 = vld [vmem:[#allocation8 + $0x158] sm:$0xff] }
  0x35   :  { %2987 = vmatmul.mubr.msk.f32.vlgmr.msra.gmra.mxu0 %vm158_vm0, %v315_v11  ;;  %2988 = vmatmul.mubr.msk.f32.vlgmr.msra.gmra.mxu1 %vm158_vm0, %v315_v11  ;;  %v3488_v40 = vld [vmem:[#allocation8 + $0x140] sm:$0xff]  ;;  %v3490_v41 = vld [vmem:[#allocation8 + $0x150] sm:$0xff]  ;;  %v3494_v42 = vld [vmem:[#allocation8 + $0x128] sm:$0xff] }
  0x36   :  { %505 = vmatprep.subr.mxu0 %v3316_v2  ;;  %576 = vmatprep.subr.mxu1 %v3318_v3  ;;  %5069 = vst [vmem:[#allocation13_spill] sm:$0xff] %v3490_v41  ;;  %5070 = vst [vmem:[#allocation14_spill] sm:$0xff] %v3494_v42  ;;  %v3496_v43 = vld [vmem:[#allocation8 + $0x138] sm:$0xff]  ;;  %v3500_v44 = vld [vmem:[#allocation8 + $0x120] sm:$0xff] }
  0x37   :  { %506 = vmatpush1.msra.mxu0 %v3320_v4  ;;  %577 = vmatpush1.msra.mxu1 %v3324_v5  ;;  %5071 = vst [vmem:[#allocation15_spill] sm:$0xff] %v3496_v43  ;;  %5072 = vst [vmem:[#allocation16_spill] sm:$0xff] %v3500_v44  ;;  %v3502_v45 = vld [vmem:[#allocation8 + $0x130] sm:$0xff]  ;;  %v3506_v46 = vld [vmem:[#allocation8 + $0x108] sm:$0xff] }
  0x38   :  { %507 = vmatprep.subr.mxu0 %v3326_v6  ;;  %578 = vmatprep.subr.mxu1 %v3328_v7  ;;  %5073 = vst [vmem:[#allocation17_spill] sm:$0xff] %v3502_v45  ;;  %5074 = vst [vmem:[#allocation18_spill] sm:$0xff] %v3506_v46  ;;  %v3508_v47 = vld [vmem:[#allocation8 + $0x118] sm:$0xff]  ;;  %v3512_v48 = vld [vmem:[#allocation8 + $0x100] sm:$0xff] }
  0x39   :  { %508 = vmatpush1.msra.mxu0 %v3332_v8  ;;  %541 = vmatprep.mubr.f32.mxu0 %v4865_v0  ;;  %5075 = vst [vmem:[#allocation19_spill] sm:$0xff] %v3508_v47  ;;  %5076 = vst [vmem:[#allocation20_spill] sm:$0xff] %v3512_v48  ;;  %v3514_v49 = vld [vmem:[#allocation8 + $0x110] sm:$0xff]  ;;  %v3518_v50 = vld [vmem:[#allocation8 + $0xe8] sm:$0xff] }
  0x3a   :  { %579 = vmatpush1.msra.mxu1 %v3334_v9  ;;  %612 = vmatprep.mubr.f32.mxu1 %v4865_v0  ;;  %5077 = vst [vmem:[#allocation21_spill] sm:$0xff] %v3514_v49  ;;  %5078 = vst [vmem:[#allocation22_spill] sm:$0xff] %v3518_v50  ;;  %v3520_v51 = vld [vmem:[#allocation8 + $0xf8] sm:$0xff]  ;;  %v3524_v52 = vld [vmem:[#allocation8 + $0xe0] sm:$0xff] }
  0x3b   :  { %2989 = vmatmul.mubr.msk.f32.vlgmr.msra.gmra.mxu0 %vm158_vm0, %v473_v12  ;;  %2990 = vmatmul.mubr.msk.f32.vlgmr.msra.gmra.mxu1 %vm158_vm0, %v473_v12  ;;  %5079 = vst [vmem:[#allocation23_spill] sm:$0xff] %v3520_v51  ;;  %5080 = vst [vmem:[#allocation24_spill] sm:$0xff] %v3524_v52  ;;  %v3526_v53 = vld [vmem:[#allocation8 + $0xf0] sm:$0xff]  ;;  %v3530_v54 = vld [vmem:[#allocation8 + $0xc8] sm:$0xff] }
  0x3c   :  { %663 = vmatprep.subr.mxu0 %v3316_v2  ;;  %734 = vmatprep.subr.mxu1 %v3318_v3  ;;  %5081 = vst [vmem:[#allocation25_spill] sm:$0xff] %v3526_v53  ;;  %5082 = vst [vmem:[#allocation26_spill] sm:$0xff] %v3530_v54  ;;  %v3532_v55 = vld [vmem:[#allocation8 + $0xd8] sm:$0xff]  ;;  %v3536_v56 = vld [vmem:[#allocation8 + $0xc0] sm:$0xff] }
  0x3d   :  { %664 = vmatpush1.msra.mxu0 %v3320_v4  ;;  %735 = vmatpush1.msra.mxu1 %v3324_v5  ;;  %5083 = vst [vmem:[#allocation27_spill] sm:$0xff] %v3532_v55  ;;  %5084 = vst [vmem:[#allocation28_spill] sm:$0xff] %v3536_v56  ;;  %v3538_v57 = vld [vmem:[#allocation8 + $0xd0] sm:$0xff]  ;;  %v3542_v58 = vld [vmem:[#allocation8 + $0xa8] sm:$0xff] }
  0x3e   :  { %665 = vmatprep.subr.mxu0 %v3326_v6  ;;  %736 = vmatprep.subr.mxu1 %v3328_v7  ;;  %5085 = vst [vmem:[#allocation29_spill] sm:$0xff] %v3538_v57  ;;  %5086 = vst [vmem:[#allocation30_spill] sm:$0xff] %v3542_v58  ;;  %v3544_v59 = vld [vmem:[#allocation8 + $0xb8] sm:$0xff]  ;;  %v3548_v60 = vld [vmem:[#allocation8 + $0xa0] sm:$0xff] }
  0x3f   :  { %666 = vmatpush1.msra.mxu0 %v3332_v8  ;;  %699 = vmatprep.mubr.f32.mxu0 %v4865_v0  ;;  %5087 = vst [vmem:[#allocation31_spill] sm:$0xff] %v3544_v59  ;;  %5088 = vst [vmem:[#allocation32_spill] sm:$0xff] %v3548_v60  ;;  %v3550_v61 = vld [vmem:[#allocation8 + $0xb0] sm:$0xff]  ;;  %v3554_v62 = vld [vmem:[#allocation8 + $0x88] sm:$0xff] }
  0x40   :  { %737 = vmatpush1.msra.mxu1 %v3334_v9  ;;  %770 = vmatprep.mubr.f32.mxu1 %v4865_v0  ;;  %5089 = vst [vmem:[#allocation33_spill] sm:$0xff] %v3550_v61  ;;  %5090 = vst [vmem:[#allocation34_spill] sm:$0xff] %v3554_v62  ;;  %v3556_v63 = vld [vmem:[#allocation8 + $0x98] sm:$0xff]  ;;  %v3584_v10 = vld [vmem:[#allocation8 + $0x40] sm:$0xff] }
  0x41   :  { %2991 = vmatmul.mubr.msk.f32.vlgmr.msra.gmra.mxu0 %vm158_vm0, %v631_v13  ;;  %2992 = vmatmul.mubr.msk.f32.vlgmr.msra.gmra.mxu1 %vm158_vm0, %v631_v13  ;;  %5091 = vst [vmem:[#allocation35_spill] sm:$0xff] %v3556_v63  ;;  %5100 = vst [vmem:[#allocation44_spill] sm:$0xff] %v3584_v10  ;;  %v3586_v11 = vld [vmem:[#allocation8 + $0x50] sm:$0xff]  ;;  %v3590_v12 = vld [vmem:[#allocation8 + $0x28] sm:$0xff] }
  0x42   :  { %821 = vmatprep.subr.mxu0 %v3316_v2  ;;  %892 = vmatprep.subr.mxu1 %v3318_v3  ;;  %5101 = vst [vmem:[#allocation45_spill] sm:$0xff] %v3586_v11  ;;  %5102 = vst [vmem:[#allocation46_spill] sm:$0xff] %v3590_v12  ;;  %v3592_v13 = vld [vmem:[#allocation8 + $0x38] sm:$0xff] }
  0x43   :  { %822 = vmatpush1.msra.mxu0 %v3320_v4  ;;  %893 = vmatpush1.msra.mxu1 %v3324_v5  ;;  %5103 = vst [vmem:[#allocation47_spill] sm:$0xff] %v3592_v13  ;;  %v3607_v1 = vld [vmem:[#allocation8 + $0x18] sm:$0xff] }
  0x44   :  { %823 = vmatprep.subr.mxu0 %v3326_v6  ;;  %894 = vmatprep.subr.mxu1 %v3328_v7  ;;  %5107 = vst [vmem:[#allocation51_spill] sm:$0xff] %v3607_v1 }
  0x45   :  { %824 = vmatpush1.msra.mxu0 %v3332_v8  ;;  %857 = vmatprep.mubr.f32.mxu0 %v4865_v0 }
  0x46   :  { %895 = vmatpush1.msra.mxu1 %v3334_v9  ;;  %928 = vmatprep.mubr.f32.mxu1 %v4865_v0 }
  0x47   :  { %2993 = vmatmul.mubr.msk.f32.vlgmr.msra.gmra.mxu0 %vm158_vm0, %v789_v14  ;;  %2994 = vmatmul.mubr.msk.f32.vlgmr.msra.gmra.mxu1 %vm158_vm0, %v789_v14  ;;  %v62_v14 = vld [vmem:[%s4858_s1] sm:$0xf] }
  0x48   :  { %979 = vmatprep.subr.mxu0 %v3316_v2  ;;  %1050 = vmatprep.subr.mxu1 %v3318_v3  ;;  %vm1666_vm1 = vcmp.gt.s32.totalorder %v62_v14, 0  ;;  %vm1869_vm2 = vcmp.gt.s32.totalorder %v62_v14, 1  ;;  %vm1667_vm3 = vcmp.gt.s32.totalorder %v62_v14, 7  ;;  %vm1870_vm4 = vcmp.gt.s32.totalorder %v62_v14, 6 }
  0x49   :  { %980 = vmatpush1.msra.mxu0 %v3320_v4  ;;  %1051 = vmatpush1.msra.mxu1 %v3324_v5  ;;  %vm2069_vm5 = vcmp.gt.s32.totalorder %v62_v14, 5  ;;  %vm2068_vm6 = vcmp.gt.s32.totalorder %v62_v14, 2  ;;  %vm2268_vm7 = vcmp.gt.s32.totalorder %v62_v14, 4  ;;  %vm2267_vm8 = vcmp.gt.s32.totalorder %v62_v14, 3  ;;  %v5113_v14 = vld [vmem:[#allocation44_spill] sm:$0xff] }
  0x4a   :  { %981 = vmatprep.subr.mxu0 %v3326_v6  ;;  %1052 = vmatprep.subr.mxu1 %v3328_v7 }
  0x4b   :  { %982 = vmatpush1.msra.mxu0 %v3332_v8  ;;  %1015 = vmatprep.mubr.f32.mxu0 %v4865_v0 }
  0x4c   :  { %1053 = vmatpush1.msra.mxu1 %v3334_v9  ;;  %1086 = vmatprep.mubr.f32.mxu1 %v4865_v0 }
  0x4d   :  { %2995 = vmatmul.mubr.msk.f32.vlgmr.msra.gmra.mxu0 %vm158_vm0, %v947_v15  ;;  %2996 = vmatmul.mubr.msk.f32.vlgmr.msra.gmra.mxu1 %vm158_vm0, %v947_v15  ;;  %v3599_v15 = vld [vmem:[#allocation8 + $0x20] sm:$0xff] }
  0x4e   :  { %1137 = vmatprep.subr.mxu0 %v3316_v2  ;;  %1208 = vmatprep.subr.mxu1 %v3318_v3  ;;  %5104 = vst [vmem:[#allocation48_spill] sm:$0xff] %v3599_v15 }
  0x4f   :  { %1138 = vmatpush1.msra.mxu0 %v3320_v4  ;;  %1209 = vmatpush1.msra.mxu1 %v3324_v5 }
  0x50   :  { %1139 = vmatprep.subr.mxu0 %v3326_v6  ;;  %1210 = vmatprep.subr.mxu1 %v3328_v7 }
  0x51   :  { %1140 = vmatpush1.msra.mxu0 %v3332_v8  ;;  %1173 = vmatprep.mubr.f32.mxu0 %v4865_v0 }
  0x52   :  { %1211 = vmatpush1.msra.mxu1 %v3334_v9  ;;  %1244 = vmatprep.mubr.f32.mxu1 %v4865_v0 }
  0x53   :  { %2997 = vmatmul.mubr.msk.f32.vlgmr.msra.gmra.mxu0 %vm158_vm0, %v1105_v16  ;;  %2998 = vmatmul.mubr.msk.f32.vlgmr.msra.gmra.mxu1 %vm158_vm0, %v1105_v16  ;;  %v3601_v16 = vld [vmem:[#allocation8 + $0x30] sm:$0xff] }
  0x54   :  { %1295 = vmatprep.subr.mxu0 %v3316_v2  ;;  %1366 = vmatprep.subr.mxu1 %v3318_v3  ;;  %v3560_v2 = vld [vmem:[#allocation8 + $0x80] sm:$0xff]  ;;  %v3562_v3 = vld [vmem:[#allocation8 + $0x90] sm:$0xff]  ;;  %5105 = vst [vmem:[#allocation49_spill] sm:$0xff] %v3601_v16 }
  0x55   :  { %1296 = vmatpush1.msra.mxu0 %v3320_v4  ;;  %1367 = vmatpush1.msra.mxu1 %v3324_v5  ;;  %5092 = vst [vmem:[#allocation36_spill] sm:$0xff] %v3560_v2  ;;  %5093 = vst [vmem:[#allocation37_spill] sm:$0xff] %v3562_v3  ;;  %v3566_v4 = vld [vmem:[#allocation8 + $0x68] sm:$0xff]  ;;  %v3568_v5 = vld [vmem:[#allocation8 + $0x78] sm:$0xff] }
  0x56   :  { %1297 = vmatprep.subr.mxu0 %v3326_v6  ;;  %1368 = vmatprep.subr.mxu1 %v3328_v7  ;;  %5094 = vst [vmem:[#allocation38_spill] sm:$0xff] %v3566_v4  ;;  %5095 = vst [vmem:[#allocation39_spill] sm:$0xff] %v3568_v5  ;;  %v3572_v6 = vld [vmem:[#allocation8 + $0x60] sm:$0xff]  ;;  %v3574_v7 = vld [vmem:[#allocation8 + $0x70] sm:$0xff] }
  0x57   :  { %1298 = vmatpush1.msra.mxu0 %v3332_v8  ;;  %1331 = vmatprep.mubr.f32.mxu0 %v4865_v0  ;;  %5096 = vst [vmem:[#allocation40_spill] sm:$0xff] %v3572_v6  ;;  %5097 = vst [vmem:[#allocation41_spill] sm:$0xff] %v3574_v7  ;;  %v3578_v8 = vld [vmem:[#allocation8 + $0x48] sm:$0xff] }
  0x58   :  { %1369 = vmatpush1.msra.mxu1 %v3334_v9  ;;  %1402 = vmatprep.mubr.f32.mxu1 %v4865_v0  ;;  %5098 = vst [vmem:[#allocation42_spill] sm:$0xff] %v3578_v8  ;;  %v3580_v9 = vld [vmem:[#allocation8 + $0x58] sm:$0xff]  ;;  %v3611_v0 = vld [vmem:[#allocation8] sm:$0xff] }
  0x59   :  { %2999 = vmatmul.mubr.msk.f32.vlgmr.msra.gmra.mxu0 %vm158_vm0, %v1263_v17  ;;  %3000 = vmatmul.mubr.msk.f32.vlgmr.msra.gmra.mxu1 %vm158_vm0, %v1263_v17  ;;  %5099 = vst [vmem:[#allocation43_spill] sm:$0xff] %v3580_v9  ;;  %v3605_v17 = vld [vmem:[#allocation8 + $0x8] sm:$0xff]  ;;  %5108 = vst [vmem:[#allocation52_spill] sm:$0xff] %v3611_v0 }
  0x5a   :  { %1506 = vmatprep.subr.mxu0 %v3422_v18  ;;  %1577 = vmatprep.subr.mxu1 %v3424_v19  ;;  %5106 = vst [vmem:[#allocation50_spill] sm:$0xff] %v3605_v17 }
  0x5b   :  { %1507 = vmatpush1.msra.mxu0 %v3428_v20  ;;  %1578 = vmatpush1.msra.mxu1 %v3430_v21 }
  0x5c   :  { %1508 = vmatprep.subr.mxu0 %v3434_v22  ;;  %1579 = vmatprep.subr.mxu1 %v3436_v23 }
  0x5d   :  { %1509 = vmatpush1.msra.mxu0 %v3440_v24  ;;  %1580 = vmatpush1.msra.mxu1 %v3442_v25 }
  0x5e   :  { %1510 = vmatprep.subr.mxu0 %v3446_v26  ;;  %1581 = vmatprep.subr.mxu1 %v3448_v27 }
  0x5f   :  { %1511 = vmatpush1.msra.mxu0 %v3452_v28  ;;  %1582 = vmatpush1.msra.mxu1 %v3454_v29 }
  0x60   :  { %1512 = vmatprep.subr.mxu0 %v3458_v30  ;;  %1583 = vmatprep.subr.mxu1 %v3460_v31 }
  0x61   :  { %1513 = vmatpush1.msra.mxu0 %v3464_v32  ;;  %1584 = vmatpush1.msra.mxu1 %v3466_v33 }
  0x62   :  { %1514 = vmatprep.subr.mxu0 %v3470_v34  ;;  %1585 = vmatprep.subr.mxu1 %v3472_v35 }
  0x63   :  { %1515 = vmatpush1.msra.mxu0 %v3476_v36  ;;  %1586 = vmatpush1.msra.mxu1 %v3478_v37 }
  0x64   :  { %1516 = vmatprep.subr.mxu0 %v3482_v38  ;;  %1587 = vmatprep.subr.mxu1 %v3484_v39 }
  0x65   :  { %1517 = vmatpush1.msra.mxu0 %v3488_v40  ;;  %1588 = vmatpush1.msra.mxu1 %v3490_v41 }
  0x66   :  { %1518 = vmatprep.subr.mxu0 %v3494_v42  ;;  %1589 = vmatprep.subr.mxu1 %v3496_v43 }
  0x67   :  { %1519 = vmatpush1.msra.mxu0 %v3500_v44  ;;  %1590 = vmatpush1.msra.mxu1 %v3502_v45 }
  0x68   :  { %1520 = vmatprep.subr.mxu0 %v3506_v46  ;;  %1591 = vmatprep.subr.mxu1 %v3508_v47 }
  0x69   :  { %1521 = vmatpush1.msra.mxu0 %v3512_v48  ;;  %1592 = vmatpush1.msra.mxu1 %v3514_v49 }
  0x6a   :  { %1522 = vmatprep.subr.mxu0 %v3518_v50  ;;  %1593 = vmatprep.subr.mxu1 %v3520_v51 }
  0x6b   :  { %1523 = vmatpush1.msra.mxu0 %v3524_v52  ;;  %1594 = vmatpush1.msra.mxu1 %v3526_v53 }
  0x6c   :  { %1524 = vmatprep.subr.mxu0 %v3530_v54  ;;  %1595 = vmatprep.subr.mxu1 %v3532_v55 }
  0x6d   :  { %1525 = vmatpush1.msra.mxu0 %v3536_v56  ;;  %1596 = vmatpush1.msra.mxu1 %v3538_v57 }
  0x6e   :  { %1526 = vmatprep.subr.mxu0 %v3542_v58  ;;  %1597 = vmatprep.subr.mxu1 %v3544_v59 }
  0x6f   :  { %1527 = vmatpush1.msra.mxu0 %v3548_v60  ;;  %1598 = vmatpush1.msra.mxu1 %v3550_v61 }
  0x70   :  { %1528 = vmatprep.subr.mxu0 %v3554_v62  ;;  %1599 = vmatprep.subr.mxu1 %v3556_v63 }
  0x71   :  { %1529 = vmatpush1.msra.mxu0 %v3560_v2  ;;  %1600 = vmatpush1.msra.mxu1 %v3562_v3 }
  0x72   :  { %1530 = vmatprep.subr.mxu0 %v3566_v4  ;;  %1601 = vmatprep.subr.mxu1 %v3568_v5 }
  0x73   :  { %1531 = vmatpush1.msra.mxu0 %v3572_v6  ;;  %1602 = vmatpush1.msra.mxu1 %v3574_v7 }
  0x74   :  { %1532 = vmatprep.subr.mxu0 %v3578_v8  ;;  %1603 = vmatprep.subr.mxu1 %v3580_v9  ;;  %v3615_v9 = vld [vmem:[#allocation8 + $0x10] sm:$0xff] }
  0x75   :  { %1533 = vmatpush1.msra.mxu0 %v3584_v10  ;;  %1604 = vmatpush1.msra.mxu1 %v3586_v11  ;;  %5109 = vst [vmem:[#allocation53_spill] sm:$0xff] %v3615_v9  ;;  %v5110_v11 = vmov 0.0  }
  0x76   :  { %1534 = vmatprep.subr.mxu0 %v3590_v12  ;;  %1605 = vmatprep.subr.mxu1 %v3592_v13  ;;  %v5111_v12 = vmov 0  }
  0x77   :  { %1535 = vmatpush1.msra.mxu0 %v3599_v15  ;;  %1606 = vmatpush1.msra.mxu1 %v3601_v16  ;;  %v1670_v13 = vsel %vm1666_vm1, 1, %v5111_v12  ;;  %v1871_v10 = vsel %vm1869_vm2, 1, %v5111_v12 }
  0x78   :  { %1536 = vmatprep.subr.mxu0 %v3605_v17  ;;  %1607 = vmatprep.subr.mxu1 %v3607_v1  ;;  %v1877_v1 = vsel %vm1870_vm4, 1, %v5111_v12 }
  0x79   :  { %1537 = vmatpush1.msra.mxu0 %v3611_v0  ;;  %1570 = vmatprep.mubr.f32.mxu0 %v5110_v11  ;;  %v1679_v0 = vsel %vm1667_vm3, 1, %v5111_v12 }
  0x7a   :  { %1608 = vmatpush1.msra.mxu1 %v3615_v9  ;;  %1641 = vmatprep.mubr.f32.mxu1 %v5110_v11 }
  0x7b   :  { %1571 = vmatmul.mubr.f32.vlgmr.msra.gmra.mxu0 %v5110_v11  ;;  %1642 = vmatmul.mubr.f32.vlgmr.msra.gmra.mxu1 %v5110_v11 }
  0x7c   :  { %1672 = vperm.xlu0 %3030, %v1670_v13   ;;  %1873 = vperm.xlu1 %3031, %v1871_v10   ;;  %v2076_v10 = vsel %vm2069_vm5, 1, %v5111_v12  ;;  %v2070_v13 = vsel %vm2068_vm6, 1, %v5111_v12 }
  0x7d   :  { %1709 = vmatprep.subr.mxu0 %v3422_v18  ;;  %1780 = vmatprep.subr.mxu1 %v3424_v19 }
  0x7e   :  { %1710 = vmatpush1.msra.mxu0 %v3428_v20  ;;  %1781 = vmatpush1.msra.mxu1 %v3430_v21 }
  0x7f   :  { %1711 = vmatprep.subr.mxu0 %v3434_v22  ;;  %1782 = vmatprep.subr.mxu1 %v3436_v23 }
  0x80   :  { %1681 = vperm.xlu0 %3030, %v1679_v0   ;;  %1879 = vperm.xlu1 %3031, %v1877_v1   ;;  %v2275_v0 = vsel %vm2268_vm7, 1, %v5111_v12  ;;  %v2269_v1 = vsel %vm2267_vm8, 1, %v5111_v12  ;;  %v5112_v12 = vld [vmem:[#allocation43_spill] sm:$0xff] }
  0x81   :  { %1712 = vmatpush1.msra.mxu0 %v3440_v24  ;;  %1783 = vmatpush1.msra.mxu1 %v3442_v25 }
  0x82   :  { %1713 = vmatprep.subr.mxu0 %v3446_v26  ;;  %1784 = vmatprep.subr.mxu1 %v3448_v27 }
  0x83   :  { %1714 = vmatpush1.msra.mxu0 %v3452_v28  ;;  %1785 = vmatpush1.msra.mxu1 %v3454_v29 }
  0x84   :  { %2078 = vperm.xlu1 %3031, %v2076_v10   ;;  %2072 = vperm.xlu0 %3030, %v2070_v13   ;;  %v5114_v10 = vld [vmem:[#allocation45_spill] sm:$0xff]  ;;  %v5115_v13 = vld [vmem:[#allocation46_spill] sm:$0xff] }
  0x85   :  { %1715 = vmatprep.subr.mxu0 %v3458_v30  ;;  %1786 = vmatprep.subr.mxu1 %v3460_v31 }
  0x86   :  { %1716 = vmatpush1.msra.mxu0 %v3464_v32  ;;  %1787 = vmatpush1.msra.mxu1 %v3466_v33 }
  0x87   :  { %1717 = vmatprep.subr.mxu0 %v3470_v34  ;;  %1788 = vmatprep.subr.mxu1 %v3472_v35 }
  0x88   :  { %2277 = vperm.xlu1 %3031, %v2275_v0   ;;  %2271 = vperm.xlu0 %3030, %v2269_v1   ;;  %v5116_v0 = vld [vmem:[#allocation47_spill] sm:$0xff] }
  0x89   :  { %1718 = vmatpush1.msra.mxu0 %v3476_v36  ;;  %1789 = vmatpush1.msra.mxu1 %v3478_v37  ;;  %v5117_v1 = vld [vmem:[#allocation51_spill] sm:$0xff] }
  0x8a   :  { %1719 = vmatprep.subr.mxu0 %v3482_v38  ;;  %1790 = vmatprep.subr.mxu1 %v3484_v39 }
  0x8b   :  { %1720 = vmatpush1.msra.mxu0 %v3488_v40  ;;  %1791 = vmatpush1.msra.mxu1 %v3490_v41 }
  0x8c   :  { %1721 = vmatprep.subr.mxu0 %v3494_v42  ;;  %1792 = vmatprep.subr.mxu1 %v3496_v43 }
  0x8d   :  { %1722 = vmatpush1.msra.mxu0 %v3500_v44  ;;  %1793 = vmatpush1.msra.mxu1 %v3502_v45 }
  0x8e   :  { %1723 = vmatprep.subr.mxu0 %v3506_v46  ;;  %1794 = vmatprep.subr.mxu1 %v3508_v47 }
  0x8f   :  { %1724 = vmatpush1.msra.mxu0 %v3512_v48  ;;  %1795 = vmatpush1.msra.mxu1 %v3514_v49 }
  0x90   :  { %1725 = vmatprep.subr.mxu0 %v3518_v50  ;;  %1796 = vmatprep.subr.mxu1 %v3520_v51 }
  0x91   :  { %1726 = vmatpush1.msra.mxu0 %v3524_v52  ;;  %1797 = vmatpush1.msra.mxu1 %v3526_v53 }
  0x92   :  { %1727 = vmatprep.subr.mxu0 %v3530_v54  ;;  %1798 = vmatprep.subr.mxu1 %v3532_v55 }
  0x93   :  { %1728 = vmatpush1.msra.mxu0 %v3536_v56  ;;  %1799 = vmatpush1.msra.mxu1 %v3538_v57 }
  0x94   :  { %1729 = vmatprep.subr.mxu0 %v3542_v58  ;;  %1800 = vmatprep.subr.mxu1 %v3544_v59 }
  0x95   :  { %1730 = vmatpush1.msra.mxu0 %v3548_v60  ;;  %1801 = vmatpush1.msra.mxu1 %v3550_v61 }
  0x96   :  { %1731 = vmatprep.subr.mxu0 %v3554_v62  ;;  %1802 = vmatprep.subr.mxu1 %v3556_v63 }
  0x97   :  { %1732 = vmatpush1.msra.mxu0 %v3560_v2  ;;  %1803 = vmatpush1.msra.mxu1 %v3562_v3 }
  0x98   :  { %1733 = vmatprep.subr.mxu0 %v3566_v4  ;;  %1804 = vmatprep.subr.mxu1 %v3568_v5 }
  0x99   :  { %1734 = vmatpush1.msra.mxu0 %v3572_v6  ;;  %1805 = vmatpush1.msra.mxu1 %v3574_v7  ;;  %v5118_v7 = vld [vmem:[#allocation52_spill] sm:$0xff] }
  0x9a   :  { %1735 = vmatprep.subr.mxu0 %v3578_v8  ;;  %1806 = vmatprep.subr.mxu1 %v5112_v12 }
  0x9b   :  { %1736 = vmatpush1.msra.mxu0 %v5113_v14  ;;  %1807 = vmatpush1.msra.mxu1 %v5114_v10 }
  0x9c   :  { %1737 = vmatprep.subr.mxu0 %v5115_v13  ;;  %1808 = vmatprep.subr.mxu1 %v5116_v0  ;;  %v138_v0 = vlaneseq }
  0x9d   :  { %1738 = vmatpush1.msra.mxu0 %v3599_v15  ;;  %1809 = vmatpush1.msra.mxu1 %v3601_v16 }
  0x9e   :  { %1739 = vmatprep.subr.mxu0 %v3605_v17  ;;  %1810 = vmatprep.subr.mxu1 %v5117_v1  ;;  %v139_v15 = vshrl.u32 %v138_v0, 7  ;;  %v3722_v62 = vand.u32 127, %v138_v0 }
  0x9f   :  { %1740 = vmatpush1.msra.mxu0 %v5118_v7  ;;  %1773 = vmatprep.mubr.f32.mxu0 %v5110_v11  ;;  %v135_v7 = vld [vmem:[%s4861_s4] sm:$0xf]  ;;  %s3272_s4 = smov [#allocation9]  }
  0xa0   :  { %1811 = vmatpush1.msra.mxu1 %v3615_v9  ;;  %1844 = vmatprep.mubr.f32.mxu1 %v5110_v11  ;;  %v140_v17 = vsub.s32 0, %v139_v15  ;;  %v148_v1 = vsub.s32 2, %v139_v15  ;;  %v144_v11 = vsub.s32 1, %v139_v15  ;;  %vm1473_vm9 = vcmp.lt.s32.totalorder %v3722_v62, 64  ;;  %s2975_s12 = sshll.u32 %s3272_s4, 4  ;;  %s2976_s12 = int_to_ptr.vmem [resolvable:$true] %s2975_s12 }
  0xa1   :  { %1908 = vmatprep.subr.mxu0 %v3422_v18  ;;  %1979 = vmatprep.subr.mxu1 %v3424_v19  ;;  %v152_v18 = vsub.s32 3, %v139_v15  ;;  %vm3743_vm11 = vmxor %vm1473_vm9, %vm3271_vm10  ;;  %v1423_v51 = vadd.s32 256, %v3722_v62  ;;  %v1424_v50 = vadd.s32 384, %v3722_v62  ;;  %s3236_s13 = scalar_lea.vmem %s2976_s12, 64  ;;  %p3241_p2 = scmp.lt.s32.totalorder %s2976_s12, %s2976_s12 }
  0xa2   :  { %v3712_v14 = vrot.slane %v135_v7, %v140_v17  ;;  %v3714_v19 = vrot.slane %v135_v7, %v148_v1  ;;  %v3716_v6 = vrot.slane %v135_v7, %v144_v11  ;;  %p3237_p1 = scmp.ne.s32.totalorder %s2976_s12, %s3236_s13  ;;  %p3242_p3 = scmp.lt.s32.totalorder %s3236_s13, %s3236_s13 }
  0xa3   :  { %v3718_v5 = vrot.slane %v135_v7, %v152_v18  ;;  %v1450_v46 = vand.u32 127, %v1424_v50  ;;  %v5140_v50 = vmov 0 }
  0xa4   :  { %p3243_p4 = por %p3242_p3, %p3241_p2 }
  0xa5   :  { %vm3848_vm2 = vcmp.lt.s32.totalorder %v1450_v46, 64 }
  0xa6   :  { %p3244_p5 = pnand %p3243_p4, %p3237_p1 }
  0xef   :  { %v3701_v13 = vpop.f32.mrf.mxu0  ;;  %v3703_v16 = vpop.f32.mrf.mxu1 }
  0xf1   :  { %v3708_v10 = vpop.f32.mrf.mxu0  ;;  %v3710_v9 = vpop.f32.mrf.mxu1 }
  0xf5   :  { %v385_v12 = vpop.f32.mrf.mxu0  ;;  %v456_v8 = vpop.f32.mrf.mxu1 }
  0xf6   :  { %v386_v4 = vadd.f32 %v385_v12, %v3712_v14  ;;  %v457_v3 = vadd.f32 %v456_v8, %v3714_v19 }
  0xf7   :  { %v387_v2 = vpop.f32.mrf.mxu0  ;;  %v458_v63 = vpop.f32.mrf.mxu1 }
  0xf8   :  { %v3725_v15 = vadd.f32 %v387_v2, %v3716_v6  ;;  %v3728_v17 = vadd.f32 %v458_v63, %v3718_v5  ;;  %v3730_v1 = vpop.permute.xlu0 %1672  ;;  %v3732_v11 = vpop.permute.xlu1 %1873 }
  0xf9   :  { %5119 = vst [vmem:[#allocation54_spill] sm:$0xff] %v3732_v11  ;;  %vm1674_vm12 = vcmp.eq.s32.totalorder %v3730_v1, 1  ;;  %vm1875_vm14 = vcmp.eq.s32.totalorder %v3732_v11, 1  ;;  %v5130_v11 = vmov 0 }
  0xfa   :  { %v3736_v7 = vcombine.low %v386_v4, %v3725_v15  ;;  %v3739_v8 = vcombine.low %v457_v3, %v3728_v17  ;;  %vm3752_vm13 = vmand %vm3743_vm11, %vm1674_vm12  ;;  %v5123_v4 = vmov 0 }
  0xfb   :  { %v543_v63 = vpop.f32.mrf.mxu0  ;;  %v614_v12 = vpop.f32.mrf.mxu1  ;;  %v5124_v4 = vsel %vm3752_vm13, 4294967295, %v5123_v4  ;;  %vm3767_vm15 = vmand %vm3743_vm11, %vm1875_vm14 }
  0xfc   :  { %5120 = vst [vmem:[#allocation55_spill] sm:$0xff] %v3739_v8  ;;  %5125 = vst [vmem:[#allocation56_spill] sm:$0xff] %v5124_v4  ;;  %v544_v3 = vadd.f32 %v543_v63, %v3712_v14  ;;  %v615_v0 = vadd.f32 %v614_v12, %v3714_v19  ;;  %v3759_v18 = vpop.permute.xlu0 %1681  ;;  %v3761_v61 = vpop.permute.xlu1 %1879 }
  0xfd   :  { %5126 = vst [vmem:[#allocation57_spill] sm:$0xff] %v3761_v61  ;;  %v545_v60 = vpop.f32.mrf.mxu0  ;;  %v616_v59 = vpop.f32.mrf.mxu1  ;;  %vm1683_vm0 = vcmp.eq.s32.totalorder %v3759_v18, 1  ;;  %vm4935_vm3 = vcmp.eq.s32.totalorder %v3761_v61, 1  ;;  %v1443_v61 = vand.u32 127, %v1423_v51 }
  0xfe   :  { %v3772_v63 = vadd.f32 %v545_v60, %v3716_v6  ;;  %v3775_v12 = vadd.f32 %v616_v59, %v3718_v5  ;;  %vm3788_vm1 = vmand %vm1473_vm9, %vm1683_vm0 }
  0xff   :  { %v5131_v11 = vsel %vm3788_vm1, 4294967295, %v5130_v11  ;;  %vm2792_vm4 = vmand %vm1473_vm9, %vm4935_vm3 }
 0x100   :  { %v3779_v57 = vcombine.low %v544_v3, %v3772_v63  ;;  %v3782_v56 = vcombine.low %v615_v0, %v3775_v12  ;;  %5132 = vst [vmem:[#allocation59_spill] sm:$0xff] %v5131_v11  ;;  %v1422_v0 = vadd.s32 128, %v3722_v62  ;;  %v3799_v54 = vpop.permute.xlu1 %2078  ;;  %vm3814_vm5 = vmor %vm2792_vm4, %vm3767_vm15  ;;  %vm3844_vm4 = vcmp.lt.s32.totalorder %v1443_v61, 64 }
 0x101   :  { %v701_v60 = vpop.f32.mrf.mxu0  ;;  %v772_v55 = vpop.f32.mrf.mxu1  ;;  %5133 = vst [vmem:[#allocation60_spill] sm:$0xff] %v3799_v54  ;;  %vm4934_vm6 = vcmp.eq.s32.totalorder %v3799_v54, 1  ;;  %v5145_v54 = vmov 0 }
 0x102   :  { %5129 = vst [vmem:[#allocation58_spill] sm:$0xff] %v3782_v56  ;;  %v702_v59 = vadd.f32 %v701_v60, %v3712_v14  ;;  %v773_v3 = vadd.f32 %v772_v55, %v3714_v19  ;;  %v3810_v55 = vpop.permute.xlu0 %2072  ;;  %v5135_v60 = vmov 0  ;;  %vm2621_vm8 = vmand %vm1473_vm9, %vm4934_vm6  ;;  %v5146_v54 = vsel %vm3844_vm4, 4294967295, %v5145_v54 }
 0x103   :  { %v703_v53 = vpop.f32.mrf.mxu0  ;;  %v774_v52 = vpop.f32.mrf.mxu1  ;;  %5134 = vst [vmem:[#allocation61_spill] sm:$0xff] %v3810_v55  ;;  %v5136_v60 = vsel %vm3814_vm5, 4294967295, %v5135_v60  ;;  %vm4939_vm7 = vcmp.eq.s32.totalorder %v3810_v55, 1  ;;  %5147 = vst [vmem:[#allocation68_spill] sm:$0xff] %v5146_v54 }
 0x104   :  { %v704_v4 = vadd.f32 %v703_v53, %v3716_v6  ;;  %v775_v11 = vadd.f32 %v774_v52, %v3718_v5  ;;  %5137 = vst [vmem:[#allocation62_spill] sm:$0xff] %v5136_v60  ;;  %v1436_v53 = vand.u32 127, %v1422_v0  ;;  %v3828_v60 = vpop.permute.xlu1 %2277  ;;  %vm2622_vm15 = vmand %vm3743_vm11, %vm4939_vm7 }
 0x105   :  { %5139 = vst [vmem:[#allocation64_spill] sm:$0xff] %v3828_v60  ;;  %vm3852_vm6 = vmor %vm2621_vm8, %vm2622_vm15  ;;  %vm4945_vm3 = vcmp.eq.s32.totalorder %v3828_v60, 1 }
 0x106   :  { %v781_v49 = vcombine.low %v702_v59, %v704_v4  ;;  %v3819_v48 = vcombine.low %v773_v3, %v775_v11  ;;  %vm3832_vm10 = vcmp.lt.s32.totalorder %v1436_v53, 64  ;;  %v5150_v53 = vmov 0  ;;  %vm2450_vm8 = vmand %vm1473_vm9, %vm4945_vm3 }
 0x107   :  { %v859_v52 = vpop.f32.mrf.mxu0  ;;  %v930_v47 = vpop.f32.mrf.mxu1  ;;  %v5141_v50 = vsel %vm3832_vm10, 4294967295, %v5140_v50  ;;  %v5151_v53 = vsel %vm3852_vm6, 4294967295, %v5150_v53  ;;  %v3863_v61 = vcombine.low %v704_v4, %v704_v4  ;;  %v5159_v4 = vmov 0 }
 0x108   :  { %5138 = vst [vmem:[#allocation63_spill] sm:$0xff] %v3819_v48  ;;  %v860_v45 = vadd.f32 %v859_v52, %v3712_v14  ;;  %v931_v58 = vadd.f32 %v930_v47, %v3714_v19  ;;  %5142 = vst [vmem:[#allocation65_spill] sm:$0xff] %v5141_v50  ;;  %v3840_v47 = vpop.permute.xlu0 %2271  ;;  %v3842_v52 = vcombine.low %v775_v11, %v775_v11 }
 0x109   :  { %v861_v59 = vpop.f32.mrf.mxu0  ;;  %v932_v3 = vpop.f32.mrf.mxu1  ;;  %5143 = vst [vmem:[#allocation66_spill] sm:$0xff] %v3840_v47  ;;  %5152 = vst [vmem:[#allocation69_spill] sm:$0xff] %v5151_v53  ;;  %vm4957_vm7 = vcmp.eq.s32.totalorder %v3840_v47, 1 }
 0x10a   :  { %v862_v0 = vadd.f32 %v861_v59, %v3716_v6  ;;  %v933_v51 = vadd.f32 %v932_v3, %v3718_v5  ;;  %5144 = vst [vmem:[#allocation67_spill] sm:$0xff] %v3842_v52  ;;  %5156 = vst [vmem:[#allocation73_spill] sm:$0xff] %v3863_v61  ;;  %v4276_v61 = vld [vmem:[#allocation8 + $0x128] sm:$0xff] }
 0x10b   :  { %vm2451_vm15 = vmand %vm3743_vm11, %vm4957_vm7 }
 0x10c   :  { %v939_v3 = vcombine.low %v860_v45, %v862_v0  ;;  %v3857_v55 = vcombine.low %v862_v0, %v862_v0  ;;  %v3859_v44 = vcombine.low %v931_v58, %v933_v51  ;;  %v3861_v11 = vcombine.low %v933_v51, %v933_v51  ;;  %vm3910_vm3 = vmor %vm2450_vm8, %vm2451_vm15 }
 0x10d   :  { %v1017_v43 = vpop.f32.mrf.mxu0  ;;  %v1088_v46 = vpop.f32.mrf.mxu1  ;;  %v5160_v4 = vsel %vm3910_vm3, 4294967295, %v5159_v4  ;;  %vm1675_vm8 = vmand %vm1473_vm9, %vm1674_vm12 }
 0x10e   :  { %5153 = vst [vmem:[#allocation70_spill] sm:$0xff] %v3857_v55  ;;  %5154 = vst [vmem:[#allocation71_spill] sm:$0xff] %v3859_v44  ;;  %v1018_v42 = vadd.f32 %v1017_v43, %v3712_v14  ;;  %v1089_v41 = vadd.f32 %v1088_v46, %v3714_v19  ;;  %v3874_v45 = vsel %vm1473_vm9, %v781_v49, %v939_v3  ;;  %v4273_v55 = vld [vmem:[#allocation8 + $0x150] sm:$0xff] }
 0x10f   :  { %5155 = vst [vmem:[#allocation72_spill] sm:$0xff] %v3861_v11  ;;  %5157 = vst [vmem:[#allocation74_spill] sm:$0xff] %v3874_v45  ;;  %v1019_v58 = vpop.f32.mrf.mxu0  ;;  %v1090_v0 = vpop.f32.mrf.mxu1  ;;  %v3890_v46 = vsel %vm1473_vm9, %v939_v3, %v781_v49  ;;  %v3926_v49 = vcombine.low %v3775_v12, %v3775_v12  ;;  %v231_v12 = vadd.f32 %v3708_v10, %v3716_v6  ;;  %v4279_v45 = vld [vmem:[#allocation8 + $0x138] sm:$0xff] }
 0x110   :  { %5158 = vst [vmem:[#allocation75_spill] sm:$0xff] %v3890_v46  ;;  %v1020_v53 = vadd.f32 %v1019_v58, %v3716_v6  ;;  %v1091_v60 = vadd.f32 %v1090_v0, %v3718_v5  ;;  %5161 = vst [vmem:[#allocation76_spill] sm:$0xff] %v5160_v4  ;;  %v3922_v46 = vcombine.low %v3772_v63, %v3772_v63 }
 0x111   :  { %5166 = vst [vmem:[#allocation81_spill] sm:$0xff] %v3926_v49  ;;  %v300_v63 = vadd.f32 %v3703_v16, %v3714_v19  ;;  %v302_v44 = vadd.f32 %v3710_v9, %v3718_v5  ;;  %v3986_v16 = vcombine.low %v3728_v17, %v3728_v17  ;;  %vm1684_vm15 = vmand %vm3743_vm11, %vm1683_vm0 }
 0x112   :  { %v1097_v58 = vcombine.low %v1018_v42, %v1020_v53  ;;  %v3914_v0 = vcombine.low %v1020_v53, %v1020_v53  ;;  %v3916_v51 = vcombine.low %v1089_v41, %v1091_v60  ;;  %v3918_v43 = vcombine.low %v1091_v60, %v1091_v60  ;;  %5165 = vst [vmem:[#allocation80_spill] sm:$0xff] %v3922_v46  ;;  %vm4076_vm7 = vmor %vm1675_vm8, %vm1684_vm15 }
 0x113   :  { %v1175_v3 = vpop.f32.mrf.mxu0  ;;  %v1246_v47 = vpop.f32.mrf.mxu1  ;;  %5172 = vst [vmem:[#allocation87_spill] sm:$0xff] %v3986_v16  ;;  %vm1876_vm12 = vmand %vm1473_vm9, %vm1875_vm14 }
 0x114   :  { %5162 = vst [vmem:[#allocation77_spill] sm:$0xff] %v3914_v0  ;;  %5163 = vst [vmem:[#allocation78_spill] sm:$0xff] %v3916_v51  ;;  %v1176_v11 = vadd.f32 %v1175_v3, %v3712_v14  ;;  %v1247_v42 = vadd.f32 %v1246_v47, %v3714_v19  ;;  %v3933_v41 = vsel %vm1473_vm9, %v3779_v57, %v1097_v58 }
 0x115   :  { %5164 = vst [vmem:[#allocation79_spill] sm:$0xff] %v3918_v43  ;;  %v1177_v60 = vpop.f32.mrf.mxu0  ;;  %v1248_v53 = vpop.f32.mrf.mxu1  ;;  %v3950_v3 = vsel %vm1473_vm9, %v1097_v58, %v3779_v57  ;;  %v229_v58 = vadd.f32 %v3701_v13, %v3712_v14  ;;  %v3982_v57 = vcombine.low %v3725_v15, %v3725_v15 }
 0x116   :  { %5167 = vst [vmem:[#allocation82_spill] sm:$0xff] %v3950_v3  ;;  %v1178_v4 = vadd.f32 %v1177_v60, %v3716_v6  ;;  %v1249_v52 = vadd.f32 %v1248_v53, %v3718_v5 }
 0x117   :  { %5171 = vst [vmem:[#allocation86_spill] sm:$0xff] %v3982_v57 }
 0x118   :  { %v1255_v47 = vcombine.low %v1176_v11, %v1178_v4  ;;  %v3970_v60 = vcombine.low %v1178_v4, %v1178_v4  ;;  %v3972_v53 = vcombine.low %v1247_v42, %v1249_v52  ;;  %v3974_v3 = vcombine.low %v1249_v52, %v1249_v52 }
 0x119   :  { %v1333_v13 = vpop.f32.mrf.mxu0  ;;  %v1404_v11 = vpop.f32.mrf.mxu1 }
 0x11a   :  { %5168 = vst [vmem:[#allocation83_spill] sm:$0xff] %v3970_v60  ;;  %5169 = vst [vmem:[#allocation84_spill] sm:$0xff] %v3972_v53  ;;  %v1334_v4 = vadd.f32 %v1333_v13, %v3712_v14  ;;  %v1405_v52 = vadd.f32 %v1404_v11, %v3714_v19  ;;  %v3993_v10 = vsel %vm1473_vm9, %v3736_v7, %v1255_v47 }
 0x11b   :  { %5170 = vst [vmem:[#allocation85_spill] sm:$0xff] %v3974_v3  ;;  %v1335_v15 = vpop.f32.mrf.mxu0  ;;  %v1406_v42 = vpop.f32.mrf.mxu1  ;;  %v4010_v19 = vsel %vm1473_vm9, %v1255_v47, %v3736_v7 }
 0x11c   :  { %5173 = vst [vmem:[#allocation88_spill] sm:$0xff] %v4010_v19  ;;  %v1336_v11 = vadd.f32 %v1335_v15, %v3716_v6  ;;  %v1407_v9 = vadd.f32 %v1406_v42, %v3718_v5  ;;  %v308_v6 = vcombine.low %v229_v58, %v231_v12  ;;  %v4032_v15 = vcombine.low %v231_v12, %v231_v12 }
 0x11d   :  { %v4034_v5 = vcombine.low %v300_v63, %v302_v44  ;;  %v4036_v42 = vcombine.low %v302_v44, %v302_v44 }
 0x11e   :  { %v1413_v47 = vcombine.low %v1334_v4, %v1336_v11  ;;  %v4026_v14 = vcombine.low %v1336_v11, %v1336_v11  ;;  %v4028_v19 = vcombine.low %v1405_v52, %v1407_v9  ;;  %v4030_v13 = vcombine.low %v1407_v9, %v1407_v9  ;;  %5177 = vst [vmem:[#allocation92_spill] sm:$0xff] %v4032_v15 }
 0x11f   :  { %5178 = vst [vmem:[#allocation93_spill] sm:$0xff] %v4034_v5  ;;  %5179 = vst [vmem:[#allocation94_spill] sm:$0xff] %v4036_v42 }
 0x120   :  { %5174 = vst [vmem:[#allocation89_spill] sm:$0xff] %v4026_v14  ;;  %5175 = vst [vmem:[#allocation90_spill] sm:$0xff] %v4028_v19  ;;  %v4040_v17 = vsel %vm1473_vm9, %v1413_v47, %v308_v6  ;;  %v1502_v63 = vsel %vm1473_vm9, %v308_v6, %v1413_v47  ;;  %v1503_v9 = vsel %vm3832_vm10, %v4032_v15, %v4026_v14 }
 0x121   :  { %5176 = vst [vmem:[#allocation91_spill] sm:$0xff] %v4030_v13  ;;  %5180 = vst [vmem:[#allocation95_spill] sm:$0xff] %v4040_v17  ;;  %v1504_v44 = vsel %vm3844_vm4, %v4034_v5, %v4028_v19  ;;  %v1505_v6 = vsel %vm3848_vm2, %v4036_v42, %v4030_v13  ;;  %v5228_v42 = vsel %vm3844_vm4, %v3739_v8, %v3972_v53  ;;  %v4267_v53 = vld [vmem:[#allocation8 + $0x158] sm:$0xff] }
 0x13b   :  { %v1572_v12 = vpop.f32.mrf.mxu0  ;;  %v1643_v17 = vpop.f32.mrf.mxu1 }
 0x13c   :  { %v1573_v52 = vadd.f32 %v1572_v12, %v1502_v63  ;;  %v1644_v48 = vadd.f32 %v1643_v17, %v1504_v44 }
 0x13d   :  { %v1574_v11 = vpop.f32.mrf.mxu0  ;;  %v1645_v47 = vpop.f32.mrf.mxu1 }
 0x13e   :  { %v1648_v4 = vmul.f32 0.5, %v1573_v52  ;;  %v1575_v7 = vadd.f32 %v1574_v11, %v1503_v9  ;;  %v1646_v63 = vadd.f32 %v1645_v47, %v1505_v6  ;;  %v4216_v47 = vld [vmem:[#allocation8 + $0x1c8] sm:$0xff] }
 0x140   :  { %3032 = vtanh.f32 %v1648_v4  ;;  %v1652_v58 = vmul.f32 0.5, %v1575_v7  ;;  %v1657_v12 = vmul.f32 0.5, %v1646_v63 }
 0x142   :  { %3034 = vtanh.f32 %v1652_v58 }
 0x143   :  { %3036 = vtanh.f32 %v1644_v48 }
 0x144   :  { %3038 = vtanh.f32 %v1657_v12 }
 0x14d   :  { %v3033_v52 = vpop.eup %3032 }
 0x14e   :  { %v1650_v9 = vmul.f32 0.5, %v3033_v52 }
 0x14f   :  { %v3035_v4 = vpop.eup %3034 }
 0x150   :  { %v1651_v7 = vadd.f32 0.5, %v1650_v9  ;;  %v1654_v11 = vmul.f32 0.5, %v3035_v4  ;;  %v3037_v48 = vpop.eup %3036 }
 0x151   :  { %v3039_v63 = vpop.eup %3038 }
 0x152   :  { %v1655_v17 = vadd.f32 0.5, %v1654_v11  ;;  %v1662_v44 = vmul.f32 %v3037_v48, %v1651_v7  ;;  %v1659_v12 = vmul.f32 0.5, %v3039_v63  ;;  %v5204_v11 = vld [vmem:[#allocation34_spill] sm:$0xff]  ;;  %v5206_v48 = vld [vmem:[#allocation36_spill] sm:$0xff] }
 0x153   :  { %v5210_v63 = vld [vmem:[#allocation40_spill] sm:$0xff] }
 0x154   :  { %v1661_v58 = vmul.f32 0.0, %v1655_v17  ;;  %v1660_v52 = vadd.f32 0.5, %v1659_v12  ;;  %v5205_v17 = vld [vmem:[#allocation35_spill] sm:$0xff]  ;;  %v5211_v12 = vld [vmem:[#allocation41_spill] sm:$0xff] }
 0x156   :  { %v1663_v6 = vadd.f32 %v1662_v44, %v1661_v58  ;;  %v5207_v58 = vld [vmem:[#allocation37_spill] sm:$0xff]  ;;  %v5208_v44 = vld [vmem:[#allocation38_spill] sm:$0xff] }
 0x158   :  { %3040 = vtanh.f32 %v1663_v6  ;;  %v4082_v1 = vsel %vm4076_vm7, %v1663_v6, 0.0  ;;  %v5209_v6 = vld [vmem:[#allocation39_spill] sm:$0xff] }
 0x165   :  { %v3041_v18 = vpop.eup %3040 }
 0x166   :  { %v4084_v9 = vmul.f32 %v3041_v18, %v1660_v52  ;;  %v5212_v52 = vld [vmem:[#allocation42_spill] sm:$0xff]  ;;  %v5213_v18 = vld [vmem:[#allocation43_spill] sm:$0xff] }
 0x168   :  { %v4089_v4 = vsel %vm4076_vm7, %v4084_v9, -inf  ;;  %3001 = vmatmul.mubr.msk.f32.vlgmr.msra.gmra.mxu0 %vm4076_vm7, %v4084_v9  ;;  %3002 = vmatmul.mubr.msk.f32.vlgmr.msra.gmra.mxu1 %vm4076_vm7, %v4084_v9 }
 0x169   :  { %1909 = vmatpush1.msra.mxu0 %v3428_v20  ;;  %1980 = vmatpush1.msra.mxu1 %v3430_v21  ;;  %v5183_v20 = vld [vmem:[#allocation13_spill] sm:$0xff]  ;;  %v5184_v21 = vld [vmem:[#allocation14_spill] sm:$0xff] }
 0x16a   :  { %1910 = vmatprep.subr.mxu0 %v3434_v22  ;;  %1981 = vmatprep.subr.mxu1 %v3436_v23  ;;  %v5185_v22 = vld [vmem:[#allocation15_spill] sm:$0xff]  ;;  %v5186_v23 = vld [vmem:[#allocation16_spill] sm:$0xff] }
 0x16b   :  { %1911 = vmatpush1.msra.mxu0 %v3440_v24  ;;  %1982 = vmatpush1.msra.mxu1 %v3442_v25  ;;  %v5187_v24 = vld [vmem:[#allocation17_spill] sm:$0xff]  ;;  %v5188_v25 = vld [vmem:[#allocation18_spill] sm:$0xff]  ;;  %5235 = vst [vmem:[#allocation16_spill] sm:$0xff] %v4267_v53 }
 0x16c   :  { %1912 = vmatprep.subr.mxu0 %v3446_v26  ;;  %1983 = vmatprep.subr.mxu1 %v3448_v27  ;;  %v5189_v26 = vld [vmem:[#allocation19_spill] sm:$0xff]  ;;  %v5190_v27 = vld [vmem:[#allocation20_spill] sm:$0xff]  ;;  %5237 = vst [vmem:[#allocation18_spill] sm:$0xff] %v4273_v55 }
 0x16d   :  { %1913 = vmatpush1.msra.mxu0 %v3452_v28  ;;  %1984 = vmatpush1.msra.mxu1 %v3454_v29  ;;  %v5191_v28 = vld [vmem:[#allocation21_spill] sm:$0xff]  ;;  %v5192_v29 = vld [vmem:[#allocation22_spill] sm:$0xff]  ;;  %5238 = vst [vmem:[#allocation19_spill] sm:$0xff] %v4276_v61  ;;  %5239 = vst [vmem:[#allocation20_spill] sm:$0xff] %v4279_v45 }
 0x16e   :  { %1914 = vmatprep.subr.mxu0 %v3458_v30  ;;  %1985 = vmatprep.subr.mxu1 %v3460_v31  ;;  %v5193_v30 = vld [vmem:[#allocation23_spill] sm:$0xff]  ;;  %v5194_v31 = vld [vmem:[#allocation24_spill] sm:$0xff] }
 0x16f   :  { %1915 = vmatpush1.msra.mxu0 %v3464_v32  ;;  %1986 = vmatpush1.msra.mxu1 %v3466_v33  ;;  %v5195_v32 = vld [vmem:[#allocation25_spill] sm:$0xff]  ;;  %v5196_v33 = vld [vmem:[#allocation26_spill] sm:$0xff] }
 0x170   :  { %1916 = vmatprep.subr.mxu0 %v3470_v34  ;;  %1987 = vmatprep.subr.mxu1 %v3472_v35  ;;  %v5197_v34 = vld [vmem:[#allocation27_spill] sm:$0xff]  ;;  %v5198_v35 = vld [vmem:[#allocation28_spill] sm:$0xff] }
 0x171   :  { %1917 = vmatpush1.msra.mxu0 %v3476_v36  ;;  %1988 = vmatpush1.msra.mxu1 %v3478_v37  ;;  %v5199_v36 = vld [vmem:[#allocation29_spill] sm:$0xff]  ;;  %v5200_v37 = vld [vmem:[#allocation30_spill] sm:$0xff] }
 0x172   :  { %1918 = vmatprep.subr.mxu0 %v3482_v38  ;;  %1989 = vmatprep.subr.mxu1 %v3484_v39  ;;  %v5201_v38 = vld [vmem:[#allocation31_spill] sm:$0xff]  ;;  %v5202_v39 = vld [vmem:[#allocation32_spill] sm:$0xff] }
 0x173   :  { %1919 = vmatpush1.msra.mxu0 %v3488_v40  ;;  %1990 = vmatpush1.msra.mxu1 %v5183_v20  ;;  %v5203_v40 = vld [vmem:[#allocation33_spill] sm:$0xff]  ;;  %v5214_v20 = vld [vmem:[#allocation44_spill] sm:$0xff] }
 0x174   :  { %1920 = vmatprep.subr.mxu0 %v5184_v21  ;;  %1991 = vmatprep.subr.mxu1 %v5185_v22  ;;  %v5215_v21 = vld [vmem:[#allocation45_spill] sm:$0xff]  ;;  %v5216_v22 = vld [vmem:[#allocation46_spill] sm:$0xff] }
 0x175   :  { %1921 = vmatpush1.msra.mxu0 %v5186_v23  ;;  %1992 = vmatpush1.msra.mxu1 %v5187_v24  ;;  %v5217_v23 = vld [vmem:[#allocation47_spill] sm:$0xff]  ;;  %v5218_v24 = vld [vmem:[#allocation48_spill] sm:$0xff] }
 0x176   :  { %1922 = vmatprep.subr.mxu0 %v5188_v25  ;;  %1993 = vmatprep.subr.mxu1 %v5189_v26  ;;  %v5219_v25 = vld [vmem:[#allocation49_spill] sm:$0xff]  ;;  %v5220_v26 = vld [vmem:[#allocation50_spill] sm:$0xff] }
 0x177   :  { %1923 = vmatpush1.msra.mxu0 %v5190_v27  ;;  %1994 = vmatpush1.msra.mxu1 %v5191_v28  ;;  %v5221_v27 = vld [vmem:[#allocation51_spill] sm:$0xff]  ;;  %v5222_v28 = vld [vmem:[#allocation52_spill] sm:$0xff] }
 0x178   :  { %1924 = vmatprep.subr.mxu0 %v5192_v29  ;;  %1995 = vmatprep.subr.mxu1 %v5193_v30  ;;  %v5223_v29 = vmov 0.0   ;;  %v5224_v30 = vld [vmem:[#allocation53_spill] sm:$0xff] }
 0x179   :  { %1925 = vmatpush1.msra.mxu0 %v5194_v31  ;;  %1996 = vmatpush1.msra.mxu1 %v5195_v32  ;;  %v4164_v31 = vld [vmem:[#allocation8 + $0x1e8] sm:$0xff]  ;;  %v4167_v32 = vld [vmem:[#allocation8 + $0x1f8] sm:$0xff] }
 0x17a   :  { %1926 = vmatprep.subr.mxu0 %v5196_v33  ;;  %1997 = vmatprep.subr.mxu1 %v5197_v34  ;;  %5225 = vst [vmem:[#allocation13_spill] sm:$0xff] %v4164_v31  ;;  %5226 = vst [vmem:[#allocation14_spill] sm:$0xff] %v4167_v32 }
 0x17b   :  { %1927 = vmatpush1.msra.mxu0 %v5198_v35  ;;  %1998 = vmatpush1.msra.mxu1 %v5199_v36 }
 0x17c   :  { %1928 = vmatprep.subr.mxu0 %v5200_v37  ;;  %1999 = vmatprep.subr.mxu1 %v5201_v38  ;;  %v5227_v38 = vsel %vm3832_vm10, %v3982_v57, %v3970_v60  ;;  %v4270_v60 = vld [vmem:[#allocation8 + $0x140] sm:$0xff] }
 0x17d   :  { %1929 = vmatpush1.msra.mxu0 %v5202_v39  ;;  %2000 = vmatpush1.msra.mxu1 %v5203_v40  ;;  %5236 = vst [vmem:[#allocation17_spill] sm:$0xff] %v4270_v60 }
 0x17e   :  { %1930 = vmatprep.subr.mxu0 %v5204_v11  ;;  %2001 = vmatprep.subr.mxu1 %v5205_v17 }
 0x17f   :  { %1931 = vmatpush1.msra.mxu0 %v5206_v48  ;;  %2002 = vmatpush1.msra.mxu1 %v5207_v58 }
 0x180   :  { %1932 = vmatprep.subr.mxu0 %v5208_v44  ;;  %2003 = vmatprep.subr.mxu1 %v5209_v6 }
 0x181   :  { %1933 = vmatpush1.msra.mxu0 %v5210_v63  ;;  %2004 = vmatpush1.msra.mxu1 %v5211_v12 }
 0x182   :  { %1934 = vmatprep.subr.mxu0 %v5212_v52  ;;  %2005 = vmatprep.subr.mxu1 %v5213_v18 }
 0x183   :  { %1935 = vmatpush1.msra.mxu0 %v5214_v20  ;;  %2006 = vmatpush1.msra.mxu1 %v5215_v21 }
 0x184   :  { %1936 = vmatprep.subr.mxu0 %v5216_v22  ;;  %2007 = vmatprep.subr.mxu1 %v5217_v23 }
 0x185   :  { %1937 = vmatpush1.msra.mxu0 %v5218_v24  ;;  %2008 = vmatpush1.msra.mxu1 %v5219_v25 }
 0x186   :  { %1938 = vmatprep.subr.mxu0 %v5220_v26  ;;  %2009 = vmatprep.subr.mxu1 %v5221_v27 }
 0x187   :  { %1939 = vmatpush1.msra.mxu0 %v5222_v28  ;;  %1972 = vmatprep.mubr.f32.mxu0 %v5223_v29 }
 0x188   :  { %2010 = vmatpush1.msra.mxu1 %v5224_v30  ;;  %2043 = vmatprep.mubr.f32.mxu1 %v5223_v29 }
 0x189   :  { %2107 = vmatprep.subr.mxu0 %v4164_v31  ;;  %2178 = vmatprep.subr.mxu1 %v4167_v32 }
 0x228   :  { %v1775_v33 = vpop.f32.mrf.mxu0  ;;  %v1846_v35 = vpop.f32.mrf.mxu1 }
 0x229   :  { %v1776_v34 = vadd.f32 %v1775_v33, %v3993_v10  ;;  %v1847_v13 = vadd.f32 %v1846_v35, %v5228_v42  ;;  %v5229_v33 = vsel %vm3848_vm2, %v3986_v16, %v3974_v3  ;;  %v4261_v16 = vld [vmem:[#allocation8 + $0x170] sm:$0xff]  ;;  %v4264_v3 = vld [vmem:[#allocation8 + $0x148] sm:$0xff] }
 0x22a   :  { %v1777_v36 = vpop.f32.mrf.mxu0  ;;  %v1848_v10 = vpop.f32.mrf.mxu1  ;;  %5234 = vst [vmem:[#allocation15_spill] sm:$0xff] %v4264_v3 }
 0x22b   :  { %v1851_v37 = vmul.f32 0.5, %v1776_v34  ;;  %v1778_v7 = vadd.f32 %v1777_v36, %v5227_v38  ;;  %v1849_v34 = vadd.f32 %v1848_v10, %v5229_v33 }
 0x22d   :  { %3042 = vtanh.f32 %v1851_v37  ;;  %v1855_v5 = vmul.f32 0.5, %v1778_v7  ;;  %v1860_v19 = vmul.f32 0.5, %v1849_v34 }
 0x22f   :  { %3044 = vtanh.f32 %v1855_v5 }
 0x230   :  { %3046 = vtanh.f32 %v1847_v13  ;;  %v5231_v13 = vld [vmem:[#allocation57_spill] sm:$0xff] }
 0x231   :  { %3048 = vtanh.f32 %v1860_v19  ;;  %vm5232_vm0 = vcmp.eq.s32.totalorder %v5231_v13, 1  ;;  %v4222_v13 = vld [vmem:[#allocation8 + $0x1c0] sm:$0xff] }
 0x232   :  { %vm1882_vm8 = vmand %vm3743_vm11, %vm5232_vm0 }
 0x233   :  { %vm1883_vm15 = vmor %vm1876_vm12, %vm1882_vm8 }
 0x23a   :  { %v3043_v15 = vpop.eup %3042 }
 0x23b   :  { %v1853_v36 = vmul.f32 0.5, %v3043_v15 }
 0x23c   :  { %v3045_v37 = vpop.eup %3044 }
 0x23d   :  { %v1854_v38 = vadd.f32 0.5, %v1853_v36  ;;  %v1857_v14 = vmul.f32 0.5, %v3045_v37  ;;  %v3047_v57 = vpop.eup %3046  ;;  %v4210_v37 = vld [vmem:[#allocation8 + $0x1e0] sm:$0xff] }
 0x23e   :  { %v3049_v35 = vpop.eup %3048 }
 0x23f   :  { %v1858_v5 = vadd.f32 0.5, %v1857_v14  ;;  %v1865_v42 = vmul.f32 %v3047_v57, %v1854_v38  ;;  %v1862_v8 = vmul.f32 0.5, %v3049_v35  ;;  %v5233_v14 = vsel %vm4076_vm7, %v4084_v9, 0.0  ;;  %v4213_v38 = vld [vmem:[#allocation8 + $0x1f0] sm:$0xff]  ;;  %v4219_v9 = vld [vmem:[#allocation8 + $0x1d8] sm:$0xff]  ;;  %v4240_v35 = vld [vmem:[#allocation8 + $0x188] sm:$0xff] }
 0x241   :  { %v1864_v7 = vmul.f32 %v1858_v5, %v4082_v1  ;;  %v1863_v10 = vadd.f32 0.5, %v1862_v8  ;;  %v4228_v5 = vld [vmem:[#allocation8 + $0x1a8] sm:$0xff]  ;;  %v4243_v8 = vld [vmem:[#allocation8 + $0x198] sm:$0xff] }
 0x243   :  { %v1866_v15 = vadd.f32 %v1865_v42, %v1864_v7  ;;  %v4231_v42 = vld [vmem:[#allocation8 + $0x1b8] sm:$0xff]  ;;  %v4234_v7 = vld [vmem:[#allocation8 + $0x1a0] sm:$0xff] }
 0x245   :  { %3050 = vtanh.f32 %v1866_v15  ;;  %v4196_v19 = vsel %vm1883_vm15, %v1866_v15, %v4082_v1  ;;  %v4237_v15 = vld [vmem:[#allocation8 + $0x1b0] sm:$0xff] }
 0x252   :  { %v3051_v33 = vpop.eup %3050 }
 0x253   :  { %v1868_v34 = vmul.f32 %v3051_v33, %v1863_v10  ;;  %v4246_v10 = vld [vmem:[#allocation8 + $0x180] sm:$0xff]  ;;  %v4249_v33 = vld [vmem:[#allocation8 + $0x190] sm:$0xff] }
 0x255   :  { %v1886_v36 = vmax.f32 %v4089_v4, %v1868_v34  ;;  %v4203_v57 = vsel %vm1883_vm15, %v1868_v34, %v5233_v14  ;;  %v4252_v34 = vld [vmem:[#allocation8 + $0x168] sm:$0xff]  ;;  %v4258_v14 = vld [vmem:[#allocation8 + $0x160] sm:$0xff] }
 0x256   :  { %1973 = vmatmul.mubr.f32.vlgmr.msra.gmra.mxu0 %v4203_v57  ;;  %2044 = vmatmul.mubr.f32.vlgmr.msra.gmra.mxu1 %v4203_v57 }
 0x257   :  { %v4208_v1 = vsel %vm1883_vm15, %v1886_v36, %v4089_v4  ;;  %2108 = vmatpush1.msra.mxu0 %v4210_v37  ;;  %2179 = vmatpush1.msra.mxu1 %v4213_v38  ;;  %v4225_v4 = vld [vmem:[#allocation8 + $0x1d0] sm:$0xff]  ;;  %v4255_v36 = vld [vmem:[#allocation8 + $0x178] sm:$0xff] }
 0x258   :  { %2109 = vmatprep.subr.mxu0 %v4216_v47  ;;  %2180 = vmatprep.subr.mxu1 %v4219_v9 }
 0x259   :  { %2110 = vmatpush1.msra.mxu0 %v4222_v13  ;;  %2181 = vmatpush1.msra.mxu1 %v4225_v4 }
 0x25a   :  { %2111 = vmatprep.subr.mxu0 %v4228_v5  ;;  %2182 = vmatprep.subr.mxu1 %v4231_v42 }
 0x25b   :  { %2112 = vmatpush1.msra.mxu0 %v4234_v7  ;;  %2183 = vmatpush1.msra.mxu1 %v4237_v15 }
 0x25c   :  { %2113 = vmatprep.subr.mxu0 %v4240_v35  ;;  %2184 = vmatprep.subr.mxu1 %v4243_v8 }
 0x25d   :  { %2114 = vmatpush1.msra.mxu0 %v4246_v10  ;;  %2185 = vmatpush1.msra.mxu1 %v4249_v33 }
 0x25e   :  { %2115 = vmatprep.subr.mxu0 %v4252_v34  ;;  %2186 = vmatprep.subr.mxu1 %v4255_v36 }
 0x25f   :  { %2116 = vmatpush1.msra.mxu0 %v4258_v14  ;;  %2187 = vmatpush1.msra.mxu1 %v4261_v16 }
 0x260   :  { %2117 = vmatprep.subr.mxu0 %v4264_v3  ;;  %2188 = vmatprep.subr.mxu1 %v4267_v53  ;;  %v4282_v3 = vld [vmem:[#allocation8 + $0x120] sm:$0xff]  ;;  %v4285_v53 = vld [vmem:[#allocation8 + $0x130] sm:$0xff] }
 0x261   :  { %2118 = vmatpush1.msra.mxu0 %v4270_v60  ;;  %2189 = vmatpush1.msra.mxu1 %v4273_v55  ;;  %5240 = vst [vmem:[#allocation21_spill] sm:$0xff] %v4282_v3  ;;  %5241 = vst [vmem:[#allocation22_spill] sm:$0xff] %v4285_v53  ;;  %v4288_v60 = vld [vmem:[#allocation8 + $0x108] sm:$0xff]  ;;  %v4291_v55 = vld [vmem:[#allocation8 + $0x118] sm:$0xff] }
 0x262   :  { %2119 = vmatprep.subr.mxu0 %v4276_v61  ;;  %2190 = vmatprep.subr.mxu1 %v4279_v45  ;;  %5242 = vst [vmem:[#allocation23_spill] sm:$0xff] %v4288_v60  ;;  %5243 = vst [vmem:[#allocation24_spill] sm:$0xff] %v4291_v55  ;;  %v4294_v61 = vld [vmem:[#allocation8 + $0x100] sm:$0xff]  ;;  %v4297_v45 = vld [vmem:[#allocation8 + $0x110] sm:$0xff] }
 0x263   :  { %2120 = vmatpush1.msra.mxu0 %v4282_v3  ;;  %2191 = vmatpush1.msra.mxu1 %v4285_v53  ;;  %5244 = vst [vmem:[#allocation25_spill] sm:$0xff] %v4294_v61  ;;  %5245 = vst [vmem:[#allocation26_spill] sm:$0xff] %v4297_v45  ;;  %v4300_v3 = vld [vmem:[#allocation8 + $0xe8] sm:$0xff]  ;;  %v4303_v53 = vld [vmem:[#allocation8 + $0xf8] sm:$0xff] }
 0x264   :  { %2121 = vmatprep.subr.mxu0 %v4288_v60  ;;  %2192 = vmatprep.subr.mxu1 %v4291_v55  ;;  %5246 = vst [vmem:[#allocation27_spill] sm:$0xff] %v4300_v3  ;;  %5247 = vst [vmem:[#allocation28_spill] sm:$0xff] %v4303_v53  ;;  %v4306_v60 = vld [vmem:[#allocation8 + $0xe0] sm:$0xff]  ;;  %v4309_v55 = vld [vmem:[#allocation8 + $0xf0] sm:$0xff] }
 0x265   :  { %2122 = vmatpush1.msra.mxu0 %v4294_v61  ;;  %2193 = vmatpush1.msra.mxu1 %v4297_v45  ;;  %5248 = vst [vmem:[#allocation29_spill] sm:$0xff] %v4306_v60  ;;  %5249 = vst [vmem:[#allocation30_spill] sm:$0xff] %v4309_v55  ;;  %v4312_v61 = vld [vmem:[#allocation8 + $0xc8] sm:$0xff]  ;;  %v4315_v45 = vld [vmem:[#allocation8 + $0xd8] sm:$0xff] }
 0x266   :  { %2123 = vmatprep.subr.mxu0 %v4300_v3  ;;  %2194 = vmatprep.subr.mxu1 %v4303_v53  ;;  %v4318_v3 = vld [vmem:[#allocation8 + $0xc0] sm:$0xff]  ;;  %v4321_v53 = vld [vmem:[#allocation8 + $0xd0] sm:$0xff] }
 0x267   :  { %2124 = vmatpush1.msra.mxu0 %v4306_v60  ;;  %2195 = vmatpush1.msra.mxu1 %v4309_v55  ;;  %v4324_v60 = vld [vmem:[#allocation8 + $0xa8] sm:$0xff]  ;;  %v4327_v55 = vld [vmem:[#allocation8 + $0xb8] sm:$0xff] }
 0x268   :  { %2125 = vmatprep.subr.mxu0 %v4312_v61  ;;  %2196 = vmatprep.subr.mxu1 %v4315_v45  ;;  %5250 = vst [vmem:[#allocation31_spill] sm:$0xff] %v4327_v55 }
 0x269   :  { %2126 = vmatpush1.msra.mxu0 %v4318_v3  ;;  %2197 = vmatpush1.msra.mxu1 %v4321_v53 }
 0x26a   :  { %2127 = vmatprep.subr.mxu0 %v4324_v60  ;;  %2198 = vmatprep.subr.mxu1 %v4327_v55 }
 0x26b   :  { %2128 = vmatpush1.msra.mxu0 %v5202_v39  ;;  %2199 = vmatpush1.msra.mxu1 %v5203_v40 }
 0x26c   :  { %2129 = vmatprep.subr.mxu0 %v5204_v11  ;;  %2200 = vmatprep.subr.mxu1 %v5205_v17 }
 0x26d   :  { %2130 = vmatpush1.msra.mxu0 %v5206_v48  ;;  %2201 = vmatpush1.msra.mxu1 %v5207_v58  ;;  %v5251_v58 = vsel %vm3832_vm10, %v3922_v46, %v3914_v0  ;;  %v4466_v46 = vld [vmem:[#allocation8 + $0x58] sm:$0xff]  ;;  %v4469_v0 = vld [vmem:[#allocation8 + $0x40] sm:$0xff] }
 0x26e   :  { %2131 = vmatprep.subr.mxu0 %v5208_v44  ;;  %2202 = vmatprep.subr.mxu1 %v5209_v6  ;;  %v5252_v6 = vsel %vm3844_vm4, %v3782_v56, %v3916_v51  ;;  %v4460_v56 = vld [vmem:[#allocation8 + $0x70] sm:$0xff]  ;;  %v4463_v51 = vld [vmem:[#allocation8 + $0x48] sm:$0xff]  ;;  %5285 = vst [vmem:[#allocation43_spill] sm:$0xff] %v4466_v46  ;;  %5286 = vst [vmem:[#allocation44_spill] sm:$0xff] %v4469_v0 }
 0x26f   :  { %2132 = vmatpush1.msra.mxu0 %v5210_v63  ;;  %2203 = vmatpush1.msra.mxu1 %v5211_v12  ;;  %5283 = vst [vmem:[#allocation41_spill] sm:$0xff] %v4460_v56  ;;  %5284 = vst [vmem:[#allocation42_spill] sm:$0xff] %v4463_v51  ;;  %v5310_v62 = vld [vmem:[#allocation31_spill] sm:$0xff] }
 0x270   :  { %2133 = vmatprep.subr.mxu0 %v5212_v52  ;;  %2204 = vmatprep.subr.mxu1 %v5213_v18  ;;  %v5253_v52 = vsel %vm3848_vm2, %v3926_v49, %v3918_v43  ;;  %v4454_v49 = vld [vmem:[#allocation8 + $0x78] sm:$0xff]  ;;  %v4457_v43 = vld [vmem:[#allocation8 + $0x60] sm:$0xff] }
 0x271   :  { %2134 = vmatpush1.msra.mxu0 %v5214_v20  ;;  %2205 = vmatpush1.msra.mxu1 %v5215_v21  ;;  %5281 = vst [vmem:[#allocation39_spill] sm:$0xff] %v4454_v49  ;;  %5282 = vst [vmem:[#allocation40_spill] sm:$0xff] %v4457_v43 }
 0x272   :  { %2135 = vmatprep.subr.mxu0 %v5216_v22  ;;  %2206 = vmatprep.subr.mxu1 %v5217_v23 }
 0x273   :  { %2136 = vmatpush1.msra.mxu0 %v5218_v24  ;;  %2207 = vmatpush1.msra.mxu1 %v5219_v25 }
 0x274   :  { %2137 = vmatprep.subr.mxu0 %v5220_v26  ;;  %2208 = vmatprep.subr.mxu1 %v5221_v27 }
 0x275   :  { %2138 = vmatpush1.msra.mxu0 %v5222_v28  ;;  %2171 = vmatprep.mubr.f32.mxu0 %v5223_v29 }
 0x276   :  { %2209 = vmatpush1.msra.mxu1 %v5224_v30  ;;  %2242 = vmatprep.mubr.f32.mxu1 %v5223_v29  ;;  %v5254_v30 = vld [vmem:[#allocation60_spill] sm:$0xff] }
 0x277   :  { %2290 = vmatprep.subr.mxu0 %v4164_v31  ;;  %2361 = vmatprep.subr.mxu1 %v4167_v32  ;;  %vm5255_vm14 = vcmp.eq.s32.totalorder %v5254_v30, 1  ;;  %v5271_v30 = vld [vmem:[#allocation28_spill] sm:$0xff] }
 0x278   :  { %vm2081_vm7 = vmand %vm3743_vm11, %vm5255_vm14 }
 0x316   :  { %v1974_v39 = vpop.f32.mrf.mxu0  ;;  %v2045_v11 = vpop.f32.mrf.mxu1 }
 0x317   :  { %v1975_v40 = vadd.f32 %v1974_v39, %v3933_v41  ;;  %v2046_v63 = vadd.f32 %v2045_v11, %v5252_v6  ;;  %v5256_v39 = vld [vmem:[#allocation61_spill] sm:$0xff] }
 0x318   :  { %v1976_v17 = vpop.f32.mrf.mxu0  ;;  %v2047_v41 = vpop.f32.mrf.mxu1  ;;  %vm5257_vm12 = vcmp.eq.s32.totalorder %v5256_v39, 1  ;;  %v5272_v39 = vld [vmem:[#allocation29_spill] sm:$0xff] }
 0x319   :  { %v2050_v48 = vmul.f32 0.5, %v1975_v40  ;;  %v1977_v44 = vadd.f32 %v1976_v17, %v5251_v58  ;;  %v2048_v18 = vadd.f32 %v2047_v41, %v5253_v52  ;;  %vm2075_vm0 = vmand %vm1473_vm9, %vm5257_vm12 }
 0x31a   :  { %vm2082_vm8 = vmor %vm2075_vm0, %vm2081_vm7 }
 0x31b   :  { %3052 = vtanh.f32 %v2050_v48  ;;  %v2054_v12 = vmul.f32 0.5, %v1977_v44  ;;  %v2059_v20 = vmul.f32 0.5, %v2048_v18  ;;  %v5261_v18 = vld [vmem:[#allocation18_spill] sm:$0xff] }
 0x31d   :  { %3054 = vtanh.f32 %v2054_v12 }
 0x31e   :  { %3056 = vtanh.f32 %v2046_v63 }
 0x31f   :  { %3058 = vtanh.f32 %v2059_v20  ;;  %v5262_v20 = vld [vmem:[#allocation19_spill] sm:$0xff] }
 0x328   :  { %v3053_v21 = vpop.eup %3052 }
 0x329   :  { %v2052_v22 = vmul.f32 0.5, %v3053_v21  ;;  %v5263_v21 = vld [vmem:[#allocation20_spill] sm:$0xff] }
 0x32a   :  { %v3055_v23 = vpop.eup %3054 }
 0x32b   :  { %v2053_v24 = vadd.f32 0.5, %v2052_v22  ;;  %v2056_v25 = vmul.f32 0.5, %v3055_v23  ;;  %v3057_v26 = vpop.eup %3056  ;;  %v5264_v22 = vld [vmem:[#allocation21_spill] sm:$0xff]  ;;  %v5265_v23 = vld [vmem:[#allocation22_spill] sm:$0xff] }
 0x32c   :  { %v3059_v48 = vpop.eup %3058 }
 0x32d   :  { %v2057_v27 = vadd.f32 0.5, %v2056_v25  ;;  %v2064_v28 = vmul.f32 %v3057_v26, %v2053_v24  ;;  %v2061_v58 = vmul.f32 0.5, %v3059_v48  ;;  %v5266_v24 = vld [vmem:[#allocation23_spill] sm:$0xff]  ;;  %v5267_v25 = vld [vmem:[#allocation24_spill] sm:$0xff]  ;;  %v5268_v26 = vld [vmem:[#allocation25_spill] sm:$0xff] }
 0x32e   :  { %v4436_v48 = vld [vmem:[#allocation8 + $0xb0] sm:$0xff] }
 0x32f   :  { %v2063_v40 = vmul.f32 %v2057_v27, %v4196_v19  ;;  %v2062_v44 = vadd.f32 0.5, %v2061_v58  ;;  %v5269_v27 = vld [vmem:[#allocation26_spill] sm:$0xff]  ;;  %5275 = vst [vmem:[#allocation33_spill] sm:$0xff] %v4436_v48 }
 0x330   :  { %v4439_v58 = vld [vmem:[#allocation8 + $0x88] sm:$0xff] }
 0x331   :  { %v2065_v11 = vadd.f32 %v2064_v28, %v2063_v40  ;;  %v5270_v28 = vld [vmem:[#allocation27_spill] sm:$0xff]  ;;  %v5273_v40 = vld [vmem:[#allocation30_spill] sm:$0xff]  ;;  %5276 = vst [vmem:[#allocation34_spill] sm:$0xff] %v4439_v58 }
 0x333   :  { %3060 = vtanh.f32 %v2065_v11  ;;  %v4382_v17 = vsel %vm2082_vm8, %v2065_v11, %v4196_v19  ;;  %v5258_v19 = vld [vmem:[#allocation15_spill] sm:$0xff]  ;;  %v4433_v11 = vld [vmem:[#allocation8 + $0xa0] sm:$0xff] }
 0x334   :  { %5274 = vst [vmem:[#allocation32_spill] sm:$0xff] %v4433_v11 }
 0x340   :  { %v3061_v6 = vpop.eup %3060 }
 0x341   :  { %v2067_v63 = vmul.f32 %v3061_v6, %v2062_v44  ;;  %v4442_v44 = vld [vmem:[#allocation8 + $0x98] sm:$0xff]  ;;  %v4445_v6 = vld [vmem:[#allocation8 + $0x80] sm:$0xff] }
 0x342   :  { %5277 = vst [vmem:[#allocation35_spill] sm:$0xff] %v4442_v44  ;;  %5278 = vst [vmem:[#allocation36_spill] sm:$0xff] %v4445_v6 }
 0x343   :  { %v2085_v12 = vmax.f32 %v4208_v1, %v2067_v63  ;;  %v4386_v41 = vsel %vm2082_vm8, %v2067_v63, %v4203_v57  ;;  %v5259_v57 = vld [vmem:[#allocation16_spill] sm:$0xff]  ;;  %v4448_v63 = vld [vmem:[#allocation8 + $0x90] sm:$0xff] }
 0x344   :  { %2172 = vmatmul.mubr.f32.vlgmr.msra.gmra.mxu0 %v4386_v41  ;;  %2243 = vmatmul.mubr.f32.vlgmr.msra.gmra.mxu1 %v4386_v41  ;;  %5279 = vst [vmem:[#allocation37_spill] sm:$0xff] %v4448_v63 }
 0x345   :  { %v4391_v52 = vsel %vm2082_vm8, %v2085_v12, %v4208_v1  ;;  %2291 = vmatpush1.msra.mxu0 %v4210_v37  ;;  %2362 = vmatpush1.msra.mxu1 %v4213_v38  ;;  %v5260_v1 = vld [vmem:[#allocation17_spill] sm:$0xff] }
 0x346   :  { %2292 = vmatprep.subr.mxu0 %v4216_v47  ;;  %2363 = vmatprep.subr.mxu1 %v4219_v9  ;;  %v4451_v12 = vld [vmem:[#allocation8 + $0x68] sm:$0xff] }
 0x347   :  { %2293 = vmatpush1.msra.mxu0 %v4222_v13  ;;  %2364 = vmatpush1.msra.mxu1 %v4225_v4  ;;  %5280 = vst [vmem:[#allocation38_spill] sm:$0xff] %v4451_v12 }
 0x348   :  { %2294 = vmatprep.subr.mxu0 %v4228_v5  ;;  %2365 = vmatprep.subr.mxu1 %v4231_v42 }
 0x349   :  { %2295 = vmatpush1.msra.mxu0 %v4234_v7  ;;  %2366 = vmatpush1.msra.mxu1 %v4237_v15 }
 0x34a   :  { %2296 = vmatprep.subr.mxu0 %v4240_v35  ;;  %2367 = vmatprep.subr.mxu1 %v4243_v8 }
 0x34b   :  { %2297 = vmatpush1.msra.mxu0 %v4246_v10  ;;  %2368 = vmatpush1.msra.mxu1 %v4249_v33 }
 0x34c   :  { %2298 = vmatprep.subr.mxu0 %v4252_v34  ;;  %2369 = vmatprep.subr.mxu1 %v4255_v36 }
 0x34d   :  { %2299 = vmatpush1.msra.mxu0 %v4258_v14  ;;  %2370 = vmatpush1.msra.mxu1 %v4261_v16 }
 0x34e   :  { %2300 = vmatprep.subr.mxu0 %v5258_v19  ;;  %2371 = vmatprep.subr.mxu1 %v5259_v57 }
 0x34f   :  { %2301 = vmatpush1.msra.mxu0 %v5260_v1  ;;  %2372 = vmatpush1.msra.mxu1 %v5261_v18 }
 0x350   :  { %2302 = vmatprep.subr.mxu0 %v5262_v20  ;;  %2373 = vmatprep.subr.mxu1 %v5263_v21 }
 0x351   :  { %2303 = vmatpush1.msra.mxu0 %v5264_v22  ;;  %2374 = vmatpush1.msra.mxu1 %v5265_v23 }
 0x352   :  { %2304 = vmatprep.subr.mxu0 %v5266_v24  ;;  %2375 = vmatprep.subr.mxu1 %v5267_v25 }
 0x353   :  { %2305 = vmatpush1.msra.mxu0 %v5268_v26  ;;  %2376 = vmatpush1.msra.mxu1 %v5269_v27 }
 0x354   :  { %2306 = vmatprep.subr.mxu0 %v5270_v28  ;;  %2377 = vmatprep.subr.mxu1 %v5271_v30 }
 0x355   :  { %2307 = vmatpush1.msra.mxu0 %v5272_v39  ;;  %2378 = vmatpush1.msra.mxu1 %v5273_v40 }
 0x356   :  { %2308 = vmatprep.subr.mxu0 %v4312_v61  ;;  %2379 = vmatprep.subr.mxu1 %v4315_v45 }
 0x357   :  { %2309 = vmatpush1.msra.mxu0 %v4318_v3  ;;  %2380 = vmatpush1.msra.mxu1 %v4321_v53 }
 0x358   :  { %2310 = vmatprep.subr.mxu0 %v4324_v60  ;;  %2381 = vmatprep.subr.mxu1 %v4327_v55 }
 0x359   :  { %2311 = vmatpush1.msra.mxu0 %v4433_v11  ;;  %2382 = vmatpush1.msra.mxu1 %v4436_v48 }
 0x35a   :  { %2312 = vmatprep.subr.mxu0 %v4439_v58  ;;  %2383 = vmatprep.subr.mxu1 %v4442_v44 }
 0x35b   :  { %2313 = vmatpush1.msra.mxu0 %v4445_v6  ;;  %2384 = vmatpush1.msra.mxu1 %v4448_v63  ;;  %v5298_v6 = vld [vmem:[#allocation70_spill] sm:$0xff] }
 0x35c   :  { %2314 = vmatprep.subr.mxu0 %v4451_v12  ;;  %2385 = vmatprep.subr.mxu1 %v4454_v49  ;;  %v4472_v49 = vld [vmem:[#allocation8 + $0x50] sm:$0xff] }
 0x35d   :  { %2315 = vmatpush1.msra.mxu0 %v4457_v43  ;;  %2386 = vmatpush1.msra.mxu1 %v4460_v56  ;;  %5287 = vst [vmem:[#allocation45_spill] sm:$0xff] %v4472_v49  ;;  %v4475_v43 = vld [vmem:[#allocation8 + $0x28] sm:$0xff]  ;;  %v4478_v56 = vld [vmem:[#allocation8 + $0x38] sm:$0xff] }
 0x35e   :  { %2316 = vmatprep.subr.mxu0 %v4463_v51  ;;  %2387 = vmatprep.subr.mxu1 %v4466_v46  ;;  %5288 = vst [vmem:[#allocation46_spill] sm:$0xff] %v4475_v43  ;;  %5289 = vst [vmem:[#allocation47_spill] sm:$0xff] %v4478_v56  ;;  %v4481_v51 = vld [vmem:[#allocation8 + $0x20] sm:$0xff]  ;;  %v4484_v46 = vld [vmem:[#allocation8 + $0x30] sm:$0xff] }
 0x35f   :  { %2317 = vmatpush1.msra.mxu0 %v4469_v0  ;;  %2388 = vmatpush1.msra.mxu1 %v4472_v49  ;;  %5290 = vst [vmem:[#allocation48_spill] sm:$0xff] %v4481_v51  ;;  %5291 = vst [vmem:[#allocation49_spill] sm:$0xff] %v4484_v46  ;;  %v4487_v0 = vld [vmem:[#allocation8 + $0x8] sm:$0xff]  ;;  %v4490_v49 = vld [vmem:[#allocation8 + $0x18] sm:$0xff] }
 0x360   :  { %2318 = vmatprep.subr.mxu0 %v4475_v43  ;;  %2389 = vmatprep.subr.mxu1 %v4478_v56  ;;  %5292 = vst [vmem:[#allocation50_spill] sm:$0xff] %v4487_v0  ;;  %5293 = vst [vmem:[#allocation51_spill] sm:$0xff] %v4490_v49  ;;  %v4493_v43 = vld [vmem:[#allocation8] sm:$0xff]  ;;  %v4497_v56 = vld [vmem:[#allocation8 + $0x10] sm:$0xff] }
 0x361   :  { %2319 = vmatpush1.msra.mxu0 %v4481_v51  ;;  %2390 = vmatpush1.msra.mxu1 %v4484_v46  ;;  %5294 = vst [vmem:[#allocation52_spill] sm:$0xff] %v4493_v43  ;;  %5295 = vst [vmem:[#allocation53_spill] sm:$0xff] %v4497_v56  ;;  %v5296_v46 = vld [vmem:[#allocation74_spill] sm:$0xff] }
 0x362   :  { %2320 = vmatprep.subr.mxu0 %v4487_v0  ;;  %2391 = vmatprep.subr.mxu1 %v4490_v49 }
 0x363   :  { %2321 = vmatpush1.msra.mxu0 %v4493_v43  ;;  %2354 = vmatprep.mubr.f32.mxu0 %v5223_v29  ;;  %v5297_v43 = vld [vmem:[#allocation73_spill] sm:$0xff] }
 0x364   :  { %2392 = vmatpush1.msra.mxu1 %v4497_v56  ;;  %2425 = vmatprep.mubr.f32.mxu1 %v5223_v29  ;;  %v5299_v44 = vsel %vm3832_vm10, %v5297_v43, %v5298_v6  ;;  %v5300_v56 = vld [vmem:[#allocation63_spill] sm:$0xff] }
 0x365   :  { %2461 = vmatprep.subr.mxu0 %v4164_v31  ;;  %2532 = vmatprep.subr.mxu1 %v4167_v32  ;;  %v5301_v29 = vld [vmem:[#allocation71_spill] sm:$0xff] }
 0x366   :  { %v5302_v31 = vsel %vm3844_vm4, %v5300_v56, %v5301_v29 }
 0x404   :  { %v2173_v0 = vpop.f32.mrf.mxu0  ;;  %v2244_v49 = vpop.f32.mrf.mxu1 }
 0x405   :  { %v2174_v51 = vadd.f32 %v2173_v0, %v5296_v46  ;;  %v2245_v48 = vadd.f32 %v2244_v49, %v5302_v31  ;;  %v5304_v0 = vld [vmem:[#allocation72_spill] sm:$0xff] }
 0x406   :  { %v2175_v12 = vpop.f32.mrf.mxu0  ;;  %v2246_v46 = vpop.f32.mrf.mxu1  ;;  %v5306_v31 = vld [vmem:[#allocation64_spill] sm:$0xff] }
 0x407   :  { %v2249_v63 = vmul.f32 0.5, %v2174_v51  ;;  %v2176_v58 = vadd.f32 %v2175_v12, %v5299_v44  ;;  %v5303_v51 = vld [vmem:[#allocation67_spill] sm:$0xff]  ;;  %vm5307_vm15 = vcmp.eq.s32.totalorder %v5306_v31, 1 }
 0x408   :  { %v5305_v50 = vsel %vm3848_vm2, %v5303_v51, %v5304_v0  ;;  %vm2280_vm14 = vmand %vm3743_vm11, %vm5307_vm15  ;;  %v5318_v31 = vld [vmem:[#allocation39_spill] sm:$0xff] }
 0x409   :  { %3062 = vtanh.f32 %v2249_v63  ;;  %v2253_v32 = vmul.f32 0.5, %v2176_v58  ;;  %v2247_v11 = vadd.f32 %v2246_v46, %v5305_v50 }
 0x40b   :  { %3064 = vtanh.f32 %v2253_v32  ;;  %v2258_v55 = vmul.f32 0.5, %v2247_v11  ;;  %v5308_v32 = vld [vmem:[#allocation66_spill] sm:$0xff] }
 0x40c   :  { %3066 = vtanh.f32 %v2245_v48  ;;  %vm5309_vm7 = vcmp.eq.s32.totalorder %v5308_v32, 1  ;;  %v5319_v32 = vld [vmem:[#allocation40_spill] sm:$0xff] }
 0x40d   :  { %3068 = vtanh.f32 %v2258_v55  ;;  %vm2274_vm12 = vmand %vm1473_vm9, %vm5309_vm7 }
 0x40e   :  { %vm2281_vm0 = vmor %vm2274_vm12, %vm2280_vm14 }
 0x40f   :  { %vm5430_vm9 = vmor %vm3788_vm1, %vm3752_vm13 }
 0x416   :  { %v3063_v43 = vpop.eup %3062 }
 0x417   :  { %v2251_v44 = vmul.f32 0.5, %v3063_v43 }
 0x418   :  { %v3065_v63 = vpop.eup %3064 }
 0x419   :  { %v2252_v12 = vadd.f32 0.5, %v2251_v44  ;;  %v2255_v54 = vmul.f32 0.5, %v3065_v63  ;;  %v3067_v6 = vpop.eup %3066  ;;  %v5314_v44 = vld [vmem:[#allocation35_spill] sm:$0xff]  ;;  %v5315_v63 = vld [vmem:[#allocation36_spill] sm:$0xff] }
 0x41b   :  { %v2256_v56 = vadd.f32 0.5, %v2255_v54  ;;  %v2263_v49 = vmul.f32 %v3067_v6, %v2252_v12  ;;  %v3069_v54 = vpop.eup %3068  ;;  %v5316_v12 = vld [vmem:[#allocation37_spill] sm:$0xff] }
 0x41c   :  { %v2260_v11 = vmul.f32 0.5, %v3069_v54  ;;  %v5322_v54 = vld [vmem:[#allocation43_spill] sm:$0xff] }
 0x41d   :  { %v2262_v50 = vmul.f32 %v2256_v56, %v4382_v17 }
 0x41e   :  { %v2261_v48 = vadd.f32 0.5, %v2260_v11  ;;  %v5323_v11 = vld [vmem:[#allocation44_spill] sm:$0xff] }
 0x41f   :  { %v2264_v43 = vadd.f32 %v2263_v49, %v2262_v50  ;;  %v5317_v49 = vld [vmem:[#allocation38_spill] sm:$0xff]  ;;  %v5320_v50 = vld [vmem:[#allocation41_spill] sm:$0xff] }
 0x421   :  { %3070 = vtanh.f32 %v2264_v43  ;;  %v4529_v55 = vsel %vm2281_vm0, %v2264_v43, %v4382_v17  ;;  %v5311_v17 = vld [vmem:[#allocation32_spill] sm:$0xff]  ;;  %v5321_v43 = vld [vmem:[#allocation42_spill] sm:$0xff] }
 0x42e   :  { %v3071_v58 = vpop.eup %3070 }
 0x42f   :  { %v2266_v6 = vmul.f32 %v3071_v58, %v2261_v48  ;;  %v5324_v48 = vld [vmem:[#allocation45_spill] sm:$0xff]  ;;  %v5325_v58 = vld [vmem:[#allocation46_spill] sm:$0xff] }
 0x431   :  { %v2284_v2 = vmax.f32 %v4391_v52, %v2266_v6  ;;  %v4533_v46 = vsel %vm2281_vm0, %v2266_v6, %v4386_v41  ;;  %v5312_v41 = vld [vmem:[#allocation33_spill] sm:$0xff]  ;;  %v5326_v6 = vld [vmem:[#allocation47_spill] sm:$0xff] }
 0x432   :  { %2355 = vmatmul.mubr.f32.vlgmr.msra.gmra.mxu0 %v4533_v46  ;;  %2426 = vmatmul.mubr.f32.vlgmr.msra.gmra.mxu1 %v4533_v46 }
 0x433   :  { %v4538_v56 = vsel %vm2281_vm0, %v2284_v2, %v4391_v52  ;;  %2462 = vmatpush1.msra.mxu0 %v4210_v37  ;;  %2533 = vmatpush1.msra.mxu1 %v4213_v38  ;;  %v5313_v52 = vld [vmem:[#allocation34_spill] sm:$0xff]  ;;  %v5327_v2 = vld [vmem:[#allocation48_spill] sm:$0xff] }
 0x434   :  { %2463 = vmatprep.subr.mxu0 %v4216_v47  ;;  %2534 = vmatprep.subr.mxu1 %v4219_v9 }
 0x435   :  { %2464 = vmatpush1.msra.mxu0 %v4222_v13  ;;  %2535 = vmatpush1.msra.mxu1 %v4225_v4 }
 0x436   :  { %2465 = vmatprep.subr.mxu0 %v4228_v5  ;;  %2536 = vmatprep.subr.mxu1 %v4231_v42 }
 0x437   :  { %2466 = vmatpush1.msra.mxu0 %v4234_v7  ;;  %2537 = vmatpush1.msra.mxu1 %v4237_v15 }
 0x438   :  { %2467 = vmatprep.subr.mxu0 %v4240_v35  ;;  %2538 = vmatprep.subr.mxu1 %v4243_v8 }
 0x439   :  { %2468 = vmatpush1.msra.mxu0 %v4246_v10  ;;  %2539 = vmatpush1.msra.mxu1 %v4249_v33 }
 0x43a   :  { %2469 = vmatprep.subr.mxu0 %v4252_v34  ;;  %2540 = vmatprep.subr.mxu1 %v4255_v36 }
 0x43b   :  { %2470 = vmatpush1.msra.mxu0 %v4258_v14  ;;  %2541 = vmatpush1.msra.mxu1 %v4261_v16 }
 0x43c   :  { %2471 = vmatprep.subr.mxu0 %v5258_v19  ;;  %2542 = vmatprep.subr.mxu1 %v5259_v57 }
 0x43d   :  { %2472 = vmatpush1.msra.mxu0 %v5260_v1  ;;  %2543 = vmatpush1.msra.mxu1 %v5261_v18 }
 0x43e   :  { %2473 = vmatprep.subr.mxu0 %v5262_v20  ;;  %2544 = vmatprep.subr.mxu1 %v5263_v21 }
 0x43f   :  { %2474 = vmatpush1.msra.mxu0 %v5264_v22  ;;  %2545 = vmatpush1.msra.mxu1 %v5265_v23 }
 0x440   :  { %2475 = vmatprep.subr.mxu0 %v5266_v24  ;;  %2546 = vmatprep.subr.mxu1 %v5267_v25 }
 0x441   :  { %2476 = vmatpush1.msra.mxu0 %v5268_v26  ;;  %2547 = vmatpush1.msra.mxu1 %v5269_v27 }
 0x442   :  { %2477 = vmatprep.subr.mxu0 %v5270_v28  ;;  %2548 = vmatprep.subr.mxu1 %v5271_v30 }
 0x443   :  { %2478 = vmatpush1.msra.mxu0 %v5272_v39  ;;  %2549 = vmatpush1.msra.mxu1 %v5273_v40 }
 0x444   :  { %2479 = vmatprep.subr.mxu0 %v4312_v61  ;;  %2550 = vmatprep.subr.mxu1 %v4315_v45 }
 0x445   :  { %2480 = vmatpush1.msra.mxu0 %v4318_v3  ;;  %2551 = vmatpush1.msra.mxu1 %v4321_v53 }
 0x446   :  { %2481 = vmatprep.subr.mxu0 %v4324_v60  ;;  %2552 = vmatprep.subr.mxu1 %v5310_v62 }
 0x447   :  { %2482 = vmatpush1.msra.mxu0 %v5311_v17  ;;  %2553 = vmatpush1.msra.mxu1 %v5312_v41 }
 0x448   :  { %2483 = vmatprep.subr.mxu0 %v5313_v52  ;;  %2554 = vmatprep.subr.mxu1 %v5314_v44 }
 0x449   :  { %2484 = vmatpush1.msra.mxu0 %v5315_v63  ;;  %2555 = vmatpush1.msra.mxu1 %v5316_v12 }
 0x44a   :  { %2485 = vmatprep.subr.mxu0 %v5317_v49  ;;  %2556 = vmatprep.subr.mxu1 %v5318_v31  ;;  %v5328_v49 = vld [vmem:[#allocation49_spill] sm:$0xff]  ;;  %v5329_v31 = vld [vmem:[#allocation50_spill] sm:$0xff] }
 0x44b   :  { %2486 = vmatpush1.msra.mxu0 %v5319_v32  ;;  %2557 = vmatpush1.msra.mxu1 %v5320_v50  ;;  %v5330_v32 = vld [vmem:[#allocation51_spill] sm:$0xff]  ;;  %v5331_v50 = vld [vmem:[#allocation52_spill] sm:$0xff] }
 0x44c   :  { %2487 = vmatprep.subr.mxu0 %v5321_v43  ;;  %2558 = vmatprep.subr.mxu1 %v5322_v54  ;;  %v5332_v43 = vmov 0.0   ;;  %v5333_v54 = vld [vmem:[#allocation53_spill] sm:$0xff] }
 0x44d   :  { %2488 = vmatpush1.msra.mxu0 %v5323_v11  ;;  %2559 = vmatpush1.msra.mxu1 %v5324_v48  ;;  %v5334_v48 = vld [vmem:[#allocation13_spill] sm:$0xff] }
 0x44e   :  { %2489 = vmatprep.subr.mxu0 %v5325_v58  ;;  %2560 = vmatprep.subr.mxu1 %v5326_v6  ;;  %v5335_v58 = vld [vmem:[#allocation14_spill] sm:$0xff] }
 0x44f   :  { %2490 = vmatpush1.msra.mxu0 %v5327_v2  ;;  %2561 = vmatpush1.msra.mxu1 %v5328_v49  ;;  %v5336_v2 = vld [vmem:[#allocation75_spill] sm:$0xff] }
 0x450   :  { %2491 = vmatprep.subr.mxu0 %v5329_v31  ;;  %2562 = vmatprep.subr.mxu1 %v5330_v32  ;;  %v5338_v32 = vld [vmem:[#allocation70_spill] sm:$0xff] }
 0x451   :  { %2492 = vmatpush1.msra.mxu0 %v5331_v50  ;;  %2525 = vmatprep.mubr.f32.mxu0 %v5332_v43  ;;  %v5339_v50 = vld [vmem:[#allocation73_spill] sm:$0xff] }
 0x452   :  { %2563 = vmatpush1.msra.mxu1 %v5333_v54  ;;  %2596 = vmatprep.mubr.f32.mxu1 %v5332_v43  ;;  %v5340_v44 = vsel %vm3832_vm10, %v5338_v32, %v5339_v50  ;;  %v5342_v43 = vld [vmem:[#allocation63_spill] sm:$0xff] }
 0x453   :  { %2632 = vmatprep.subr.mxu0 %v5334_v48  ;;  %2703 = vmatprep.subr.mxu1 %v5335_v58  ;;  %v5343_v48 = vsel %vm3844_vm4, %v5301_v29, %v5342_v43  ;;  %v5358_v43 = vld [vmem:[#allocation45_spill] sm:$0xff] }
 0x4f2   :  { %v2356_v6 = vpop.f32.mrf.mxu0  ;;  %v2427_v49 = vpop.f32.mrf.mxu1 }
 0x4f3   :  { %v2357_v11 = vadd.f32 %v2356_v6, %v5336_v2  ;;  %v2428_v41 = vadd.f32 %v2427_v49, %v5343_v48 }
 0x4f4   :  { %v2358_v12 = vpop.f32.mrf.mxu0  ;;  %v2429_v6 = vpop.f32.mrf.mxu1 }
 0x4f5   :  { %v2432_v31 = vmul.f32 0.5, %v2357_v11  ;;  %v2359_v52 = vadd.f32 %v2358_v12, %v5340_v44  ;;  %v5344_v11 = vsel %vm3848_vm2, %v5304_v0, %v5303_v51 }
 0x4f6   :  { %v2430_v2 = vadd.f32 %v2429_v6, %v5344_v11 }
 0x4f7   :  { %3072 = vtanh.f32 %v2432_v31  ;;  %v2436_v58 = vmul.f32 0.5, %v2359_v52 }
 0x4f8   :  { %v2441_v63 = vmul.f32 0.5, %v2430_v2 }
 0x4f9   :  { %3074 = vtanh.f32 %v2436_v58 }
 0x4fa   :  { %3076 = vtanh.f32 %v2428_v41 }
 0x4fb   :  { %3078 = vtanh.f32 %v2441_v63 }
 0x504   :  { %v3073_v32 = vpop.eup %3072 }
 0x505   :  { %v2434_v44 = vmul.f32 0.5, %v3073_v32  ;;  %v5349_v32 = vld [vmem:[#allocation36_spill] sm:$0xff] }
 0x506   :  { %v3075_v12 = vpop.eup %3074 }
 0x507   :  { %v2435_v31 = vadd.f32 0.5, %v2434_v44  ;;  %v2438_v50 = vmul.f32 0.5, %v3075_v12  ;;  %v3077_v54 = vpop.eup %3076  ;;  %v5350_v44 = vld [vmem:[#allocation37_spill] sm:$0xff]  ;;  %v5351_v12 = vld [vmem:[#allocation38_spill] sm:$0xff] }
 0x508   :  { %v3079_v51 = vpop.eup %3078 }
 0x509   :  { %v2439_v29 = vadd.f32 0.5, %v2438_v50  ;;  %v2446_v49 = vmul.f32 %v3077_v54, %v2435_v31  ;;  %v2443_v0 = vmul.f32 0.5, %v3079_v51  ;;  %v5348_v54 = vld [vmem:[#allocation35_spill] sm:$0xff]  ;;  %v5353_v50 = vld [vmem:[#allocation40_spill] sm:$0xff]  ;;  %v5359_v51 = vld [vmem:[#allocation46_spill] sm:$0xff] }
 0x50a   :  { %v5352_v31 = vld [vmem:[#allocation39_spill] sm:$0xff] }
 0x50b   :  { %v2445_v52 = vmul.f32 %v2439_v29, %v4529_v55  ;;  %v2444_v58 = vadd.f32 0.5, %v2443_v0  ;;  %v5354_v29 = vld [vmem:[#allocation41_spill] sm:$0xff]  ;;  %v5360_v0 = vld [vmem:[#allocation47_spill] sm:$0xff] }
 0x50d   :  { %v2447_v41 = vadd.f32 %v2446_v49, %v2445_v52  ;;  %v5355_v49 = vld [vmem:[#allocation42_spill] sm:$0xff]  ;;  %v5356_v52 = vld [vmem:[#allocation43_spill] sm:$0xff] }
 0x50f   :  { %3080 = vtanh.f32 %v2447_v41  ;;  %v4626_v48 = vsel %vm3910_vm3, %v2447_v41, %v4529_v55  ;;  %v5357_v41 = vld [vmem:[#allocation44_spill] sm:$0xff] }
 0x51c   :  { %v3081_v6 = vpop.eup %3080 }
 0x51d   :  { %v2449_v11 = vmul.f32 %v3081_v6, %v2444_v58  ;;  %v5361_v58 = vld [vmem:[#allocation48_spill] sm:$0xff]  ;;  %v5362_v6 = vld [vmem:[#allocation49_spill] sm:$0xff] }
 0x51f   :  { %v2455_v2 = vmax.f32 %v4538_v56, %v2449_v11  ;;  %v4632_v63 = vsel %vm3910_vm3, %v2449_v11, %v4533_v46  ;;  %v5346_v46 = vld [vmem:[#allocation33_spill] sm:$0xff]  ;;  %v5363_v11 = vld [vmem:[#allocation50_spill] sm:$0xff] }
 0x520   :  { %2526 = vmatmul.mubr.f32.vlgmr.msra.gmra.mxu0 %v4632_v63  ;;  %2597 = vmatmul.mubr.f32.vlgmr.msra.gmra.mxu1 %v4632_v63 }
 0x521   :  { %v4639_v55 = vsel %vm3910_vm3, %v2455_v2, %v4538_v56  ;;  %2633 = vmatpush1.msra.mxu0 %v4210_v37  ;;  %2704 = vmatpush1.msra.mxu1 %v4213_v38  ;;  %v5347_v56 = vld [vmem:[#allocation34_spill] sm:$0xff]  ;;  %v5364_v2 = vld [vmem:[#allocation51_spill] sm:$0xff] }
 0x522   :  { %2634 = vmatprep.subr.mxu0 %v4216_v47  ;;  %2705 = vmatprep.subr.mxu1 %v4219_v9 }
 0x523   :  { %2635 = vmatpush1.msra.mxu0 %v4222_v13  ;;  %2706 = vmatpush1.msra.mxu1 %v4225_v4 }
 0x524   :  { %2636 = vmatprep.subr.mxu0 %v4228_v5  ;;  %2707 = vmatprep.subr.mxu1 %v4231_v42 }
 0x525   :  { %2637 = vmatpush1.msra.mxu0 %v4234_v7  ;;  %2708 = vmatpush1.msra.mxu1 %v4237_v15 }
 0x526   :  { %2638 = vmatprep.subr.mxu0 %v4240_v35  ;;  %2709 = vmatprep.subr.mxu1 %v4243_v8 }
 0x527   :  { %2639 = vmatpush1.msra.mxu0 %v4246_v10  ;;  %2710 = vmatpush1.msra.mxu1 %v4249_v33 }
 0x528   :  { %2640 = vmatprep.subr.mxu0 %v4252_v34  ;;  %2711 = vmatprep.subr.mxu1 %v4255_v36 }
 0x529   :  { %2641 = vmatpush1.msra.mxu0 %v4258_v14  ;;  %2712 = vmatpush1.msra.mxu1 %v4261_v16 }
 0x52a   :  { %2642 = vmatprep.subr.mxu0 %v5258_v19  ;;  %2713 = vmatprep.subr.mxu1 %v5259_v57 }
 0x52b   :  { %2643 = vmatpush1.msra.mxu0 %v5260_v1  ;;  %2714 = vmatpush1.msra.mxu1 %v5261_v18 }
 0x52c   :  { %2644 = vmatprep.subr.mxu0 %v5262_v20  ;;  %2715 = vmatprep.subr.mxu1 %v5263_v21 }
 0x52d   :  { %2645 = vmatpush1.msra.mxu0 %v5264_v22  ;;  %2716 = vmatpush1.msra.mxu1 %v5265_v23 }
 0x52e   :  { %2646 = vmatprep.subr.mxu0 %v5266_v24  ;;  %2717 = vmatprep.subr.mxu1 %v5267_v25 }
 0x52f   :  { %2647 = vmatpush1.msra.mxu0 %v5268_v26  ;;  %2718 = vmatpush1.msra.mxu1 %v5269_v27 }
 0x530   :  { %2648 = vmatprep.subr.mxu0 %v5270_v28  ;;  %2719 = vmatprep.subr.mxu1 %v5271_v30 }
 0x531   :  { %2649 = vmatpush1.msra.mxu0 %v5272_v39  ;;  %2720 = vmatpush1.msra.mxu1 %v5273_v40 }
 0x532   :  { %2650 = vmatprep.subr.mxu0 %v4312_v61  ;;  %2721 = vmatprep.subr.mxu1 %v4315_v45 }
 0x533   :  { %2651 = vmatpush1.msra.mxu0 %v4318_v3  ;;  %2722 = vmatpush1.msra.mxu1 %v4321_v53 }
 0x534   :  { %2652 = vmatprep.subr.mxu0 %v4324_v60  ;;  %2723 = vmatprep.subr.mxu1 %v5310_v62 }
 0x535   :  { %2653 = vmatpush1.msra.mxu0 %v5311_v17  ;;  %2724 = vmatpush1.msra.mxu1 %v5346_v46 }
 0x536   :  { %2654 = vmatprep.subr.mxu0 %v5347_v56  ;;  %2725 = vmatprep.subr.mxu1 %v5348_v54 }
 0x537   :  { %2655 = vmatpush1.msra.mxu0 %v5349_v32  ;;  %2726 = vmatpush1.msra.mxu1 %v5350_v44  ;;  %v5377_v32 = vld [vmem:[#allocation58_spill] sm:$0xff] }
 0x538   :  { %2656 = vmatprep.subr.mxu0 %v5351_v12  ;;  %2727 = vmatprep.subr.mxu1 %v5352_v31 }
 0x539   :  { %2657 = vmatpush1.msra.mxu0 %v5353_v50  ;;  %2728 = vmatpush1.msra.mxu1 %v5354_v29  ;;  %v5365_v29 = vld [vmem:[#allocation52_spill] sm:$0xff] }
 0x53a   :  { %2658 = vmatprep.subr.mxu0 %v5355_v49  ;;  %2729 = vmatprep.subr.mxu1 %v5356_v52  ;;  %v5366_v49 = vmov 0.0   ;;  %v5367_v52 = vld [vmem:[#allocation53_spill] sm:$0xff] }
 0x53b   :  { %2659 = vmatpush1.msra.mxu0 %v5357_v41  ;;  %2730 = vmatpush1.msra.mxu1 %v5358_v43  ;;  %v5368_v43 = vld [vmem:[#allocation13_spill] sm:$0xff] }
 0x53c   :  { %2660 = vmatprep.subr.mxu0 %v5359_v51  ;;  %2731 = vmatprep.subr.mxu1 %v5360_v0  ;;  %v5369_v51 = vld [vmem:[#allocation14_spill] sm:$0xff] }
 0x53d   :  { %2661 = vmatpush1.msra.mxu0 %v5361_v58  ;;  %2732 = vmatpush1.msra.mxu1 %v5362_v6  ;;  %v5370_v58 = vld [vmem:[#allocation82_spill] sm:$0xff] }
 0x53e   :  { %2662 = vmatprep.subr.mxu0 %v5363_v11  ;;  %2733 = vmatprep.subr.mxu1 %v5364_v2  ;;  %v5372_v2 = vld [vmem:[#allocation77_spill] sm:$0xff] }
 0x53f   :  { %2663 = vmatpush1.msra.mxu0 %v5365_v29  ;;  %2696 = vmatprep.mubr.f32.mxu0 %v5366_v49  ;;  %v5373_v29 = vld [vmem:[#allocation80_spill] sm:$0xff] }
 0x540   :  { %2734 = vmatpush1.msra.mxu1 %v5367_v52  ;;  %2767 = vmatprep.mubr.f32.mxu1 %v5366_v49  ;;  %v5374_v12 = vsel %vm3832_vm10, %v5372_v2, %v5373_v29  ;;  %v5376_v49 = vld [vmem:[#allocation78_spill] sm:$0xff] }
 0x541   :  { %2803 = vmatprep.subr.mxu0 %v5368_v43  ;;  %2874 = vmatprep.subr.mxu1 %v5369_v51  ;;  %v5378_v43 = vsel %vm3844_vm4, %v5376_v49, %v5377_v32 }
 0x5e0   :  { %v2527_v0 = vpop.f32.mrf.mxu0  ;;  %v2598_v6 = vpop.f32.mrf.mxu1 }
 0x5e1   :  { %v2528_v41 = vadd.f32 %v2527_v0, %v5370_v58  ;;  %v2599_v54 = vadd.f32 %v2598_v6, %v5378_v43  ;;  %v5380_v58 = vld [vmem:[#allocation81_spill] sm:$0xff] }
 0x5e2   :  { %v2529_v50 = vpop.f32.mrf.mxu0  ;;  %v2600_v0 = vpop.f32.mrf.mxu1 }
 0x5e3   :  { %v2603_v11 = vmul.f32 0.5, %v2528_v41  ;;  %v2530_v44 = vadd.f32 %v2529_v50, %v5374_v12  ;;  %v5379_v41 = vld [vmem:[#allocation79_spill] sm:$0xff] }
 0x5e4   :  { %v5381_v31 = vsel %vm3848_vm2, %v5379_v41, %v5380_v58 }
 0x5e5   :  { %3082 = vtanh.f32 %v2603_v11  ;;  %v2607_v51 = vmul.f32 0.5, %v2530_v44  ;;  %v2601_v56 = vadd.f32 %v2600_v0, %v5381_v31 }
 0x5e7   :  { %3084 = vtanh.f32 %v2607_v51  ;;  %v2612_v46 = vmul.f32 0.5, %v2601_v56 }
 0x5e8   :  { %3086 = vtanh.f32 %v2599_v54 }
 0x5e9   :  { %3088 = vtanh.f32 %v2612_v46 }
 0x5f2   :  { %v3083_v29 = vpop.eup %3082 }
 0x5f3   :  { %v2605_v12 = vmul.f32 0.5, %v3083_v29 }
 0x5f4   :  { %v3085_v50 = vpop.eup %3084 }
 0x5f5   :  { %v2606_v11 = vadd.f32 0.5, %v2605_v12  ;;  %v2609_v2 = vmul.f32 0.5, %v3085_v50  ;;  %v3087_v52 = vpop.eup %3086 }
 0x5f6   :  { %v3089_v31 = vpop.eup %3088 }
 0x5f7   :  { %v2610_v32 = vadd.f32 0.5, %v2609_v2  ;;  %v2617_v49 = vmul.f32 %v3087_v52, %v2606_v11  ;;  %v2614_v56 = vmul.f32 0.5, %v3089_v31 }
 0x5f9   :  { %v2616_v44 = vmul.f32 %v2610_v32, %v4626_v48  ;;  %v2615_v51 = vadd.f32 0.5, %v2614_v56 }
 0x5fb   :  { %v2618_v54 = vadd.f32 %v2617_v49, %v2616_v44 }
 0x5fd   :  { %3090 = vtanh.f32 %v2618_v54  ;;  %v4727_v43 = vsel %vm3852_vm6, %v2618_v54, %v4626_v48 }
 0x60a   :  { %v3091_v0 = vpop.eup %3090 }
 0x60b   :  { %v2620_v41 = vmul.f32 %v3091_v0, %v2615_v51 }
 0x60d   :  { %v2626_v58 = vmax.f32 %v4639_v55, %v2620_v41  ;;  %v4733_v46 = vsel %vm3852_vm6, %v2620_v41, %v4632_v63  ;;  %v5415_v63 = vld [vmem:[#allocation87_spill] sm:$0xff] }
 0x60e   :  { %2697 = vmatmul.mubr.f32.vlgmr.msra.gmra.mxu0 %v4733_v46  ;;  %2768 = vmatmul.mubr.f32.vlgmr.msra.gmra.mxu1 %v4733_v46 }
 0x60f   :  { %2804 = vmatpush1.msra.mxu0 %v4210_v37  ;;  %2875 = vmatpush1.msra.mxu1 %v4213_v38  ;;  %v4742_v48 = vsel %vm3852_vm6, %v2626_v58, %v4639_v55  ;;  %v5384_v37 = vld [vmem:[#allocation34_spill] sm:$0xff]  ;;  %v5385_v38 = vld [vmem:[#allocation35_spill] sm:$0xff] }
 0x610   :  { %2805 = vmatprep.subr.mxu0 %v4216_v47  ;;  %2876 = vmatprep.subr.mxu1 %v4219_v9  ;;  %v5386_v47 = vld [vmem:[#allocation36_spill] sm:$0xff]  ;;  %v5392_v9 = vld [vmem:[#allocation42_spill] sm:$0xff] }
 0x611   :  { %2806 = vmatpush1.msra.mxu0 %v4222_v13  ;;  %2877 = vmatpush1.msra.mxu1 %v4225_v4  ;;  %v5393_v13 = vld [vmem:[#allocation43_spill] sm:$0xff]  ;;  %v5394_v4 = vld [vmem:[#allocation44_spill] sm:$0xff] }
 0x612   :  { %2807 = vmatprep.subr.mxu0 %v4228_v5  ;;  %2878 = vmatprep.subr.mxu1 %v4231_v42  ;;  %v5395_v5 = vld [vmem:[#allocation45_spill] sm:$0xff]  ;;  %v5396_v42 = vld [vmem:[#allocation46_spill] sm:$0xff] }
 0x613   :  { %2808 = vmatpush1.msra.mxu0 %v4234_v7  ;;  %2879 = vmatpush1.msra.mxu1 %v4237_v15  ;;  %v5397_v7 = vld [vmem:[#allocation47_spill] sm:$0xff]  ;;  %v5398_v15 = vld [vmem:[#allocation48_spill] sm:$0xff] }
 0x614   :  { %2809 = vmatprep.subr.mxu0 %v4240_v35  ;;  %2880 = vmatprep.subr.mxu1 %v4243_v8  ;;  %v5399_v35 = vld [vmem:[#allocation49_spill] sm:$0xff]  ;;  %v5400_v8 = vld [vmem:[#allocation50_spill] sm:$0xff] }
 0x615   :  { %2810 = vmatpush1.msra.mxu0 %v4246_v10  ;;  %2881 = vmatpush1.msra.mxu1 %v4249_v33  ;;  %v5401_v10 = vld [vmem:[#allocation51_spill] sm:$0xff]  ;;  %v5402_v33 = vld [vmem:[#allocation52_spill] sm:$0xff] }
 0x616   :  { %2811 = vmatprep.subr.mxu0 %v4252_v34  ;;  %2882 = vmatprep.subr.mxu1 %v4255_v36  ;;  %v5403_v34 = vmov 0.0   ;;  %v5404_v36 = vld [vmem:[#allocation53_spill] sm:$0xff] }
 0x617   :  { %2812 = vmatpush1.msra.mxu0 %v4258_v14  ;;  %2883 = vmatpush1.msra.mxu1 %v4261_v16  ;;  %v5383_v16 = vld [vmem:[#allocation33_spill] sm:$0xff] }
 0x618   :  { %2813 = vmatprep.subr.mxu0 %v5258_v19  ;;  %2884 = vmatprep.subr.mxu1 %v5259_v57  ;;  %v5405_v19 = vld [vmem:[#allocation88_spill] sm:$0xff] }
 0x619   :  { %2814 = vmatpush1.msra.mxu0 %v5260_v1  ;;  %2885 = vmatpush1.msra.mxu1 %v5261_v18 }
 0x61a   :  { %2815 = vmatprep.subr.mxu0 %v5262_v20  ;;  %2886 = vmatprep.subr.mxu1 %v5263_v21 }
 0x61b   :  { %2816 = vmatpush1.msra.mxu0 %v5264_v22  ;;  %2887 = vmatpush1.msra.mxu1 %v5265_v23  ;;  %v5407_v22 = vld [vmem:[#allocation83_spill] sm:$0xff]  ;;  %v5408_v23 = vld [vmem:[#allocation86_spill] sm:$0xff] }
 0x61c   :  { %2817 = vmatprep.subr.mxu0 %v5266_v24  ;;  %2888 = vmatprep.subr.mxu1 %v5267_v25  ;;  %v5409_v24 = vsel %vm3832_vm10, %v5407_v22, %v5408_v23 }
 0x61d   :  { %2818 = vmatpush1.msra.mxu0 %v5268_v26  ;;  %2889 = vmatpush1.msra.mxu1 %v5269_v27  ;;  %v5411_v27 = vld [vmem:[#allocation84_spill] sm:$0xff] }
 0x61e   :  { %2819 = vmatprep.subr.mxu0 %v5270_v28  ;;  %2890 = vmatprep.subr.mxu1 %v5271_v30  ;;  %v5412_v28 = vld [vmem:[#allocation55_spill] sm:$0xff] }
 0x61f   :  { %2820 = vmatpush1.msra.mxu0 %v5272_v39  ;;  %2891 = vmatpush1.msra.mxu1 %v5273_v40  ;;  %v5413_v30 = vsel %vm3844_vm4, %v5411_v27, %v5412_v28 }
 0x620   :  { %2821 = vmatprep.subr.mxu0 %v4312_v61  ;;  %2892 = vmatprep.subr.mxu1 %v4315_v45  ;;  %v5387_v61 = vld [vmem:[#allocation37_spill] sm:$0xff]  ;;  %v5388_v45 = vld [vmem:[#allocation38_spill] sm:$0xff] }
 0x621   :  { %2822 = vmatpush1.msra.mxu0 %v4318_v3  ;;  %2893 = vmatpush1.msra.mxu1 %v4321_v53  ;;  %v5389_v3 = vld [vmem:[#allocation39_spill] sm:$0xff]  ;;  %v5390_v53 = vld [vmem:[#allocation40_spill] sm:$0xff] }
 0x622   :  { %2823 = vmatprep.subr.mxu0 %v4324_v60  ;;  %2894 = vmatprep.subr.mxu1 %v5310_v62  ;;  %v5391_v60 = vld [vmem:[#allocation41_spill] sm:$0xff] }
 0x623   :  { %2824 = vmatpush1.msra.mxu0 %v5311_v17  ;;  %2895 = vmatpush1.msra.mxu1 %v5383_v16  ;;  %v5414_v17 = vld [vmem:[#allocation85_spill] sm:$0xff] }
 0x624   :  { %2825 = vmatprep.subr.mxu0 %v5384_v37  ;;  %2896 = vmatprep.subr.mxu1 %v5385_v38  ;;  %v5416_v55 = vsel %vm3848_vm2, %v5414_v17, %v5415_v63 }
 0x625   :  { %2826 = vmatpush1.msra.mxu0 %v5386_v47  ;;  %2897 = vmatpush1.msra.mxu1 %v5387_v61 }
 0x626   :  { %2827 = vmatprep.subr.mxu0 %v5388_v45  ;;  %2898 = vmatprep.subr.mxu1 %v5389_v3  ;;  %v5418_v3 = vld [vmem:[#allocation95_spill] sm:$0xff] }
 0x627   :  { %2828 = vmatpush1.msra.mxu0 %v5390_v53  ;;  %2899 = vmatpush1.msra.mxu1 %v5391_v60 }
 0x628   :  { %2829 = vmatprep.subr.mxu0 %v5392_v9  ;;  %2900 = vmatprep.subr.mxu1 %v5393_v13  ;;  %v5419_v13 = vld [vmem:[#allocation89_spill] sm:$0xff] }
 0x629   :  { %2830 = vmatpush1.msra.mxu0 %v5394_v4  ;;  %2901 = vmatpush1.msra.mxu1 %v5395_v5  ;;  %v5420_v4 = vld [vmem:[#allocation92_spill] sm:$0xff] }
 0x62a   :  { %2831 = vmatprep.subr.mxu0 %v5396_v42  ;;  %2902 = vmatprep.subr.mxu1 %v5397_v7  ;;  %v5421_v5 = vsel %vm3832_vm10, %v5419_v13, %v5420_v4  ;;  %v5422_v42 = vld [vmem:[#allocation90_spill] sm:$0xff]  ;;  %v5423_v7 = vld [vmem:[#allocation93_spill] sm:$0xff] }
 0x62b   :  { %2832 = vmatpush1.msra.mxu0 %v5398_v15  ;;  %2903 = vmatpush1.msra.mxu1 %v5399_v35  ;;  %v5424_v15 = vsel %vm3844_vm4, %v5422_v42, %v5423_v7 }
 0x62c   :  { %2833 = vmatprep.subr.mxu0 %v5400_v8  ;;  %2904 = vmatprep.subr.mxu1 %v5401_v10  ;;  %v5425_v10 = vld [vmem:[#allocation91_spill] sm:$0xff] }
 0x62d   :  { %2834 = vmatpush1.msra.mxu0 %v5402_v33  ;;  %2867 = vmatprep.mubr.f32.mxu0 %v5403_v34  ;;  %v5426_v33 = vld [vmem:[#allocation94_spill] sm:$0xff] }
 0x62e   :  { %2905 = vmatpush1.msra.mxu1 %v5404_v36  ;;  %2938 = vmatprep.mubr.f32.mxu1 %v5403_v34  ;;  %v5427_v34 = vsel %vm3848_vm2, %v5425_v10, %v5426_v33 }
 0x6ce   :  { %v2698_v14 = vpop.f32.mrf.mxu0  ;;  %v2769_v1 = vpop.f32.mrf.mxu1 }
 0x6cf   :  { %v2699_v57 = vadd.f32 %v2698_v14, %v5405_v19  ;;  %v2770_v39 = vadd.f32 %v2769_v1, %v5413_v30 }
 0x6d0   :  { %v2700_v18 = vpop.f32.mrf.mxu0  ;;  %v2771_v62 = vpop.f32.mrf.mxu1 }
 0x6d1   :  { %v2774_v20 = vmul.f32 0.5, %v2699_v57  ;;  %v2701_v25 = vadd.f32 %v2700_v18, %v5409_v24  ;;  %v2772_v52 = vadd.f32 %v2771_v62, %v5416_v55 }
 0x6d3   :  { %3092 = vtanh.f32 %v2774_v20  ;;  %v2778_v40 = vmul.f32 0.5, %v2701_v25  ;;  %v2783_v29 = vmul.f32 0.5, %v2772_v52 }
 0x6d5   :  { %3094 = vtanh.f32 %v2778_v40 }
 0x6d6   :  { %3096 = vtanh.f32 %v2770_v39 }
 0x6d7   :  { %3098 = vtanh.f32 %v2783_v29 }
 0x6e0   :  { %v3093_v12 = vpop.eup %3092 }
 0x6e1   :  { %v2776_v50 = vmul.f32 0.5, %v3093_v12 }
 0x6e2   :  { %v3095_v11 = vpop.eup %3094 }
 0x6e3   :  { %v2777_v2 = vadd.f32 0.5, %v2776_v50  ;;  %v2780_v32 = vmul.f32 0.5, %v3095_v11  ;;  %v3097_v49 = vpop.eup %3096 }
 0x6e4   :  { %v3099_v0 = vpop.eup %3098 }
 0x6e5   :  { %v2781_v44 = vadd.f32 0.5, %v2780_v32  ;;  %v2788_v54 = vmul.f32 %v3097_v49, %v2777_v2  ;;  %v2785_v41 = vmul.f32 0.5, %v3099_v0 }
 0x6e7   :  { %v2787_v6 = vmul.f32 %v2781_v44, %v4727_v43  ;;  %v2786_v58 = vadd.f32 0.5, %v2785_v41 }
 0x6e9   :  { %v2789_v31 = vadd.f32 %v2788_v54, %v2787_v6 }
 0x6eb   :  { %3100 = vtanh.f32 %v2789_v31  ;;  %v2796_v51 = vsel %vm3814_vm5, %v2789_v31, %v4727_v43 }
 0x6f8   :  { %v3101_v16 = vpop.eup %3100 }
 0x6f9   :  { %v2791_v37 = vmul.f32 %v3101_v16, %v2786_v58 }
 0x6fb   :  { %v2795_v38 = vsel %vm3814_vm5, %v2791_v37, %v4733_v46  ;;  %v2797_v47 = vmax.f32 %v4742_v48, %v2791_v37 }
 0x6fc   :  { %2868 = vmatmul.mubr.f32.vlgmr.msra.gmra.mxu0 %v2795_v38  ;;  %2939 = vmatmul.mubr.f32.vlgmr.msra.gmra.mxu1 %v2795_v38 }
 0x6fd   :  { %v2798_v61 = vsel %vm3814_vm5, %v2797_v47, %v4742_v48 }
 0x7bc   :  { %v2869_v45 = vpop.f32.mrf.mxu0  ;;  %v2940_v53 = vpop.f32.mrf.mxu1 }
 0x7bd   :  { %v2870_v43 = vadd.f32 %v2869_v45, %v5418_v3  ;;  %v2941_v35 = vadd.f32 %v2940_v53, %v5424_v15 }
 0x7be   :  { %v2871_v60 = vpop.f32.mrf.mxu0  ;;  %v2942_v8 = vpop.f32.mrf.mxu1 }
 0x7bf   :  { %v2945_v9 = vmul.f32 0.5, %v2870_v43  ;;  %v2872_v46 = vadd.f32 %v2871_v60, %v5421_v5  ;;  %v2943_v36 = vadd.f32 %v2942_v8, %v5427_v34 }
 0x7c1   :  { %3102 = vtanh.f32 %v2945_v9  ;;  %v2949_v48 = vmul.f32 0.5, %v2872_v46  ;;  %v2954_v14 = vmul.f32 0.5, %v2943_v36 }
 0x7c3   :  { %3104 = vtanh.f32 %v2949_v48 }
 0x7c4   :  { %3106 = vtanh.f32 %v2941_v35 }
 0x7c5   :  { %3108 = vtanh.f32 %v2954_v14 }
 0x7ce   :  { %v3103_v19 = vpop.eup %3102 }
 0x7cf   :  { %v2947_v57 = vmul.f32 0.5, %v3103_v19 }
 0x7d0   :  { %v3105_v1 = vpop.eup %3104 }
 0x7d1   :  { %v2948_v18 = vadd.f32 0.5, %v2947_v57  ;;  %v2951_v20 = vmul.f32 0.5, %v3105_v1  ;;  %v3107_v21 = vpop.eup %3106 }
 0x7d2   :  { %v3109_v26 = vpop.eup %3108 }
 0x7d3   :  { %v2952_v22 = vadd.f32 0.5, %v2951_v20  ;;  %v2959_v23 = vmul.f32 %v3107_v21, %v2948_v18  ;;  %v2956_v27 = vmul.f32 0.5, %v3109_v26 }
 0x7d5   :  { %v2958_v24 = vmul.f32 %v2952_v22, %v2796_v51  ;;  %v2957_v59 = vadd.f32 0.5, %v2956_v27 }
 0x7d7   :  { %v2960_v25 = vadd.f32 %v2959_v23, %v2958_v24 }
 0x7d9   :  { %3110 = vtanh.f32 %v2960_v25 }
 0x7e6   :  { %v3111_v28 = vpop.eup %3110 }
 0x7e7   :  { %v2962_v30 = vmul.f32 %v3111_v28, %v2957_v59 }
 0x7e9   :  { %v2966_v39 = vmax.f32 %v2798_v61, %v2962_v30 }
 0x7eb   :  { %v2967_v17 = vsel %vm5430_vm9, %v2966_v39, %v2798_v61 }
 0x7ec   :  { %2968 = vst [vmem:[#allocation9] sm:$0xf] %v2967_v17 }
 0x7ed   :  { %3247 = shalt.err (!%p3244_p5)
}
 0x7ee   :  { %2978 = dma.vmem_to_hbm [thread:$0]  %s2976_s12, 64, %s4862_s5, [#allocation5]  }
 0x7ef   :  { %3260 = dma.done.wait [#allocation5], 64  }
 0x7f0   :  { %3261 = vsyncadd [#allocation5], 4294967232 }
 0x7f1   :  { %2982 = vsyncpa [#allocation4], 1 }
 0x7f2   :  { %2983 = vsyncpa [#allocation7], 1 }
 0x7f3   :  { %2984 = vsyncpa [#allocation5], 1 }

</bundles_post_ra>
